<compile_context>
chip_gen: v5e
topology: v5e:2x2
jax: 0.10.0
libtpu: 0.0.40
codegen_flags: <defaults>
</compile_context>

<pallas_src>
import functools

import jax
import jax.numpy as jnp
from jax.experimental import pallas as pl
from jax.experimental.pallas import tpu as pltpu

EPS = 1e-5
LANE = 128

_COMPILER_PARAMS = pltpu.CompilerParams(
    dimension_semantics=("parallel",),
    vmem_limit_bytes=32 * 1024 * 1024,
)


def _ceil_to(v, m):
    return ((v + m - 1) // m) * m


def _pick_row_tile(m, max_tile=256):
    # Largest power-of-two row tile <= max_tile that divides M.
    t = min(max_tile, m)
    while t > 1 and m % t:
        t //= 2
    return t


# ----------------------------- Pallas kernels ------------------------------
def _mm_bias_act_kernel(x_ref, w_ref, b_ref, o_ref, *, relu):
    # (TM, K)bf16 @ (K, C)bf16 on the MXU, f32 accumulate, folded-BN bias (+ReLU).
    acc = jnp.dot(x_ref[...], w_ref[...], preferred_element_type=jnp.float32)
    acc = acc + b_ref[...]
    if relu:
        acc = jnp.maximum(acc, 0.0)
    o_ref[...] = acc.astype(o_ref.dtype)


def _mm_bias_residual_kernel(h_ref, w_ref, b_ref, r_ref, o_ref):
    # conv3 (1x1) + BN + identity residual + ReLU.
    acc = jnp.dot(h_ref[...], w_ref[...], preferred_element_type=jnp.float32)
    acc = acc + b_ref[...] + r_ref[...].astype(jnp.float32)
    o_ref[...] = jnp.maximum(acc, 0.0).astype(o_ref.dtype)


def _mm_bias_down_residual_kernel(h_ref, w_ref, b_ref, xd_ref, wd_ref, bd_ref, o_ref):
    # conv3 (1x1) + BN + fused 1x1/stride downsample projection + add + ReLU.
    acc = jnp.dot(h_ref[...], w_ref[...], preferred_element_type=jnp.float32) + b_ref[...]
    res = jnp.dot(xd_ref[...], wd_ref[...], preferred_element_type=jnp.float32) + bd_ref[...]
    o_ref[...] = jnp.maximum(acc + res, 0.0).astype(o_ref.dtype)


def _conv3x3_kernel(x_ref, w_ref, b_ref, o_ref, *, stride, ho, wo):
    # Implicit-GEMM 3x3 conv for one image:
    #   x_ref: (stride*stride, Hs, Ws, Cin_p) f32 -- space-to-depth'd, zero
    #          spatially padded activations (one parity sub-image per row).
    #   w_ref: (9, Cin_p, Cout_p) bf16 (BN scale folded in), resident.
    #   b_ref: (1, Cout_p) f32 folded-BN bias.
    #   o_ref: (ho*wo, Cout_p) bf16.
    cin = x_ref.shape[-1]
    cout = o_ref.shape[-1]
    acc = jnp.zeros((ho * wo, cout), jnp.float32)
    for i in range(3):
        for j in range(3):
            p = (i % stride) * stride + (j % stride)      # parity sub-image
            i0, j0 = i // stride, j // stride             # offset inside it
            tap = x_ref[p, i0:i0 + ho, j0:j0 + wo, :]     # (ho, wo, cin) f32
            lhs = tap.reshape(ho * wo, cin).astype(jnp.bfloat16)
            acc = acc + jnp.dot(lhs, w_ref[i * 3 + j],
                                preferred_element_type=jnp.float32)
    acc = acc + b_ref[...]
    o_ref[...] = jnp.maximum(acc, 0.0).astype(o_ref.dtype)


# ------------------------------ kernel wrappers -----------------------------
def _matmul_bias_act(x, wmat, bias, *, relu, out_dtype):
    m, k = x.shape
    n_out = wmat.shape[1]
    tm = _pick_row_tile(m)
    kern = functools.partial(_mm_bias_act_kernel, relu=relu)
    return pl.pallas_call(
        kern,
        out_shape=jax.ShapeDtypeStruct((m, n_out), out_dtype),
        grid=(m // tm,),
        in_specs=[
            pl.BlockSpec((tm, k), lambda i: (i, 0)),
            pl.BlockSpec((k, n_out), lambda i: (0, 0)),     # resident weights
            pl.BlockSpec((1, n_out), lambda i: (0, 0)),     # resident bias
        ],
        out_specs=pl.BlockSpec((tm, n_out), lambda i: (i, 0)),
        compiler_params=_COMPILER_PARAMS,
    )(x, wmat, bias)


def _matmul_bias_residual(h, wmat, bias, res, *, out_dtype=jnp.float32):
    m, k = h.shape
    n_out = wmat.shape[1]
    tm = _pick_row_tile(m)
    return pl.pallas_call(
        _mm_bias_residual_kernel,
        out_shape=jax.ShapeDtypeStruct((m, n_out), out_dtype),
        grid=(m // tm,),
        in_specs=[
            pl.BlockSpec((tm, k), lambda i: (i, 0)),
            pl.BlockSpec((k, n_out), lambda i: (0, 0)),
            pl.BlockSpec((1, n_out), lambda i: (0, 0)),
            pl.BlockSpec((tm, n_out), lambda i: (i, 0)),
        ],
        out_specs=pl.BlockSpec((tm, n_out), lambda i: (i, 0)),
        compiler_params=_COMPILER_PARAMS,
    )(h, wmat, bias, res)


def _matmul_bias_down_residual(h, wmat, bias, xd, wd, bd, *, out_dtype=jnp.float32):
    m, k = h.shape
    n_out = wmat.shape[1]
    kd = xd.shape[1]
    tm = _pick_row_tile(m)
    return pl.pallas_call(
        _mm_bias_down_residual_kernel,
        out_shape=jax.ShapeDtypeStruct((m, n_out), out_dtype),
        grid=(m // tm,),
        in_specs=[
            pl.BlockSpec((tm, k), lambda i: (i, 0)),
            pl.BlockSpec((k, n_out), lambda i: (0, 0)),
            pl.BlockSpec((1, n_out), lambda i: (0, 0)),
            pl.BlockSpec((tm, kd), lambda i: (i, 0)),
            pl.BlockSpec((kd, n_out), lambda i: (0, 0)),
            pl.BlockSpec((1, n_out), lambda i: (0, 0)),
        ],
        out_specs=pl.BlockSpec((tm, n_out), lambda i: (i, 0)),
        compiler_params=_COMPILER_PARAMS,
    )(h, wmat, bias, xd, wd, bd)


def _conv3x3_bn_relu(x_nhwc, w_taps, bias, *, stride):
    """3x3 conv (pad=1, given stride) + folded BN + ReLU as an implicit GEMM.

    x_nhwc: (N, H, W, Cin_p) f32, lane-padded channels.
    w_taps: (9, Cin_p, Cout_p) bf16, BN scale folded in.
    Returns ((N*Ho*Wo, Cout_p) bf16, (Ho, Wo)).
    """
    n, h, w, cp = x_nhwc.shape
    pad = 1
    ho = (h + 2 * pad - 3) // stride + 1
    wo = (w + 2 * pad - 3) // stride + 1
    hp = _ceil_to(h + 2 * pad, stride)
    wp = _ceil_to(w + 2 * pad, stride)
    xp = jnp.pad(x_nhwc, ((0, 0), (pad, hp - h - pad), (pad, wp - w - pad), (0, 0)))
    hs, ws = hp // stride, wp // stride
    # Space-to-depth by the conv stride so each of the 9 taps becomes a
    # unit-stride static slice of one parity sub-image inside the kernel.
    xs = xp.reshape(n, hs, stride, ws, stride, cp)
    xs = xs.transpose(0, 2, 4, 1, 3, 5).reshape(n * stride * stride, hs, ws, cp)

    s2 = stride * stride
    coutp = w_taps.shape[-1]
    kern = functools.partial(_conv3x3_kernel, stride=stride, ho=ho, wo=wo)
    out = pl.pallas_call(
        kern,
        out_shape=jax.ShapeDtypeStruct((n * ho * wo, coutp), jnp.bfloat16),
        grid=(n,),
        in_specs=[
            pl.BlockSpec((s2, hs, ws, cp), lambda b: (b, 0, 0, 0)),
            pl.BlockSpec((9, cp, coutp), lambda b: (0, 0, 0)),   # resident weights
            pl.BlockSpec((1, coutp), lambda b: (0, 0)),          # resident bias
        ],
        out_specs=pl.BlockSpec((ho * wo, coutp), lambda b: (b, 0)),
        compiler_params=_COMPILER_PARAMS,
    )(xs, w_taps, bias)
    return out, (ho, wo)


# ---------------------- parameters (deterministic synthetic) ----------------
def _make_conv_bn(key, kh, kw, cin, cout):
    k1, k2, k3, k4, k5 = jax.random.split(key, 5)
    return {
        "w": jax.random.normal(k1, (kh, kw, cin, cout), jnp.float32) * 0.05,
        "gamma": jax.random.uniform(k2, (cout,), jnp.float32, 0.5, 1.5),
        "beta": jax.random.normal(k3, (cout,), jnp.float32) * 0.1,
        "mean": jax.random.normal(k4, (cout,), jnp.float32) * 0.1,
        "var": jax.random.uniform(k5, (cout,), jnp.float32, 0.5, 1.5),
    }


def make_bottleneck_params(key, *, inplanes, planes, stride, downsample):
    expansion = 4
    k1, k2, k3, k4 = jax.random.split(key, 4)
    raw = {
        "stride": stride,
        "conv1": _make_conv_bn(k1, 1, 1, inplanes, planes),
        "conv2": _make_conv_bn(k2, 3, 3, planes, planes),
        "conv3": _make_conv_bn(k3, 1, 1, planes, planes * expansion),
    }
    if downsample:
        raw["down"] = _make_conv_bn(k4, 1, 1, inplanes, planes * expansion)
    return raw


def _fold_conv_bn(cb):
    scale = cb["gamma"] / jnp.sqrt(cb["var"] + EPS)
    w = cb["w"] * scale                       # fold BN scale into the weights
    b = cb["beta"] - cb["mean"] * scale
    return w, b


def prepare_params(raw):
    """Fold BN, pad channels to 128 lanes, flatten weights for the kernels."""
    inplanes = raw["conv1"]["w"].shape[2]
    planes = raw["conv1"]["w"].shape[3]
    cout = raw["conv3"]["w"].shape[3]
    cin_p = _ceil_to(inplanes, LANE)
    pl_p = _ceil_to(planes, LANE)
    cout_p = _ceil_to(cout, LANE)

    def fold_pad(cb, cin_pad, cout_pad):
        w, b = _fold_conv_bn(cb)
        kh, kw, ci, co = w.shape
        w = jnp.pad(w.reshape(kh * kw, ci, co),
                    ((0, 0), (0, cin_pad - ci), (0, cout_pad - co)))
        b = jnp.pad(b, (0, cout_pad - co)).reshape(1, cout_pad).astype(jnp.float32)
        return w.astype(jnp.bfloat16), b

    w1, b1 = fold_pad(raw["conv1"], cin_p, pl_p)
    w2, b2 = fold_pad(raw["conv2"], pl_p, pl_p)
    w3, b3 = fold_pad(raw["conv3"], pl_p, cout_p)
    prep = {
        "stride": raw["stride"],
        "cout": cout,
        "cin_p": cin_p, "planes_p": pl_p, "cout_p": cout_p,
        "w1": w1[0], "b1": b1,
        "w2": w2, "b2": b2,
        "w3": w3[0], "b3": b3,
    }
    if "down" in raw:
        wd, bd = fold_pad(raw["down"], cin_p, cout_p)
        prep["wd"] = wd[0]
        prep["bd"] = bd
    return prep


# -------------------------------- forward ----------------------------------
def bottleneck_forward(x_nchw, prep):
    stride = prep["stride"]
    x = jnp.transpose(x_nchw, (0, 2, 3, 1)).astype(jnp.float32)   # NCHW -> NHWC
    n, h, w, cin = x.shape
    cin_p = prep["cin_p"]
    x_pad = jnp.pad(x, ((0, 0), (0, 0), (0, 0), (0, cin_p - cin)))
    x_bf = x_pad.astype(jnp.bfloat16)
    m1 = n * h * w

    # conv1 (1x1) + BN + ReLU.  Output kept in f32 so the 3x3 kernel's tap
    # reshapes stay on native (8,128) f32 tiles; the matmul itself is bf16.
    h1 = _matmul_bias_act(x_bf.reshape(m1, cin_p), prep["w1"], prep["b1"],
                          relu=True, out_dtype=jnp.float32)
    h1 = h1.reshape(n, h, w, prep["planes_p"])

    # conv2 (3x3, stride) + BN + ReLU, implicit GEMM.
    h2, (ho, wo) = _conv3x3_bn_relu(h1, prep["w2"], prep["b2"], stride=stride)

    # conv3 (1x1) + BN + residual (+ fused 1x1/stride downsample) + ReLU.
    if "wd" in prep:
        xd = x_bf[:, ::stride, ::stride, :].reshape(n * ho * wo, cin_p)
        out = _matmul_bias_down_residual(h2, prep["w3"], prep["b3"],
                                         xd, prep["wd"], prep["bd"])
    else:
        assert stride == 1 and prep["cin_p"] == prep["cout_p"]
        res = x_pad.reshape(m1, cin_p)                 # identity residual, f32
        out = _matmul_bias_residual(h2, prep["w3"], prep["b3"], res)

    out = out.reshape(n, ho, wo, prep["cout_p"])[..., : prep["cout"]]
    return jnp.transpose(out, (0, 3, 1, 2))            # NHWC -> NCHW


# ---------------------------- pure-JAX reference ----------------------------
def _conv2d_ref(x_nhwc, w_hwio, stride, pad):
    return jax.lax.conv_general_dilated(
        x_nhwc, w_hwio, window_strides=(stride, stride),
        padding=((pad, pad), (pad, pad)),
        dimension_numbers=("NHWC", "HWIO", "NHWC"))


def _bn_ref(x, p):
    return (x - p["mean"]) / jnp.sqrt(p["var"] + EPS) * p["gamma"] + p["beta"]


def bottleneck_reference(x_nchw, raw):
    x = jnp.transpose(x_nchw, (0, 2, 3, 1)).astype(jnp.float32)
    out = jax.nn.relu(_bn_ref(_conv2d_ref(x, raw["conv1"]["w"], 1, 0), raw["conv1"]))
    out = jax.nn.relu(_bn_ref(_conv2d_ref(out, raw["conv2"]["w"], raw["stride"], 1),
                              raw["conv2"]))
    out = _bn_ref(_conv2d_ref(out, raw["conv3"]["w"], 1, 0), raw["conv3"])
    if "down" in raw:
        res = _bn_ref(_conv2d_ref(x, raw["down"]["w"], raw["stride"], 0), raw["down"])
    else:
        res = x
    out = jax.nn.relu(out + res)
    return jnp.transpose(out, (0, 3, 1, 2))


# ---------------------------------- main ------------------------------------
if __name__ == "__main__":
    key = jax.random.PRNGKey(0)
    k_a, k_b, kx_a, kx_b = jax.random.split(key, 4)

    # Block A: identity residual (inplanes == planes * expansion, stride 1).
    raw_a = make_bottleneck_params(k_a, inplanes=64, planes=16, stride=1,
                                   downsample=False)
    prep_a = prepare_params(raw_a)
    x_a = jax.random.normal(kx_a, (2, 64, 16, 16), jnp.float32)

    # Block B: stride-2 with a 1x1 downsample projection (fused into conv3 kernel).
    raw_b = make_bottleneck_params(k_b, inplanes=32, planes=16, stride=2,
                                   downsample=True)
    prep_b = prepare_params(raw_b)
    x_b = jax.random.normal(kx_b, (2, 32, 16, 16), jnp.float32)

    fwd_a = jax.jit(lambda x: bottleneck_forward(x, prep_a))
    fwd_b = jax.jit(lambda x: bottleneck_forward(x, prep_b))

    out_a = jax.block_until_ready(fwd_a(x_a))
    out_b = jax.block_until_ready(fwd_b(x_b))
    assert out_a.shape == (2, 64, 16, 16), out_a.shape
    assert out_b.shape == (2, 64, 8, 8), out_b.shape

    # Numerical check against the f32 reference (bf16 MXU inputs => loose tol).
    ref_a = bottleneck_reference(x_a, raw_a)
    ref_b = bottleneck_reference(x_b, raw_b)
    err_a = float(jnp.max(jnp.abs(out_a - ref_a)))
    err_b = float(jnp.max(jnp.abs(out_b - ref_b)))
    assert err_a < 0.1 and err_b < 0.1, (err_a, err_b)

    print("KERNEL_OK")
</pallas_src>

<mosaic_0001>
module attributes {stable_mosaic.version = 11 : i64} {
  func.func @_conv3x3_kernel(%arg0: i32, %arg1: memref<1x18x18x128xf32, #tpu.memory_space<vmem>>, %arg2: memref<9x128x128xbf16, #tpu.memory_space<vmem>>, %arg3: memref<1x128xf32, #tpu.memory_space<vmem>>, %arg4: memref<256x128xbf16, #tpu.memory_space<vmem>>) attributes {dimension_semantics = [#tpu.dimension_semantics<parallel>], iteration_bounds = array<i64: 2>, scalar_prefetch = 0 : i64, scratch_operands = 0 : i64, tpu.core_type = #tpu.core_type<tc>, window_params = [{transform_indices = @transform_0, window_bounds = array<i64: 1, 18, 18, 128>}, {pipeline_mode = #tpu.pipeline_mode<synchronous>, transform_indices = @transform_1, window_bounds = array<i64: 9, 128, 128>}, {pipeline_mode = #tpu.pipeline_mode<synchronous>, transform_indices = @transform_2, window_bounds = array<i64: 1, 128>}, {transform_indices = @transform_3, window_bounds = array<i64: 256, 128>}]} {
    %cst = arith.constant 0.000000e+00 : f32
    %0 = vector.broadcast %cst : f32 to vector<256x128xf32>
    %c0 = arith.constant 0 : index
    %c0_0 = arith.constant 0 : index
    %c0_1 = arith.constant 0 : index
    %c0_2 = arith.constant 0 : index
    %1 = vector.load %arg1[%c0, %c0_0, %c0_1, %c0_2] : memref<1x18x18x128xf32, #tpu.memory_space<vmem>>, vector<1x16x16x128xf32>
    %2 = vector.shape_cast %1 : vector<1x16x16x128xf32> to vector<16x16x128xf32>
    %3 = vector.shape_cast %2 : vector<16x16x128xf32> to vector<256x128xf32>
    %4 = arith.truncf %3 : vector<256x128xf32> to vector<256x128xbf16>
    %c0_3 = arith.constant 0 : index
    %c0_4 = arith.constant 0 : index
    %c0_5 = arith.constant 0 : index
    %5 = vector.load %arg2[%c0_3, %c0_4, %c0_5] : memref<9x128x128xbf16, #tpu.memory_space<vmem>>, vector<1x128x128xbf16>
    %6 = vector.shape_cast %5 : vector<1x128x128xbf16> to vector<128x128xbf16>
    %cst_6 = arith.constant dense<0.000000e+00> : vector<256x128xf32>
    %7 = tpu.matmul %4, %6, %cst_6 {dimension_numbers = #tpu.dot_dimension_numbers<[1], [0], [0], [1], [0, 0, 1, 1], [], []>} : vector<256x128xbf16>, vector<128x128xbf16>, vector<256x128xf32> -> vector<256x128xf32>
    %8 = arith.addf %0, %7 : vector<256x128xf32>
    %c0_7 = arith.constant 0 : index
    %c0_8 = arith.constant 0 : index
    %c1 = arith.constant 1 : index
    %c0_9 = arith.constant 0 : index
    %9 = vector.load %arg1[%c0_7, %c0_8, %c1, %c0_9] : memref<1x18x18x128xf32, #tpu.memory_space<vmem>>, vector<1x16x16x128xf32>
    %10 = vector.shape_cast %9 : vector<1x16x16x128xf32> to vector<16x16x128xf32>
    %11 = vector.shape_cast %10 : vector<16x16x128xf32> to vector<256x128xf32>
    %12 = arith.truncf %11 : vector<256x128xf32> to vector<256x128xbf16>
    %c1_10 = arith.constant 1 : index
    %c0_11 = arith.constant 0 : index
    %c0_12 = arith.constant 0 : index
    %13 = vector.load %arg2[%c1_10, %c0_11, %c0_12] : memref<9x128x128xbf16, #tpu.memory_space<vmem>>, vector<1x128x128xbf16>
    %14 = vector.shape_cast %13 : vector<1x128x128xbf16> to vector<128x128xbf16>
    %cst_13 = arith.constant dense<0.000000e+00> : vector<256x128xf32>
    %15 = tpu.matmul %12, %14, %cst_13 {dimension_numbers = #tpu.dot_dimension_numbers<[1], [0], [0], [1], [0, 0, 1, 1], [], []>} : vector<256x128xbf16>, vector<128x128xbf16>, vector<256x128xf32> -> vector<256x128xf32>
    %16 = arith.addf %8, %15 : vector<256x128xf32>
    %c0_14 = arith.constant 0 : index
    %c0_15 = arith.constant 0 : index
    %c2 = arith.constant 2 : index
    %c0_16 = arith.constant 0 : index
    %17 = vector.load %arg1[%c0_14, %c0_15, %c2, %c0_16] : memref<1x18x18x128xf32, #tpu.memory_space<vmem>>, vector<1x16x16x128xf32>
    %18 = vector.shape_cast %17 : vector<1x16x16x128xf32> to vector<16x16x128xf32>
    %19 = vector.shape_cast %18 : vector<16x16x128xf32> to vector<256x128xf32>
    %20 = arith.truncf %19 : vector<256x128xf32> to vector<256x128xbf16>
    %c2_17 = arith.constant 2 : index
    %c0_18 = arith.constant 0 : index
    %c0_19 = arith.constant 0 : index
    %21 = vector.load %arg2[%c2_17, %c0_18, %c0_19] : memref<9x128x128xbf16, #tpu.memory_space<vmem>>, vector<1x128x128xbf16>
    %22 = vector.shape_cast %21 : vector<1x128x128xbf16> to vector<128x128xbf16>
    %cst_20 = arith.constant dense<0.000000e+00> : vector<256x128xf32>
    %23 = tpu.matmul %20, %22, %cst_20 {dimension_numbers = #tpu.dot_dimension_numbers<[1], [0], [0], [1], [0, 0, 1, 1], [], []>} : vector<256x128xbf16>, vector<128x128xbf16>, vector<256x128xf32> -> vector<256x128xf32>
    %24 = arith.addf %16, %23 : vector<256x128xf32>
    %c0_21 = arith.constant 0 : index
    %c1_22 = arith.constant 1 : index
    %c0_23 = arith.constant 0 : index
    %c0_24 = arith.constant 0 : index
    %25 = vector.load %arg1[%c0_21, %c1_22, %c0_23, %c0_24] : memref<1x18x18x128xf32, #tpu.memory_space<vmem>>, vector<1x16x16x128xf32>
    %26 = vector.shape_cast %25 : vector<1x16x16x128xf32> to vector<16x16x128xf32>
    %27 = vector.shape_cast %26 : vector<16x16x128xf32> to vector<256x128xf32>
    %28 = arith.truncf %27 : vector<256x128xf32> to vector<256x128xbf16>
    %c3 = arith.constant 3 : index
    %c0_25 = arith.constant 0 : index
    %c0_26 = arith.constant 0 : index
    %29 = vector.load %arg2[%c3, %c0_25, %c0_26] : memref<9x128x128xbf16, #tpu.memory_space<vmem>>, vector<1x128x128xbf16>
    %30 = vector.shape_cast %29 : vector<1x128x128xbf16> to vector<128x128xbf16>
    %cst_27 = arith.constant dense<0.000000e+00> : vector<256x128xf32>
    %31 = tpu.matmul %28, %30, %cst_27 {dimension_numbers = #tpu.dot_dimension_numbers<[1], [0], [0], [1], [0, 0, 1, 1], [], []>} : vector<256x128xbf16>, vector<128x128xbf16>, vector<256x128xf32> -> vector<256x128xf32>
    %32 = arith.addf %24, %31 : vector<256x128xf32>
    %c0_28 = arith.constant 0 : index
    %c1_29 = arith.constant 1 : index
    %c1_30 = arith.constant 1 : index
    %c0_31 = arith.constant 0 : index
    %33 = vector.load %arg1[%c0_28, %c1_29, %c1_30, %c0_31] : memref<1x18x18x128xf32, #tpu.memory_space<vmem>>, vector<1x16x16x128xf32>
    %34 = vector.shape_cast %33 : vector<1x16x16x128xf32> to vector<16x16x128xf32>
    %35 = vector.shape_cast %34 : vector<16x16x128xf32> to vector<256x128xf32>
    %36 = arith.truncf %35 : vector<256x128xf32> to vector<256x128xbf16>
    %c4 = arith.constant 4 : index
    %c0_32 = arith.constant 0 : index
    %c0_33 = arith.constant 0 : index
    %37 = vector.load %arg2[%c4, %c0_32, %c0_33] : memref<9x128x128xbf16, #tpu.memory_space<vmem>>, vector<1x128x128xbf16>
    %38 = vector.shape_cast %37 : vector<1x128x128xbf16> to vector<128x128xbf16>
    %cst_34 = arith.constant dense<0.000000e+00> : vector<256x128xf32>
    %39 = tpu.matmul %36, %38, %cst_34 {dimension_numbers = #tpu.dot_dimension_numbers<[1], [0], [0], [1], [0, 0, 1, 1], [], []>} : vector<256x128xbf16>, vector<128x128xbf16>, vector<256x128xf32> -> vector<256x128xf32>
    %40 = arith.addf %32, %39 : vector<256x128xf32>
    %c0_35 = arith.constant 0 : index
    %c1_36 = arith.constant 1 : index
    %c2_37 = arith.constant 2 : index
    %c0_38 = arith.constant 0 : index
    %41 = vector.load %arg1[%c0_35, %c1_36, %c2_37, %c0_38] : memref<1x18x18x128xf32, #tpu.memory_space<vmem>>, vector<1x16x16x128xf32>
    %42 = vector.shape_cast %41 : vector<1x16x16x128xf32> to vector<16x16x128xf32>
    %43 = vector.shape_cast %42 : vector<16x16x128xf32> to vector<256x128xf32>
    %44 = arith.truncf %43 : vector<256x128xf32> to vector<256x128xbf16>
    %c5 = arith.constant 5 : index
    %c0_39 = arith.constant 0 : index
    %c0_40 = arith.constant 0 : index
    %45 = vector.load %arg2[%c5, %c0_39, %c0_40] : memref<9x128x128xbf16, #tpu.memory_space<vmem>>, vector<1x128x128xbf16>
    %46 = vector.shape_cast %45 : vector<1x128x128xbf16> to vector<128x128xbf16>
    %cst_41 = arith.constant dense<0.000000e+00> : vector<256x128xf32>
    %47 = tpu.matmul %44, %46, %cst_41 {dimension_numbers = #tpu.dot_dimension_numbers<[1], [0], [0], [1], [0, 0, 1, 1], [], []>} : vector<256x128xbf16>, vector<128x128xbf16>, vector<256x128xf32> -> vector<256x128xf32>
    %48 = arith.addf %40, %47 : vector<256x128xf32>
    %c0_42 = arith.constant 0 : index
    %c2_43 = arith.constant 2 : index
    %c0_44 = arith.constant 0 : index
    %c0_45 = arith.constant 0 : index
    %49 = vector.load %arg1[%c0_42, %c2_43, %c0_44, %c0_45] : memref<1x18x18x128xf32, #tpu.memory_space<vmem>>, vector<1x16x16x128xf32>
    %50 = vector.shape_cast %49 : vector<1x16x16x128xf32> to vector<16x16x128xf32>
    %51 = vector.shape_cast %50 : vector<16x16x128xf32> to vector<256x128xf32>
    %52 = arith.truncf %51 : vector<256x128xf32> to vector<256x128xbf16>
    %c6 = arith.constant 6 : index
    %c0_46 = arith.constant 0 : index
    %c0_47 = arith.constant 0 : index
    %53 = vector.load %arg2[%c6, %c0_46, %c0_47] : memref<9x128x128xbf16, #tpu.memory_space<vmem>>, vector<1x128x128xbf16>
    %54 = vector.shape_cast %53 : vector<1x128x128xbf16> to vector<128x128xbf16>
    %cst_48 = arith.constant dense<0.000000e+00> : vector<256x128xf32>
    %55 = tpu.matmul %52, %54, %cst_48 {dimension_numbers = #tpu.dot_dimension_numbers<[1], [0], [0], [1], [0, 0, 1, 1], [], []>} : vector<256x128xbf16>, vector<128x128xbf16>, vector<256x128xf32> -> vector<256x128xf32>
    %56 = arith.addf %48, %55 : vector<256x128xf32>
    %c0_49 = arith.constant 0 : index
    %c2_50 = arith.constant 2 : index
    %c1_51 = arith.constant 1 : index
    %c0_52 = arith.constant 0 : index
    %57 = vector.load %arg1[%c0_49, %c2_50, %c1_51, %c0_52] : memref<1x18x18x128xf32, #tpu.memory_space<vmem>>, vector<1x16x16x128xf32>
    %58 = vector.shape_cast %57 : vector<1x16x16x128xf32> to vector<16x16x128xf32>
    %59 = vector.shape_cast %58 : vector<16x16x128xf32> to vector<256x128xf32>
    %60 = arith.truncf %59 : vector<256x128xf32> to vector<256x128xbf16>
    %c7 = arith.constant 7 : index
    %c0_53 = arith.constant 0 : index
    %c0_54 = arith.constant 0 : index
    %61 = vector.load %arg2[%c7, %c0_53, %c0_54] : memref<9x128x128xbf16, #tpu.memory_space<vmem>>, vector<1x128x128xbf16>
    %62 = vector.shape_cast %61 : vector<1x128x128xbf16> to vector<128x128xbf16>
    %cst_55 = arith.constant dense<0.000000e+00> : vector<256x128xf32>
    %63 = tpu.matmul %60, %62, %cst_55 {dimension_numbers = #tpu.dot_dimension_numbers<[1], [0], [0], [1], [0, 0, 1, 1], [], []>} : vector<256x128xbf16>, vector<128x128xbf16>, vector<256x128xf32> -> vector<256x128xf32>
    %64 = arith.addf %56, %63 : vector<256x128xf32>
    %c0_56 = arith.constant 0 : index
    %c2_57 = arith.constant 2 : index
    %c2_58 = arith.constant 2 : index
    %c0_59 = arith.constant 0 : index
    %65 = vector.load %arg1[%c0_56, %c2_57, %c2_58, %c0_59] : memref<1x18x18x128xf32, #tpu.memory_space<vmem>>, vector<1x16x16x128xf32>
    %66 = vector.shape_cast %65 : vector<1x16x16x128xf32> to vector<16x16x128xf32>
    %67 = vector.shape_cast %66 : vector<16x16x128xf32> to vector<256x128xf32>
    %68 = arith.truncf %67 : vector<256x128xf32> to vector<256x128xbf16>
    %c8 = arith.constant 8 : index
    %c0_60 = arith.constant 0 : index
    %c0_61 = arith.constant 0 : index
    %69 = vector.load %arg2[%c8, %c0_60, %c0_61] : memref<9x128x128xbf16, #tpu.memory_space<vmem>>, vector<1x128x128xbf16>
    %70 = vector.shape_cast %69 : vector<1x128x128xbf16> to vector<128x128xbf16>
    %cst_62 = arith.constant dense<0.000000e+00> : vector<256x128xf32>
    %71 = tpu.matmul %68, %70, %cst_62 {dimension_numbers = #tpu.dot_dimension_numbers<[1], [0], [0], [1], [0, 0, 1, 1], [], []>} : vector<256x128xbf16>, vector<128x128xbf16>, vector<256x128xf32> -> vector<256x128xf32>
    %72 = arith.addf %64, %71 : vector<256x128xf32>
    %c0_63 = arith.constant 0 : index
    %c0_64 = arith.constant 0 : index
    %73 = vector.load %arg3[%c0_63, %c0_64] : memref<1x128xf32, #tpu.memory_space<vmem>>, vector<1x128xf32>
    %74 = vector.broadcast %73 : vector<1x128xf32> to vector<256x128xf32>
    %75 = arith.addf %72, %74 : vector<256x128xf32>
    %cst_65 = arith.constant 0.000000e+00 : f32
    %76 = vector.broadcast %cst_65 : f32 to vector<256x128xf32>
    %77 = arith.maximumf %75, %76 : vector<256x128xf32>
    %78 = arith.truncf %77 : vector<256x128xf32> to vector<256x128xbf16>
    %c0_66 = arith.constant 0 : index
    %c0_67 = arith.constant 0 : index
    %79 = vector.load %arg4[%c0_66, %c0_67] : memref<256x128xbf16, #tpu.memory_space<vmem>>, vector<256x128xbf16>
    tpu.vector_store %arg4[%c0_66, %c0_67], %78 {strides = array<i32>} : memref<256x128xbf16, #tpu.memory_space<vmem>>, vector<256x128xbf16>,
    return
  }
  func.func @transform_0(%arg0: i32) -> (i32, i32, i32, i32) {
    %c0_i32 = arith.constant 0 : i32
    %c0_i32_0 = arith.constant 0 : i32
    %c0_i32_1 = arith.constant 0 : i32
    %c0_i32_2 = arith.constant 0 : i32
    return %arg0, %c0_i32, %c0_i32_0, %c0_i32_1 : i32, i32, i32, i32
  }
  func.func @transform_1(%arg0: i32) -> (i32, i32, i32) {
    %c0_i32 = arith.constant 0 : i32
    %c0_i32_0 = arith.constant 0 : i32
    %c0_i32_1 = arith.constant 0 : i32
    %c0_i32_2 = arith.constant 0 : i32
    return %c0_i32, %c0_i32_0, %c0_i32_1 : i32, i32, i32
  }
  func.func @transform_2(%arg0: i32) -> (i32, i32) {
    %c0_i32 = arith.constant 0 : i32
    %c0_i32_0 = arith.constant 0 : i32
    %c0_i32_1 = arith.constant 0 : i32
    return %c0_i32, %c0_i32_0 : i32, i32
  }
  func.func @transform_3(%arg0: i32) -> (i32, i32) {
    %c0_i32 = arith.constant 0 : i32
    %c0_i32_0 = arith.constant 0 : i32
    return %arg0, %c0_i32 : i32, i32
  }
}

module attributes {stable_mosaic.version = 11 : i64} {
  func.func @_mm_bias_act_kernel(%arg0: i32, %arg1: memref<256x128xbf16, #tpu.memory_space<vmem>>, %arg2: memref<128x128xbf16, #tpu.memory_space<vmem>>, %arg3: memref<1x128xf32, #tpu.memory_space<vmem>>, %arg4: memref<256x128xf32, #tpu.memory_space<vmem>>) attributes {dimension_semantics = [#tpu.dimension_semantics<parallel>], iteration_bounds = array<i64: 2>, scalar_prefetch = 0 : i64, scratch_operands = 0 : i64, tpu.core_type = #tpu.core_type<tc>, window_params = [{transform_indices = @transform_0, window_bounds = array<i64: 256, 128>}, {pipeline_mode = #tpu.pipeline_mode<synchronous>, transform_indices = @transform_1, window_bounds = array<i64: 128, 128>}, {pipeline_mode = #tpu.pipeline_mode<synchronous>, transform_indices = @transform_2, window_bounds = array<i64: 1, 128>}, {transform_indices = @transform_3, window_bounds = array<i64: 256, 128>}]} {
    %c0 = arith.constant 0 : index
    %c0_0 = arith.constant 0 : index
    %0 = vector.load %arg1[%c0, %c0_0] : memref<256x128xbf16, #tpu.memory_space<vmem>>, vector<256x128xbf16>
    %c0_1 = arith.constant 0 : index
    %c0_2 = arith.constant 0 : index
    %1 = vector.load %arg2[%c0_1, %c0_2] : memref<128x128xbf16, #tpu.memory_space<vmem>>, vector<128x128xbf16>
    %cst = arith.constant dense<0.000000e+00> : vector<256x128xf32>
    %2 = tpu.matmul %0, %1, %cst {dimension_numbers = #tpu.dot_dimension_numbers<[1], [0], [0], [1], [0, 0, 1, 1], [], []>} : vector<256x128xbf16>, vector<128x128xbf16>, vector<256x128xf32> -> vector<256x128xf32>
    %c0_3 = arith.constant 0 : index
    %c0_4 = arith.constant 0 : index
    %3 = vector.load %arg3[%c0_3, %c0_4] : memref<1x128xf32, #tpu.memory_space<vmem>>, vector<1x128xf32>
    %4 = vector.broadcast %3 : vector<1x128xf32> to vector<256x128xf32>
    %5 = arith.addf %2, %4 : vector<256x128xf32>
    %cst_5 = arith.constant 0.000000e+00 : f32
    %6 = vector.broadcast %cst_5 : f32 to vector<256x128xf32>
    %7 = arith.maximumf %5, %6 : vector<256x128xf32>
    %c0_6 = arith.constant 0 : index
    %c0_7 = arith.constant 0 : index
    %8 = vector.load %arg4[%c0_6, %c0_7] : memref<256x128xf32, #tpu.memory_space<vmem>>, vector<256x128xf32>
    tpu.vector_store %arg4[%c0_6, %c0_7], %7 {strides = array<i32>} : memref<256x128xf32, #tpu.memory_space<vmem>>, vector<256x128xf32>,
    return
  }
  func.func @transform_0(%arg0: i32) -> (i32, i32) {
    %c0_i32 = arith.constant 0 : i32
    %c0_i32_0 = arith.constant 0 : i32
    return %arg0, %c0_i32 : i32, i32
  }
  func.func @transform_1(%arg0: i32) -> (i32, i32) {
    %c0_i32 = arith.constant 0 : i32
    %c0_i32_0 = arith.constant 0 : i32
    %c0_i32_1 = arith.constant 0 : i32
    return %c0_i32, %c0_i32_0 : i32, i32
  }
  func.func @transform_2(%arg0: i32) -> (i32, i32) {
    %c0_i32 = arith.constant 0 : i32
    %c0_i32_0 = arith.constant 0 : i32
    %c0_i32_1 = arith.constant 0 : i32
    return %c0_i32, %c0_i32_0 : i32, i32
  }
  func.func @transform_3(%arg0: i32) -> (i32, i32) {
    %c0_i32 = arith.constant 0 : i32
    %c0_i32_0 = arith.constant 0 : i32
    return %arg0, %c0_i32 : i32, i32
  }
}

module attributes {stable_mosaic.version = 11 : i64} {
  func.func @_mm_bias_residual_kernel(%arg0: i32, %arg1: memref<256x128xbf16, #tpu.memory_space<vmem>>, %arg2: memref<128x128xbf16, #tpu.memory_space<vmem>>, %arg3: memref<1x128xf32, #tpu.memory_space<vmem>>, %arg4: memref<256x128xf32, #tpu.memory_space<vmem>>, %arg5: memref<256x128xf32, #tpu.memory_space<vmem>>) attributes {dimension_semantics = [#tpu.dimension_semantics<parallel>], iteration_bounds = array<i64: 2>, scalar_prefetch = 0 : i64, scratch_operands = 0 : i64, tpu.core_type = #tpu.core_type<tc>, window_params = [{transform_indices = @transform_0, window_bounds = array<i64: 256, 128>}, {pipeline_mode = #tpu.pipeline_mode<synchronous>, transform_indices = @transform_1, window_bounds = array<i64: 128, 128>}, {pipeline_mode = #tpu.pipeline_mode<synchronous>, transform_indices = @transform_2, window_bounds = array<i64: 1, 128>}, {transform_indices = @transform_3, window_bounds = array<i64: 256, 128>}, {transform_indices = @transform_4, window_bounds = array<i64: 256, 128>}]} {
    %c0 = arith.constant 0 : index
    %c0_0 = arith.constant 0 : index
    %0 = vector.load %arg1[%c0, %c0_0] : memref<256x128xbf16, #tpu.memory_space<vmem>>, vector<256x128xbf16>
    %c0_1 = arith.constant 0 : index
    %c0_2 = arith.constant 0 : index
    %1 = vector.load %arg2[%c0_1, %c0_2] : memref<128x128xbf16, #tpu.memory_space<vmem>>, vector<128x128xbf16>
    %cst = arith.constant dense<0.000000e+00> : vector<256x128xf32>
    %2 = tpu.matmul %0, %1, %cst {dimension_numbers = #tpu.dot_dimension_numbers<[1], [0], [0], [1], [0, 0, 1, 1], [], []>} : vector<256x128xbf16>, vector<128x128xbf16>, vector<256x128xf32> -> vector<256x128xf32>
    %c0_3 = arith.constant 0 : index
    %c0_4 = arith.constant 0 : index
    %3 = vector.load %arg3[%c0_3, %c0_4] : memref<1x128xf32, #tpu.memory_space<vmem>>, vector<1x128xf32>
    %4 = vector.broadcast %3 : vector<1x128xf32> to vector<256x128xf32>
    %5 = arith.addf %2, %4 : vector<256x128xf32>
    %c0_5 = arith.constant 0 : index
    %c0_6 = arith.constant 0 : index
    %6 = vector.load %arg4[%c0_5, %c0_6] : memref<256x128xf32, #tpu.memory_space<vmem>>, vector<256x128xf32>
    %7 = arith.addf %5, %6 : vector<256x128xf32>
    %cst_7 = arith.constant 0.000000e+00 : f32
    %8 = vector.broadcast %cst_7 : f32 to vector<256x128xf32>
    %9 = arith.maximumf %7, %8 : vector<256x128xf32>
    %c0_8 = arith.constant 0 : index
    %c0_9 = arith.constant 0 : index
    %10 = vector.load %arg5[%c0_8, %c0_9] : memref<256x128xf32, #tpu.memory_space<vmem>>, vector<256x128xf32>
    tpu.vector_store %arg5[%c0_8, %c0_9], %9 {strides = array<i32>} : memref<256x128xf32, #tpu.memory_space<vmem>>, vector<256x128xf32>,
    return
  }
  func.func @transform_0(%arg0: i32) -> (i32, i32) {
    %c0_i32 = arith.constant 0 : i32
    %c0_i32_0 = arith.constant 0 : i32
    return %arg0, %c0_i32 : i32, i32
  }
  func.func @transform_1(%arg0: i32) -> (i32, i32) {
    %c0_i32 = arith.constant 0 : i32
    %c0_i32_0 = arith.constant 0 : i32
    %c0_i32_1 = arith.constant 0 : i32
    return %c0_i32, %c0_i32_0 : i32, i32
  }
  func.func @transform_2(%arg0: i32) -> (i32, i32) {
    %c0_i32 = arith.constant 0 : i32
    %c0_i32_0 = arith.constant 0 : i32
    %c0_i32_1 = arith.constant 0 : i32
    return %c0_i32, %c0_i32_0 : i32, i32
  }
  func.func @transform_3(%arg0: i32) -> (i32, i32) {
    %c0_i32 = arith.constant 0 : i32
    %c0_i32_0 = arith.constant 0 : i32
    return %arg0, %c0_i32 : i32, i32
  }
  func.func @transform_4(%arg0: i32) -> (i32, i32) {
    %c0_i32 = arith.constant 0 : i32
    %c0_i32_0 = arith.constant 0 : i32
    return %arg0, %c0_i32 : i32, i32
  }
}

</mosaic_0001>

<bundles_post_ra>
// kernel: _lambda_.5
= control target key start
LH: loop header
LB: loop body
LE: loop exit
PB: predicated region body
PF: predicated region fallthrough
CT: control target
= control target key end

     0   :  { %s903_s15 = smov 0   ;;  %s1074_s0 = inlined_call_operand.vmem [shape: bf16[512,128], index: 0, kind: input, shape index: {}]   ;;  %s1075_s1 = inlined_call_operand.vmem [shape: bf16[128,128], index: 1, kind: input, shape index: {}]   ;;  %s1076_s2 = inlined_call_operand.vmem [shape: f32[1,128], index: 2, kind: input, shape index: {}]   ;;  %s1077_s3 = inlined_call_operand.vmem [shape: f32[512,128], index: 3, kind: input, shape index: {}]   ;;  %s1078_s4 = inlined_call_operand.vmem [shape: f32[512,128], index: 4, kind: output, shape index: {}]  }
   0x1 LB: > { %s704_s16 = sadd.s32 4294967295, %s876_s15   ;;  %p708_p0 = scmp.ge.s32.totalorder %s876_s15, 1  ;;  %s876_s15 = sphi %s903_s15, %s14_s15  }
   0x2   : > { %p174_p1 = scmp.lt.s32.totalorder %s876_s15, 3 }
   0x4   : > { %p175_p2 = pnand %p708_p0, %p174_p1 }
   0x5   : > { %s709_s25 = sshll.u32 (!%p175_p2), %s704_s16, 5 }
   0x6   : > { %178 = sbr.rel (%p175_p2) target bundleno = 240 (0xf0), region = 36  ;;  %p206_p3 = scmp.lt.s32.totalorder (!%p175_p2), %s709_s25, 63 }
   0xb   : > { %v836_v0 = vld [vmem:[%s1075_s1 + $0x38] sm:$0xff]  ;;  %v835_v1 = vld [vmem:[%s1075_s1 + $0x30] sm:$0xff]  ;;  %v834_v2 = vld [vmem:[%s1075_s1 + $0x28] sm:$0xff]  ;;  %s1080_s25 = smov (!%p206_p3, %s709_s25), 63 }
   0xc   : > { %419 = vmatpush.bf16.msra.mxu0 %v836_v0  ;;  %837 = vmatpush.bf16.msra.mxu1 %v836_v0  ;;  %v833_v3 = vld [vmem:[%s1075_s1 + $0x20] sm:$0xff]  ;;  %v832_v4 = vld [vmem:[%s1075_s1 + $0x18] sm:$0xff]  ;;  %v831_v5 = vld [vmem:[%s1075_s1 + $0x10] sm:$0xff]  ;;  %s710_s6 = sshll.u32 %s1080_s25, 2  ;;  %s712_s12 = sshll.u32 %s1080_s25, 3 }
   0xd   : > { %838 = vmatpush.bf16.msra.mxu2 %v836_v0  ;;  %839 = vmatpush.bf16.msra.mxu3 %v836_v0  ;;  %v830_v6 = vld [vmem:[%s1075_s1 + $0x8] sm:$0xff]  ;;  %v829_v7 = vld [vmem:[%s1075_s1] sm:$0xff]  ;;  %s941_s11 = scalar_lea.vmem %s1074_s0, %s710_s6  ;;  %s963_s16 = scalar_lea.vmem %s1077_s3, %s712_s12 }
   0xe   : > { %v813_v8 = vld [vmem:[%s941_s11] sm:$0xff]  ;;  %v814_v12 = vld [vmem:[%s941_s11 + $0x8] sm:$0xff]  ;;  %v815_v16 = vld [vmem:[%s941_s11 + $0x10] sm:$0xff]  ;;  %s977_s21 = scalar_lea.vmem %s1078_s4, %s712_s12 }
   0xf   : > { %v817_v9 = vld [vmem:[%s941_s11 + $0x20] sm:$0xff]  ;;  %v818_v13 = vld [vmem:[%s941_s11 + $0x28] sm:$0xff]  ;;  %v819_v17 = vld [vmem:[%s941_s11 + $0x30] sm:$0xff] }
  0x10   : > { %420 = vmatpush.bf16.msra.mxu0 %v835_v1  ;;  %840 = vmatpush.bf16.msra.mxu1 %v835_v1  ;;  %v821_v10 = vld [vmem:[%s941_s11 + $0x40] sm:$0xff]  ;;  %v822_v14 = vld [vmem:[%s941_s11 + $0x48] sm:$0xff]  ;;  %v823_v18 = vld [vmem:[%s941_s11 + $0x50] sm:$0xff] }
  0x11   : > { %841 = vmatpush.bf16.msra.mxu2 %v835_v1  ;;  %842 = vmatpush.bf16.msra.mxu3 %v835_v1  ;;  %v825_v11 = vld [vmem:[%s941_s11 + $0x60] sm:$0xff]  ;;  %v826_v15 = vld [vmem:[%s941_s11 + $0x68] sm:$0xff]  ;;  %v827_v19 = vld [vmem:[%s941_s11 + $0x70] sm:$0xff] }
  0x12   : > { %v816_v20 = vld [vmem:[%s941_s11 + $0x18] sm:$0xff]  ;;  %v968_v24 = vld [vmem:[%s1076_s2] ss:$0 sm:$0xff]  ;;  %v509_v42 = vld [vmem:[%s963_s16 + $0x8] sm:$0xff] }
  0x13   : > { %v820_v21 = vld [vmem:[%s941_s11 + $0x38] sm:$0xff]  ;;  %v508_v26 = vld [vmem:[%s963_s16] sm:$0xff]  ;;  %v517_v44 = vld [vmem:[%s963_s16 + $0x48] sm:$0xff] }
  0x14   : > { %421 = vmatpush.bf16.msra.mxu0 %v834_v2  ;;  %843 = vmatpush.bf16.msra.mxu1 %v834_v2  ;;  %v824_v22 = vld [vmem:[%s941_s11 + $0x58] sm:$0xff]  ;;  %v516_v28 = vld [vmem:[%s963_s16 + $0x40] sm:$0xff]  ;;  %v525_v56 = vld [vmem:[%s963_s16 + $0x88] sm:$0xff] }
  0x15   : > { %844 = vmatpush.bf16.msra.mxu2 %v834_v2  ;;  %845 = vmatpush.bf16.msra.mxu3 %v834_v2  ;;  %v828_v23 = vld [vmem:[%s941_s11 + $0x78] sm:$0xff]  ;;  %v524_v36 = vld [vmem:[%s963_s16 + $0x80] sm:$0xff]  ;;  %v533_v58 = vld [vmem:[%s963_s16 + $0xc8] sm:$0xff] }
  0x16   : > { %v532_v38 = vld [vmem:[%s963_s16 + $0xc0] sm:$0xff]  ;;  %v510_v62 = vld [vmem:[%s963_s16 + $0x10] sm:$0xff] }
  0x17   : > { %v518_v0 = vld [vmem:[%s963_s16 + $0x50] sm:$0xff] }
  0x18   : > { %422 = vmatpush.bf16.msra.mxu0 %v833_v3  ;;  %846 = vmatpush.bf16.msra.mxu1 %v833_v3 }
  0x19   : > { %847 = vmatpush.bf16.msra.mxu2 %v833_v3  ;;  %848 = vmatpush.bf16.msra.mxu3 %v833_v3 }
  0x1c   : > { %423 = vmatpush.bf16.msra.mxu0 %v832_v4  ;;  %849 = vmatpush.bf16.msra.mxu1 %v832_v4 }
  0x1d   : > { %850 = vmatpush.bf16.msra.mxu2 %v832_v4  ;;  %851 = vmatpush.bf16.msra.mxu3 %v832_v4 }
  0x20   : > { %424 = vmatpush.bf16.msra.mxu0 %v831_v5  ;;  %852 = vmatpush.bf16.msra.mxu1 %v831_v5 }
  0x21   : > { %853 = vmatpush.bf16.msra.mxu2 %v831_v5  ;;  %854 = vmatpush.bf16.msra.mxu3 %v831_v5 }
  0x24   : > { %425 = vmatpush.bf16.msra.mxu0 %v830_v6  ;;  %855 = vmatpush.bf16.msra.mxu1 %v830_v6 }
  0x25   : > { %856 = vmatpush.bf16.msra.mxu2 %v830_v6  ;;  %857 = vmatpush.bf16.msra.mxu3 %v830_v6 }
  0x28   : > { %426 = vmatpush.bf16.msra.mxu0 %v829_v7  ;;  %858 = vmatpush.bf16.msra.mxu1 %v829_v7 }
  0x29   : > { %859 = vmatpush.bf16.msra.mxu2 %v829_v7  ;;  %860 = vmatpush.bf16.msra.mxu3 %v829_v7 }
  0x2b   : > { %427 = vmatmul.bf16.vlgmr.msra.gmra.mxu0 %v813_v8  ;;  %447 = vmatmul.bf16.vlgmr.msra.gmra.mxu1 %v817_v9 }
  0x2c   : > { %467 = vmatmul.bf16.vlgmr.msra.gmra.mxu2 %v821_v10  ;;  %487 = vmatmul.bf16.vlgmr.msra.gmra.mxu3 %v825_v11 }
  0x3b   : > { %432 = vmatmul.bf16.gmra.mxu0 %v814_v12  ;;  %452 = vmatmul.bf16.gmra.mxu1 %v818_v13  ;;  %v526_v12 = vld [vmem:[%s963_s16 + $0x90] sm:$0xff] }
  0x3c   : > { %472 = vmatmul.bf16.gmra.mxu2 %v822_v14  ;;  %492 = vmatmul.bf16.gmra.mxu3 %v826_v15  ;;  %v534_v14 = vld [vmem:[%s963_s16 + $0xd0] sm:$0xff] }
  0x4b   : > { %437 = vmatmul.bf16.gmra.mxu0 %v815_v16  ;;  %457 = vmatmul.bf16.gmra.mxu1 %v819_v17 }
  0x4c   : > { %477 = vmatmul.bf16.gmra.mxu2 %v823_v18  ;;  %497 = vmatmul.bf16.gmra.mxu3 %v827_v19  ;;  %v511_v18 = vld [vmem:[%s963_s16 + $0x18] sm:$0xff] }
  0x5b   : > { %442 = vmatmul.bf16.gmra.mxu0 %v816_v20  ;;  %462 = vmatmul.bf16.gmra.mxu1 %v820_v21  ;;  %v519_v20 = vld [vmem:[%s963_s16 + $0x58] sm:$0xff] }
  0x5c   : > { %482 = vmatmul.bf16.gmra.mxu2 %v824_v22  ;;  %502 = vmatmul.bf16.gmra.mxu3 %v828_v23 }
  0xa8   : > { %v428_v25 = vpop.f32.mrf.mxu0  ;;  %v448_v27 = vpop.f32.mrf.mxu1 }
  0xa9   : > { %v429_v29 = vadd.f32 %v968_v24, %v428_v25  ;;  %v449_v30 = vadd.f32 %v968_v24, %v448_v27 }
  0xab   : > { %v540_v31 = vadd.f32 %v508_v26, %v429_v29  ;;  %v548_v32 = vadd.f32 %v516_v28, %v449_v30 }
  0xad   : > { %v572_v33 = vmax.f32 %v540_v31, 0.0  ;;  %v580_v34 = vmax.f32 %v548_v32, 0.0 }
  0xaf   : > { %604 = vst [vmem:[%s977_s21] sm:$0xff] %v572_v33  ;;  %v468_v35 = vpop.f32.mrf.mxu2  ;;  %v488_v37 = vpop.f32.mrf.mxu3  ;;  %v527_v33 = vld [vmem:[%s963_s16 + $0x98] sm:$0xff] }
  0xb0   : > { %612 = vst [vmem:[%s977_s21 + $0x40] sm:$0xff] %v580_v34  ;;  %v469_v39 = vadd.f32 %v968_v24, %v468_v35  ;;  %v489_v40 = vadd.f32 %v968_v24, %v488_v37  ;;  %v430_v41 = vpop.f32.mrf.mxu0  ;;  %v450_v43 = vpop.f32.mrf.mxu1  ;;  %v535_v35 = vld [vmem:[%s963_s16 + $0xd8] sm:$0xff] }
  0xb1   : > { %v431_v45 = vadd.f32 %v968_v24, %v430_v41  ;;  %v451_v46 = vadd.f32 %v968_v24, %v450_v43  ;;  %v520_v41 = vld [vmem:[%s963_s16 + $0x60] sm:$0xff] }
  0xb2   : > { %v556_v47 = vadd.f32 %v524_v36, %v469_v39  ;;  %v564_v48 = vadd.f32 %v532_v38, %v489_v40  ;;  %v512_v39 = vld [vmem:[%s963_s16 + $0x20] sm:$0xff] }
  0xb3   : > { %v541_v49 = vadd.f32 %v509_v42, %v431_v45  ;;  %v549_v50 = vadd.f32 %v517_v44, %v451_v46 }
  0xb4   : > { %v588_v51 = vmax.f32 %v556_v47, 0.0  ;;  %v596_v52 = vmax.f32 %v564_v48, 0.0 }
  0xb5   : > { %v573_v53 = vmax.f32 %v541_v49, 0.0  ;;  %v581_v54 = vmax.f32 %v549_v50, 0.0 }
  0xb6   : > { %620 = vst [vmem:[%s977_s21 + $0x80] sm:$0xff] %v588_v51 }
  0xb7   : > { %628 = vst [vmem:[%s977_s21 + $0xc0] sm:$0xff] %v596_v52  ;;  %v470_v55 = vpop.f32.mrf.mxu2  ;;  %v490_v57 = vpop.f32.mrf.mxu3 }
  0xb8   : > { %605 = vst [vmem:[%s977_s21 + $0x8] sm:$0xff] %v573_v53  ;;  %v471_v59 = vadd.f32 %v968_v24, %v470_v55  ;;  %v491_v60 = vadd.f32 %v968_v24, %v490_v57  ;;  %v433_v61 = vpop.f32.mrf.mxu0  ;;  %v453_v63 = vpop.f32.mrf.mxu1  ;;  %v528_v53 = vld [vmem:[%s963_s16 + $0xa0] sm:$0xff] }
  0xb9   : > { %613 = vst [vmem:[%s977_s21 + $0x48] sm:$0xff] %v581_v54  ;;  %v434_v1 = vadd.f32 %v968_v24, %v433_v61  ;;  %v454_v2 = vadd.f32 %v968_v24, %v453_v63  ;;  %v536_v55 = vld [vmem:[%s963_s16 + $0xe0] sm:$0xff]  ;;  %v521_v61 = vld [vmem:[%s963_s16 + $0x68] sm:$0xff] }
  0xba   : > { %v557_v3 = vadd.f32 %v525_v56, %v471_v59  ;;  %v565_v4 = vadd.f32 %v533_v58, %v491_v60  ;;  %v513_v59 = vld [vmem:[%s963_s16 + $0x28] sm:$0xff] }
  0xbb   : > { %v542_v5 = vadd.f32 %v510_v62, %v434_v1  ;;  %v550_v6 = vadd.f32 %v518_v0, %v454_v2 }
  0xbc   : > { %v589_v7 = vmax.f32 %v557_v3, 0.0  ;;  %v597_v8 = vmax.f32 %v565_v4, 0.0 }
  0xbd   : > { %v574_v9 = vmax.f32 %v542_v5, 0.0  ;;  %v582_v10 = vmax.f32 %v550_v6, 0.0 }
  0xbe   : > { %621 = vst [vmem:[%s977_s21 + $0x88] sm:$0xff] %v589_v7 }
  0xbf   : > { %629 = vst [vmem:[%s977_s21 + $0xc8] sm:$0xff] %v597_v8  ;;  %v473_v11 = vpop.f32.mrf.mxu2  ;;  %v493_v13 = vpop.f32.mrf.mxu3 }
  0xc0   : > { %606 = vst [vmem:[%s977_s21 + $0x10] sm:$0xff] %v574_v9  ;;  %v474_v15 = vadd.f32 %v968_v24, %v473_v11  ;;  %v494_v16 = vadd.f32 %v968_v24, %v493_v13  ;;  %v435_v17 = vpop.f32.mrf.mxu0  ;;  %v455_v19 = vpop.f32.mrf.mxu1  ;;  %v529_v9 = vld [vmem:[%s963_s16 + $0xa8] sm:$0xff] }
  0xc1   : > { %614 = vst [vmem:[%s977_s21 + $0x50] sm:$0xff] %v582_v10  ;;  %v436_v21 = vadd.f32 %v968_v24, %v435_v17  ;;  %v456_v22 = vadd.f32 %v968_v24, %v455_v19  ;;  %v537_v11 = vld [vmem:[%s963_s16 + $0xe8] sm:$0xff]  ;;  %v522_v17 = vld [vmem:[%s963_s16 + $0x70] sm:$0xff] }
  0xc2   : > { %v558_v23 = vadd.f32 %v526_v12, %v474_v15  ;;  %v566_v25 = vadd.f32 %v534_v14, %v494_v16  ;;  %v514_v15 = vld [vmem:[%s963_s16 + $0x30] sm:$0xff] }
  0xc3   : > { %v543_v26 = vadd.f32 %v511_v18, %v436_v21  ;;  %v551_v27 = vadd.f32 %v519_v20, %v456_v22 }
  0xc4   : > { %v590_v28 = vmax.f32 %v558_v23, 0.0  ;;  %v598_v29 = vmax.f32 %v566_v25, 0.0 }
  0xc5   : > { %v575_v30 = vmax.f32 %v543_v26, 0.0  ;;  %v583_v31 = vmax.f32 %v551_v27, 0.0 }
  0xc6   : > { %622 = vst [vmem:[%s977_s21 + $0x90] sm:$0xff] %v590_v28 }
  0xc7   : > { %630 = vst [vmem:[%s977_s21 + $0xd0] sm:$0xff] %v598_v29  ;;  %v475_v32 = vpop.f32.mrf.mxu2  ;;  %v495_v34 = vpop.f32.mrf.mxu3 }
  0xc8   : > { %607 = vst [vmem:[%s977_s21 + $0x18] sm:$0xff] %v575_v30  ;;  %v476_v36 = vadd.f32 %v968_v24, %v475_v32  ;;  %v496_v37 = vadd.f32 %v968_v24, %v495_v34  ;;  %v438_v38 = vpop.f32.mrf.mxu0  ;;  %v458_v40 = vpop.f32.mrf.mxu1  ;;  %v530_v30 = vld [vmem:[%s963_s16 + $0xb0] sm:$0xff] }
  0xc9   : > { %615 = vst [vmem:[%s977_s21 + $0x58] sm:$0xff] %v583_v31  ;;  %v439_v42 = vadd.f32 %v968_v24, %v438_v38  ;;  %v459_v43 = vadd.f32 %v968_v24, %v458_v40  ;;  %v538_v32 = vld [vmem:[%s963_s16 + $0xf0] sm:$0xff]  ;;  %v523_v38 = vld [vmem:[%s963_s16 + $0x78] sm:$0xff] }
  0xca   : > { %v559_v44 = vadd.f32 %v527_v33, %v476_v36  ;;  %v567_v45 = vadd.f32 %v535_v35, %v496_v37  ;;  %v515_v36 = vld [vmem:[%s963_s16 + $0x38] sm:$0xff] }
  0xcb   : > { %v544_v46 = vadd.f32 %v512_v39, %v439_v42  ;;  %v552_v47 = vadd.f32 %v520_v41, %v459_v43 }
  0xcc   : > { %v591_v48 = vmax.f32 %v559_v44, 0.0  ;;  %v599_v49 = vmax.f32 %v567_v45, 0.0 }
  0xcd   : > { %v576_v50 = vmax.f32 %v544_v46, 0.0  ;;  %v584_v51 = vmax.f32 %v552_v47, 0.0 }
  0xce   : > { %623 = vst [vmem:[%s977_s21 + $0x98] sm:$0xff] %v591_v48 }
  0xcf   : > { %631 = vst [vmem:[%s977_s21 + $0xd8] sm:$0xff] %v599_v49  ;;  %v478_v52 = vpop.f32.mrf.mxu2  ;;  %v498_v54 = vpop.f32.mrf.mxu3 }
  0xd0   : > { %608 = vst [vmem:[%s977_s21 + $0x20] sm:$0xff] %v576_v50  ;;  %v479_v56 = vadd.f32 %v968_v24, %v478_v52  ;;  %v499_v57 = vadd.f32 %v968_v24, %v498_v54  ;;  %v440_v58 = vpop.f32.mrf.mxu0  ;;  %v460_v60 = vpop.f32.mrf.mxu1  ;;  %v531_v50 = vld [vmem:[%s963_s16 + $0xb8] sm:$0xff] }
  0xd1   : > { %616 = vst [vmem:[%s977_s21 + $0x60] sm:$0xff] %v584_v51  ;;  %v441_v62 = vadd.f32 %v968_v24, %v440_v58  ;;  %v461_v63 = vadd.f32 %v968_v24, %v460_v60  ;;  %v539_v52 = vld [vmem:[%s963_s16 + $0xf8] sm:$0xff] }
  0xd2   : > { %v560_v0 = vadd.f32 %v528_v53, %v479_v56  ;;  %v568_v1 = vadd.f32 %v536_v55, %v499_v57 }
  0xd3   : > { %v545_v2 = vadd.f32 %v513_v59, %v441_v62  ;;  %v553_v3 = vadd.f32 %v521_v61, %v461_v63 }
  0xd4   : > { %v592_v4 = vmax.f32 %v560_v0, 0.0  ;;  %v600_v5 = vmax.f32 %v568_v1, 0.0 }
  0xd5   : > { %v577_v6 = vmax.f32 %v545_v2, 0.0  ;;  %v585_v7 = vmax.f32 %v553_v3, 0.0 }
  0xd6   : > { %624 = vst [vmem:[%s977_s21 + $0xa0] sm:$0xff] %v592_v4 }
  0xd7   : > { %632 = vst [vmem:[%s977_s21 + $0xe0] sm:$0xff] %v600_v5  ;;  %v480_v8 = vpop.f32.mrf.mxu2  ;;  %v500_v10 = vpop.f32.mrf.mxu3 }
  0xd8   : > { %609 = vst [vmem:[%s977_s21 + $0x28] sm:$0xff] %v577_v6  ;;  %v481_v12 = vadd.f32 %v968_v24, %v480_v8  ;;  %v501_v13 = vadd.f32 %v968_v24, %v500_v10  ;;  %v443_v14 = vpop.f32.mrf.mxu0  ;;  %v463_v16 = vpop.f32.mrf.mxu1 }
  0xd9   : > { %617 = vst [vmem:[%s977_s21 + $0x68] sm:$0xff] %v585_v7  ;;  %v444_v18 = vadd.f32 %v968_v24, %v443_v14  ;;  %v464_v19 = vadd.f32 %v968_v24, %v463_v16 }
  0xda   : > { %v561_v20 = vadd.f32 %v529_v9, %v481_v12  ;;  %v569_v21 = vadd.f32 %v537_v11, %v501_v13 }
  0xdb   : > { %v546_v22 = vadd.f32 %v514_v15, %v444_v18  ;;  %v554_v23 = vadd.f32 %v522_v17, %v464_v19 }
  0xdc   : > { %v593_v25 = vmax.f32 %v561_v20, 0.0  ;;  %v601_v26 = vmax.f32 %v569_v21, 0.0 }
  0xdd   : > { %v578_v27 = vmax.f32 %v546_v22, 0.0  ;;  %v586_v28 = vmax.f32 %v554_v23, 0.0 }
  0xde   : > { %625 = vst [vmem:[%s977_s21 + $0xa8] sm:$0xff] %v593_v25 }
  0xdf   : > { %633 = vst [vmem:[%s977_s21 + $0xe8] sm:$0xff] %v601_v26  ;;  %v483_v29 = vpop.f32.mrf.mxu2  ;;  %v503_v31 = vpop.f32.mrf.mxu3 }
  0xe0   : > { %610 = vst [vmem:[%s977_s21 + $0x30] sm:$0xff] %v578_v27  ;;  %v484_v33 = vadd.f32 %v968_v24, %v483_v29  ;;  %v504_v34 = vadd.f32 %v968_v24, %v503_v31  ;;  %v445_v35 = vpop.f32.mrf.mxu0  ;;  %v465_v37 = vpop.f32.mrf.mxu1 }
  0xe1   : > { %618 = vst [vmem:[%s977_s21 + $0x70] sm:$0xff] %v586_v28  ;;  %v446_v39 = vadd.f32 %v968_v24, %v445_v35  ;;  %v466_v40 = vadd.f32 %v968_v24, %v465_v37 }
  0xe2   : > { %v562_v41 = vadd.f32 %v530_v30, %v484_v33  ;;  %v570_v42 = vadd.f32 %v538_v32, %v504_v34 }
  0xe3   : > { %v547_v43 = vadd.f32 %v515_v36, %v446_v39  ;;  %v555_v44 = vadd.f32 %v523_v38, %v466_v40 }
  0xe4   : > { %v594_v45 = vmax.f32 %v562_v41, 0.0  ;;  %v602_v46 = vmax.f32 %v570_v42, 0.0 }
  0xe5   : > { %v579_v47 = vmax.f32 %v547_v43, 0.0  ;;  %v587_v48 = vmax.f32 %v555_v44, 0.0 }
  0xe6   : > { %626 = vst [vmem:[%s977_s21 + $0xb0] sm:$0xff] %v594_v45 }
  0xe7   : > { %634 = vst [vmem:[%s977_s21 + $0xf0] sm:$0xff] %v602_v46  ;;  %v485_v49 = vpop.f32.mrf.mxu2  ;;  %v505_v51 = vpop.f32.mrf.mxu3 }
  0xe8   : > { %611 = vst [vmem:[%s977_s21 + $0x38] sm:$0xff] %v579_v47  ;;  %v486_v53 = vadd.f32 %v968_v24, %v485_v49  ;;  %v506_v54 = vadd.f32 %v968_v24, %v505_v51 }
  0xe9   : > { %619 = vst [vmem:[%s977_s21 + $0x78] sm:$0xff] %v587_v48 }
  0xea   : > { %v563_v55 = vadd.f32 %v531_v50, %v486_v53  ;;  %v571_v56 = vadd.f32 %v539_v52, %v506_v54 }
  0xec   : > { %v595_v57 = vmax.f32 %v563_v55, 0.0  ;;  %v603_v58 = vmax.f32 %v571_v56, 0.0 }
  0xee   : > { %627 = vst [vmem:[%s977_s21 + $0xb8] sm:$0xff] %v595_v57 }
  0xef   : > { %635 = vst [vmem:[%s977_s21 + $0xf8] sm:$0xff] %v603_v58 }
  0xf0 PF: > { %s14_s15 = sadd.s32 1, %s876_s15  }
  0xf1   : > { %p11_p4 = scmp.ge.s32.totalorder %s14_s15, 4  }
  0xf3   :  { %13 = sbr.rel (!%p11_p4) target bundleno = 1 (0x1), region = 69 }

// kernel: _lambda_.3
= control target key start
LH: loop header
LB: loop body
LE: loop exit
PB: predicated region body
PF: predicated region fallthrough
CT: control target
= control target key end

     0   :  { %s771_s12 = smov 0   ;;  %s905_s0 = inlined_call_operand.vmem [shape: bf16[512,128], index: 0, kind: input, shape index: {}]   ;;  %s906_s1 = inlined_call_operand.vmem [shape: bf16[128,128], index: 1, kind: input, shape index: {}]   ;;  %s907_s2 = inlined_call_operand.vmem [shape: f32[1,128], index: 2, kind: input, shape index: {}]   ;;  %s908_s3 = inlined_call_operand.vmem [shape: f32[512,128], index: 3, kind: output, shape index: {}]  }
   0x1 LB: > { %s579_s13 = sadd.s32 4294967295, %s749_s12   ;;  %p583_p0 = scmp.ge.s32.totalorder %s749_s12, 1  ;;  %s749_s12 = sphi %s771_s12, %s13_s12  }
   0x2   : > { %p138_p1 = scmp.lt.s32.totalorder %s749_s12, 3 }
   0x4   : > { %p139_p2 = pnand %p583_p0, %p138_p1 }
   0x5   : > { %s584_s22 = sshll.u32 (!%p139_p2), %s579_s13, 5 }
   0x6   : > { %142 = sbr.rel (%p139_p2) target bundleno = 238 (0xee), region = 32  ;;  %p163_p3 = scmp.lt.s32.totalorder (!%p139_p2), %s584_s22, 63 }
   0xb   : > { %v709_v0 = vld [vmem:[%s906_s1 + $0x38] sm:$0xff]  ;;  %v708_v1 = vld [vmem:[%s906_s1 + $0x30] sm:$0xff]  ;;  %v707_v2 = vld [vmem:[%s906_s1 + $0x28] sm:$0xff]  ;;  %s910_s22 = smov (!%p163_p3, %s584_s22), 63 }
   0xc   : > { %370 = vmatpush.bf16.msra.mxu0 %v709_v0  ;;  %710 = vmatpush.bf16.msra.mxu1 %v709_v0  ;;  %v706_v3 = vld [vmem:[%s906_s1 + $0x20] sm:$0xff]  ;;  %v705_v4 = vld [vmem:[%s906_s1 + $0x18] sm:$0xff]  ;;  %v704_v5 = vld [vmem:[%s906_s1 + $0x10] sm:$0xff]  ;;  %s585_s29 = sshll.u32 %s910_s22, 2  ;;  %s587_s10 = sshll.u32 %s910_s22, 3 }
   0xd   : > { %711 = vmatpush.bf16.msra.mxu2 %v709_v0  ;;  %712 = vmatpush.bf16.msra.mxu3 %v709_v0  ;;  %v703_v6 = vld [vmem:[%s906_s1 + $0x8] sm:$0xff]  ;;  %v702_v7 = vld [vmem:[%s906_s1] sm:$0xff]  ;;  %s809_s7 = scalar_lea.vmem %s905_s0, %s585_s29  ;;  %s838_s14 = scalar_lea.vmem %s908_s3, %s587_s10 }
   0xe   : > { %v686_v8 = vld [vmem:[%s809_s7] sm:$0xff]  ;;  %v687_v12 = vld [vmem:[%s809_s7 + $0x8] sm:$0xff]  ;;  %v688_v16 = vld [vmem:[%s809_s7 + $0x10] sm:$0xff] }
   0xf   : > { %v690_v9 = vld [vmem:[%s809_s7 + $0x20] sm:$0xff]  ;;  %v691_v13 = vld [vmem:[%s809_s7 + $0x28] sm:$0xff]  ;;  %v692_v17 = vld [vmem:[%s809_s7 + $0x30] sm:$0xff] }
  0x10   : > { %371 = vmatpush.bf16.msra.mxu0 %v708_v1  ;;  %713 = vmatpush.bf16.msra.mxu1 %v708_v1  ;;  %v694_v10 = vld [vmem:[%s809_s7 + $0x40] sm:$0xff]  ;;  %v695_v14 = vld [vmem:[%s809_s7 + $0x48] sm:$0xff]  ;;  %v696_v18 = vld [vmem:[%s809_s7 + $0x50] sm:$0xff] }
  0x11   : > { %714 = vmatpush.bf16.msra.mxu2 %v708_v1  ;;  %715 = vmatpush.bf16.msra.mxu3 %v708_v1  ;;  %v698_v11 = vld [vmem:[%s809_s7 + $0x60] sm:$0xff]  ;;  %v699_v15 = vld [vmem:[%s809_s7 + $0x68] sm:$0xff]  ;;  %v700_v19 = vld [vmem:[%s809_s7 + $0x70] sm:$0xff] }
  0x12   : > { %v689_v20 = vld [vmem:[%s809_s7 + $0x18] sm:$0xff]  ;;  %v830_v24 = vld [vmem:[%s907_s2] ss:$0 sm:$0xff] }
  0x13   : > { %v693_v21 = vld [vmem:[%s809_s7 + $0x38] sm:$0xff] }
  0x14   : > { %372 = vmatpush.bf16.msra.mxu0 %v707_v2  ;;  %716 = vmatpush.bf16.msra.mxu1 %v707_v2  ;;  %v697_v22 = vld [vmem:[%s809_s7 + $0x58] sm:$0xff] }
  0x15   : > { %717 = vmatpush.bf16.msra.mxu2 %v707_v2  ;;  %718 = vmatpush.bf16.msra.mxu3 %v707_v2  ;;  %v701_v23 = vld [vmem:[%s809_s7 + $0x78] sm:$0xff] }
  0x18   : > { %373 = vmatpush.bf16.msra.mxu0 %v706_v3  ;;  %719 = vmatpush.bf16.msra.mxu1 %v706_v3 }
  0x19   : > { %720 = vmatpush.bf16.msra.mxu2 %v706_v3  ;;  %721 = vmatpush.bf16.msra.mxu3 %v706_v3 }
  0x1c   : > { %374 = vmatpush.bf16.msra.mxu0 %v705_v4  ;;  %722 = vmatpush.bf16.msra.mxu1 %v705_v4 }
  0x1d   : > { %723 = vmatpush.bf16.msra.mxu2 %v705_v4  ;;  %724 = vmatpush.bf16.msra.mxu3 %v705_v4 }
  0x20   : > { %375 = vmatpush.bf16.msra.mxu0 %v704_v5  ;;  %725 = vmatpush.bf16.msra.mxu1 %v704_v5 }
  0x21   : > { %726 = vmatpush.bf16.msra.mxu2 %v704_v5  ;;  %727 = vmatpush.bf16.msra.mxu3 %v704_v5 }
  0x24   : > { %376 = vmatpush.bf16.msra.mxu0 %v703_v6  ;;  %728 = vmatpush.bf16.msra.mxu1 %v703_v6 }
  0x25   : > { %729 = vmatpush.bf16.msra.mxu2 %v703_v6  ;;  %730 = vmatpush.bf16.msra.mxu3 %v703_v6 }
  0x28   : > { %377 = vmatpush.bf16.msra.mxu0 %v702_v7  ;;  %731 = vmatpush.bf16.msra.mxu1 %v702_v7 }
  0x29   : > { %732 = vmatpush.bf16.msra.mxu2 %v702_v7  ;;  %733 = vmatpush.bf16.msra.mxu3 %v702_v7 }
  0x2b   : > { %378 = vmatmul.bf16.vlgmr.msra.gmra.mxu0 %v686_v8  ;;  %398 = vmatmul.bf16.vlgmr.msra.gmra.mxu1 %v690_v9 }
  0x2c   : > { %418 = vmatmul.bf16.vlgmr.msra.gmra.mxu2 %v694_v10  ;;  %438 = vmatmul.bf16.vlgmr.msra.gmra.mxu3 %v698_v11 }
  0x3b   : > { %383 = vmatmul.bf16.gmra.mxu0 %v687_v12  ;;  %403 = vmatmul.bf16.gmra.mxu1 %v691_v13 }
  0x3c   : > { %423 = vmatmul.bf16.gmra.mxu2 %v695_v14  ;;  %443 = vmatmul.bf16.gmra.mxu3 %v699_v15 }
  0x4b   : > { %388 = vmatmul.bf16.gmra.mxu0 %v688_v16  ;;  %408 = vmatmul.bf16.gmra.mxu1 %v692_v17 }
  0x4c   : > { %428 = vmatmul.bf16.gmra.mxu2 %v696_v18  ;;  %448 = vmatmul.bf16.gmra.mxu3 %v700_v19 }
  0x5b   : > { %393 = vmatmul.bf16.gmra.mxu0 %v689_v20  ;;  %413 = vmatmul.bf16.gmra.mxu1 %v693_v21 }
  0x5c   : > { %433 = vmatmul.bf16.gmra.mxu2 %v697_v22  ;;  %453 = vmatmul.bf16.gmra.mxu3 %v701_v23 }
  0xa8   : > { %v379_v25 = vpop.f32.mrf.mxu0  ;;  %v399_v26 = vpop.f32.mrf.mxu1 }
  0xa9   : > { %v380_v27 = vadd.f32 %v830_v24, %v379_v25  ;;  %v400_v28 = vadd.f32 %v830_v24, %v399_v26 }
  0xab   : > { %v459_v29 = vmax.f32 %v380_v27, 0.0  ;;  %v467_v30 = vmax.f32 %v400_v28, 0.0 }
  0xad   : > { %491 = vst [vmem:[%s838_s14] sm:$0xff] %v459_v29 }
  0xae   : > { %499 = vst [vmem:[%s838_s14 + $0x40] sm:$0xff] %v467_v30 }
  0xaf   : > { %v419_v31 = vpop.f32.mrf.mxu2  ;;  %v439_v32 = vpop.f32.mrf.mxu3 }
  0xb0   : > { %v420_v33 = vadd.f32 %v830_v24, %v419_v31  ;;  %v440_v34 = vadd.f32 %v830_v24, %v439_v32  ;;  %v381_v35 = vpop.f32.mrf.mxu0  ;;  %v401_v36 = vpop.f32.mrf.mxu1 }
  0xb1   : > { %v382_v37 = vadd.f32 %v830_v24, %v381_v35  ;;  %v402_v38 = vadd.f32 %v830_v24, %v401_v36 }
  0xb2   : > { %v475_v39 = vmax.f32 %v420_v33, 0.0  ;;  %v483_v40 = vmax.f32 %v440_v34, 0.0 }
  0xb3   : > { %v460_v41 = vmax.f32 %v382_v37, 0.0  ;;  %v468_v42 = vmax.f32 %v402_v38, 0.0 }
  0xb4   : > { %507 = vst [vmem:[%s838_s14 + $0x80] sm:$0xff] %v475_v39 }
  0xb5   : > { %515 = vst [vmem:[%s838_s14 + $0xc0] sm:$0xff] %v483_v40 }
  0xb6   : > { %492 = vst [vmem:[%s838_s14 + $0x8] sm:$0xff] %v460_v41 }
  0xb7   : > { %500 = vst [vmem:[%s838_s14 + $0x48] sm:$0xff] %v468_v42  ;;  %v421_v43 = vpop.f32.mrf.mxu2  ;;  %v441_v44 = vpop.f32.mrf.mxu3 }
  0xb8   : > { %v422_v45 = vadd.f32 %v830_v24, %v421_v43  ;;  %v442_v46 = vadd.f32 %v830_v24, %v441_v44  ;;  %v384_v47 = vpop.f32.mrf.mxu0  ;;  %v404_v48 = vpop.f32.mrf.mxu1 }
  0xb9   : > { %v385_v49 = vadd.f32 %v830_v24, %v384_v47  ;;  %v405_v50 = vadd.f32 %v830_v24, %v404_v48 }
  0xba   : > { %v476_v51 = vmax.f32 %v422_v45, 0.0  ;;  %v484_v52 = vmax.f32 %v442_v46, 0.0 }
  0xbb   : > { %v461_v53 = vmax.f32 %v385_v49, 0.0  ;;  %v469_v54 = vmax.f32 %v405_v50, 0.0 }
  0xbc   : > { %508 = vst [vmem:[%s838_s14 + $0x88] sm:$0xff] %v476_v51 }
  0xbd   : > { %516 = vst [vmem:[%s838_s14 + $0xc8] sm:$0xff] %v484_v52 }
  0xbe   : > { %493 = vst [vmem:[%s838_s14 + $0x10] sm:$0xff] %v461_v53 }
  0xbf   : > { %501 = vst [vmem:[%s838_s14 + $0x50] sm:$0xff] %v469_v54  ;;  %v424_v55 = vpop.f32.mrf.mxu2  ;;  %v444_v56 = vpop.f32.mrf.mxu3 }
  0xc0   : > { %v425_v57 = vadd.f32 %v830_v24, %v424_v55  ;;  %v445_v58 = vadd.f32 %v830_v24, %v444_v56  ;;  %v386_v59 = vpop.f32.mrf.mxu0  ;;  %v406_v60 = vpop.f32.mrf.mxu1 }
  0xc1   : > { %v387_v61 = vadd.f32 %v830_v24, %v386_v59  ;;  %v407_v62 = vadd.f32 %v830_v24, %v406_v60 }
  0xc2   : > { %v477_v63 = vmax.f32 %v425_v57, 0.0  ;;  %v485_v0 = vmax.f32 %v445_v58, 0.0 }
  0xc3   : > { %v462_v1 = vmax.f32 %v387_v61, 0.0  ;;  %v470_v2 = vmax.f32 %v407_v62, 0.0 }
  0xc4   : > { %509 = vst [vmem:[%s838_s14 + $0x90] sm:$0xff] %v477_v63 }
  0xc5   : > { %517 = vst [vmem:[%s838_s14 + $0xd0] sm:$0xff] %v485_v0 }
  0xc6   : > { %494 = vst [vmem:[%s838_s14 + $0x18] sm:$0xff] %v462_v1 }
  0xc7   : > { %502 = vst [vmem:[%s838_s14 + $0x58] sm:$0xff] %v470_v2  ;;  %v426_v3 = vpop.f32.mrf.mxu2  ;;  %v446_v4 = vpop.f32.mrf.mxu3 }
  0xc8   : > { %v427_v5 = vadd.f32 %v830_v24, %v426_v3  ;;  %v447_v6 = vadd.f32 %v830_v24, %v446_v4  ;;  %v389_v7 = vpop.f32.mrf.mxu0  ;;  %v409_v8 = vpop.f32.mrf.mxu1 }
  0xc9   : > { %v390_v9 = vadd.f32 %v830_v24, %v389_v7  ;;  %v410_v10 = vadd.f32 %v830_v24, %v409_v8 }
  0xca   : > { %v478_v11 = vmax.f32 %v427_v5, 0.0  ;;  %v486_v12 = vmax.f32 %v447_v6, 0.0 }
  0xcb   : > { %v463_v13 = vmax.f32 %v390_v9, 0.0  ;;  %v471_v14 = vmax.f32 %v410_v10, 0.0 }
  0xcc   : > { %510 = vst [vmem:[%s838_s14 + $0x98] sm:$0xff] %v478_v11 }
  0xcd   : > { %518 = vst [vmem:[%s838_s14 + $0xd8] sm:$0xff] %v486_v12 }
  0xce   : > { %495 = vst [vmem:[%s838_s14 + $0x20] sm:$0xff] %v463_v13 }
  0xcf   : > { %503 = vst [vmem:[%s838_s14 + $0x60] sm:$0xff] %v471_v14  ;;  %v429_v15 = vpop.f32.mrf.mxu2  ;;  %v449_v16 = vpop.f32.mrf.mxu3 }
  0xd0   : > { %v430_v17 = vadd.f32 %v830_v24, %v429_v15  ;;  %v450_v18 = vadd.f32 %v830_v24, %v449_v16  ;;  %v391_v19 = vpop.f32.mrf.mxu0  ;;  %v411_v20 = vpop.f32.mrf.mxu1 }
  0xd1   : > { %v392_v21 = vadd.f32 %v830_v24, %v391_v19  ;;  %v412_v22 = vadd.f32 %v830_v24, %v411_v20 }
  0xd2   : > { %v479_v23 = vmax.f32 %v430_v17, 0.0  ;;  %v487_v25 = vmax.f32 %v450_v18, 0.0 }
  0xd3   : > { %v464_v26 = vmax.f32 %v392_v21, 0.0  ;;  %v472_v27 = vmax.f32 %v412_v22, 0.0 }
  0xd4   : > { %511 = vst [vmem:[%s838_s14 + $0xa0] sm:$0xff] %v479_v23 }
  0xd5   : > { %519 = vst [vmem:[%s838_s14 + $0xe0] sm:$0xff] %v487_v25 }
  0xd6   : > { %496 = vst [vmem:[%s838_s14 + $0x28] sm:$0xff] %v464_v26 }
  0xd7   : > { %504 = vst [vmem:[%s838_s14 + $0x68] sm:$0xff] %v472_v27  ;;  %v431_v28 = vpop.f32.mrf.mxu2  ;;  %v451_v29 = vpop.f32.mrf.mxu3 }
  0xd8   : > { %v432_v30 = vadd.f32 %v830_v24, %v431_v28  ;;  %v452_v31 = vadd.f32 %v830_v24, %v451_v29  ;;  %v394_v32 = vpop.f32.mrf.mxu0  ;;  %v414_v33 = vpop.f32.mrf.mxu1 }
  0xd9   : > { %v395_v34 = vadd.f32 %v830_v24, %v394_v32  ;;  %v415_v35 = vadd.f32 %v830_v24, %v414_v33 }
  0xda   : > { %v480_v36 = vmax.f32 %v432_v30, 0.0  ;;  %v488_v37 = vmax.f32 %v452_v31, 0.0 }
  0xdb   : > { %v465_v38 = vmax.f32 %v395_v34, 0.0  ;;  %v473_v39 = vmax.f32 %v415_v35, 0.0 }
  0xdc   : > { %512 = vst [vmem:[%s838_s14 + $0xa8] sm:$0xff] %v480_v36 }
  0xdd   : > { %520 = vst [vmem:[%s838_s14 + $0xe8] sm:$0xff] %v488_v37 }
  0xde   : > { %497 = vst [vmem:[%s838_s14 + $0x30] sm:$0xff] %v465_v38 }
  0xdf   : > { %505 = vst [vmem:[%s838_s14 + $0x70] sm:$0xff] %v473_v39  ;;  %v434_v40 = vpop.f32.mrf.mxu2  ;;  %v454_v41 = vpop.f32.mrf.mxu3 }
  0xe0   : > { %v435_v42 = vadd.f32 %v830_v24, %v434_v40  ;;  %v455_v43 = vadd.f32 %v830_v24, %v454_v41  ;;  %v396_v44 = vpop.f32.mrf.mxu0  ;;  %v416_v45 = vpop.f32.mrf.mxu1 }
  0xe1   : > { %v397_v46 = vadd.f32 %v830_v24, %v396_v44  ;;  %v417_v47 = vadd.f32 %v830_v24, %v416_v45 }
  0xe2   : > { %v481_v48 = vmax.f32 %v435_v42, 0.0  ;;  %v489_v49 = vmax.f32 %v455_v43, 0.0 }
  0xe3   : > { %v466_v50 = vmax.f32 %v397_v46, 0.0  ;;  %v474_v51 = vmax.f32 %v417_v47, 0.0 }
  0xe4   : > { %513 = vst [vmem:[%s838_s14 + $0xb0] sm:$0xff] %v481_v48 }
  0xe5   : > { %521 = vst [vmem:[%s838_s14 + $0xf0] sm:$0xff] %v489_v49 }
  0xe6   : > { %498 = vst [vmem:[%s838_s14 + $0x38] sm:$0xff] %v466_v50 }
  0xe7   : > { %506 = vst [vmem:[%s838_s14 + $0x78] sm:$0xff] %v474_v51  ;;  %v436_v52 = vpop.f32.mrf.mxu2  ;;  %v456_v53 = vpop.f32.mrf.mxu3 }
  0xe8   : > { %v437_v54 = vadd.f32 %v830_v24, %v436_v52  ;;  %v457_v55 = vadd.f32 %v830_v24, %v456_v53 }
  0xea   : > { %v482_v56 = vmax.f32 %v437_v54, 0.0  ;;  %v490_v57 = vmax.f32 %v457_v55, 0.0 }
  0xec   : > { %514 = vst [vmem:[%s838_s14 + $0xb8] sm:$0xff] %v482_v56 }
  0xed   : > { %522 = vst [vmem:[%s838_s14 + $0xf8] sm:$0xff] %v490_v57 }
  0xee PF: > { %s13_s12 = sadd.s32 1, %s749_s12  }
  0xef   : > { %p10_p4 = scmp.ge.s32.totalorder %s13_s12, 4  }
  0xf1   :  { %12 = sbr.rel (!%p10_p4) target bundleno = 1 (0x1), region = 62 }

// kernel: _lambda_.4
= control target key start
LH: loop header
LB: loop body
LE: loop exit
PB: predicated region body
PF: predicated region fallthrough
CT: control target
= control target key end

     0   :  { %s3250_s12 = smov 0   ;;  %s4064_s0 = inlined_call_operand.vmem [shape: f32[2,18,18,128], index: 0, kind: input, shape index: {}]   ;;  %s4065_s1 = inlined_call_operand.vmem [shape: bf16[9,128,128], index: 1, kind: input, shape index: {}]   ;;  %s4066_s2 = inlined_call_operand.vmem [shape: f32[1,128], index: 2, kind: input, shape index: {}]   ;;  %s4067_s3 = inlined_call_operand.vmem [shape: bf16[512,128], index: 3, kind: output, shape index: {}]  }
   0x1 LB: > { %s3256_s13 = sadd.s32 4294967295, %s3228_s12   ;;  %p2407_p0 = scmp.ge.s32.totalorder %s3228_s12, 1  ;;  %s3228_s12 = sphi %s3250_s12, %s13_s12  }
   0x2   : > { %p137_p1 = scmp.lt.s32.totalorder %s3228_s12, 3 }
   0x4   : > { %p138_p2 = pnand %p2407_p0, %p137_p1 }
   0x6   : > { %141 = sbr.rel (%p138_p2) target bundleno = 756 (0x2f4), region = 32 }
   0xb   : > { %v3036_v0 = vld [vmem:[%s4065_s1 + $0x78] sm:$0xff]  ;;  %v3035_v1 = vld [vmem:[%s4065_s1 + $0x70] sm:$0xff]  ;;  %v3034_v2 = vld [vmem:[%s4065_s1 + $0x68] sm:$0xff]  ;;  %p161_p3 = scmp.lt.s32.totalorder %s3256_s13, 1  ;;  %s2409_s18 = sshll.u32 %s3256_s13, 5 }
   0xc   : > { %3188 = vmatpush.bf16.msra.mxu1 %v3036_v0  ;;  %3189 = vmatpush.bf16.msra.mxu2 %v3036_v0  ;;  %v3033_v3 = vld [vmem:[%s4065_s1 + $0x60] sm:$0xff]  ;;  %v3032_v4 = vld [vmem:[%s4065_s1 + $0x58] sm:$0xff]  ;;  %v3031_v5 = vld [vmem:[%s4065_s1 + $0x50] sm:$0xff]  ;;  %p167_p4 = scmp.lt.s32.totalorder %s2409_s18, 63 }
   0xd   : > { %3190 = vmatpush.bf16.msra.mxu3 %v3036_v0  ;;  %349 = vmatpush.bf16.msra.mxu0 %v3036_v0  ;;  %s162_s24 = scalar_select %p161_p3, %s3256_s13, 1  ;;  %v3030_v6 = vld [vmem:[%s4065_s1 + $0x48] sm:$0xff]  ;;  %v3029_v7 = vld [vmem:[%s4065_s1 + $0x40] sm:$0xff]  ;;  %v3044_v16 = vld [vmem:[%s4065_s1 + $0xb8] sm:$0xff] }
   0xe   : > { %v3052_v17 = vld [vmem:[%s4065_s1 + $0xf8] sm:$0xff]  ;;  %v3043_v24 = vld [vmem:[%s4065_s1 + $0xb0] sm:$0xff]  ;;  %v3042_v28 = vld [vmem:[%s4065_s1 + $0xa8] sm:$0xff]  ;;  %s4103_s18 = smov (!%p167_p4, %s2409_s18), 63 }
   0xf   : > { %s3212_s27 = smul.u32 432, %s162_s24  ;;  %v3028_v22 = vld [vmem:[%s4065_s1 + $0x38] sm:$0xff]  ;;  %v3051_v25 = vld [vmem:[%s4065_s1 + $0xf0] sm:$0xff]  ;;  %v3050_v29 = vld [vmem:[%s4065_s1 + $0xe8] sm:$0xff]  ;;  %s2410_s13 = sshll.u32 %s4103_s18, 2 }
  0x10   : > { %3191 = vmatpush.bf16.msra.mxu1 %v3035_v1  ;;  %3192 = vmatpush.bf16.msra.mxu2 %v3035_v1  ;;  %v3060_v23 = vld [vmem:[%s4065_s1 + $0x138] sm:$0xff]  ;;  %v3027_v26 = vld [vmem:[%s4065_s1 + $0x30] sm:$0xff]  ;;  %v3026_v30 = vld [vmem:[%s4065_s1 + $0x28] sm:$0xff]  ;;  %s3949_s23 = scalar_lea.vmem %s4067_s3, %s2410_s13 }
  0x11   : > { %3193 = vmatpush.bf16.msra.mxu3 %v3035_v1  ;;  %350 = vmatpush.bf16.msra.mxu0 %v3035_v1  ;;  %s3286_s5 = scalar_lea.vmem %s4064_s0, %s3212_s27  ;;  %v3059_v27 = vld [vmem:[%s4065_s1 + $0x130] sm:$0xff]  ;;  %v3058_v31 = vld [vmem:[%s4065_s1 + $0x128] sm:$0xff]  ;;  %v3041_v33 = vld [vmem:[%s4065_s1 + $0xa0] sm:$0xff] }
  0x12   : > { %v244_v8 = vld [vmem:[%s3286_s5 + $0x61] sm:$0xff]  ;;  %v245_v9 = vld [vmem:[%s3286_s5 + $0x69] sm:$0xff]  ;;  %v246_v32 = vld [vmem:[%s3286_s5 + $0x79] sm:$0xff] }
  0x13   : > { %v252_v10 = vld [vmem:[%s3286_s5 + $0xc1] sm:$0xff]  ;;  %v253_v11 = vld [vmem:[%s3286_s5 + $0xc9] sm:$0xff]  ;;  %v3305_v18 = vpack.c.bf16 %v245_v9, %v244_v8  ;;  %v254_v36 = vld [vmem:[%s3286_s5 + $0xd9] sm:$0xff] }
  0x14   : > { %3194 = vmatpush.bf16.msra.mxu1 %v3034_v2  ;;  %3195 = vmatpush.bf16.msra.mxu2 %v3034_v2  ;;  %v260_v12 = vld [vmem:[%s3286_s5 + $0x121] sm:$0xff]  ;;  %v261_v13 = vld [vmem:[%s3286_s5 + $0x129] sm:$0xff]  ;;  %v3307_v19 = vpack.c.bf16 %v253_v11, %v252_v10  ;;  %v262_v38 = vld [vmem:[%s3286_s5 + $0x139] sm:$0xff] }
  0x15   : > { %3196 = vmatpush.bf16.msra.mxu3 %v3034_v2  ;;  %351 = vmatpush.bf16.msra.mxu0 %v3034_v2  ;;  %v236_v14 = vld [vmem:[%s3286_s5 + $0x1] sm:$0xff]  ;;  %v237_v15 = vld [vmem:[%s3286_s5 + $0x9] sm:$0xff]  ;;  %v280_v20 = vpack.c.bf16 %v261_v13, %v260_v12  ;;  %v238_v40 = vld [vmem:[%s3286_s5 + $0x19] sm:$0xff] }
  0x16   : > { %v268_v21 = vpack.c.bf16 %v237_v15, %v236_v14  ;;  %v3049_v34 = vld [vmem:[%s4065_s1 + $0xe0] sm:$0xff]  ;;  %v3040_v44 = vld [vmem:[%s4065_s1 + $0x98] sm:$0xff]  ;;  %v3039_v52 = vld [vmem:[%s4065_s1 + $0x90] sm:$0xff] }
  0x17   : > { %v247_v35 = vld [vmem:[%s3286_s5 + $0x81] sm:$0xff]  ;;  %v3048_v45 = vld [vmem:[%s4065_s1 + $0xd8] sm:$0xff]  ;;  %v3047_v53 = vld [vmem:[%s4065_s1 + $0xd0] sm:$0xff] }
  0x18   : > { %3197 = vmatpush.bf16.msra.mxu1 %v3033_v3  ;;  %3198 = vmatpush.bf16.msra.mxu2 %v3033_v3  ;;  %v255_v37 = vld [vmem:[%s3286_s5 + $0xe1] sm:$0xff]  ;;  %v3367_v46 = vpack.c.bf16 %v247_v35, %v246_v32  ;;  %v3024_v50 = vld [vmem:[%s4065_s1 + $0x18] sm:$0xff]  ;;  %v3023_v54 = vld [vmem:[%s4065_s1 + $0x10] sm:$0xff] }
  0x19   : > { %3199 = vmatpush.bf16.msra.mxu3 %v3033_v3  ;;  %352 = vmatpush.bf16.msra.mxu0 %v3033_v3  ;;  %v263_v39 = vld [vmem:[%s3286_s5 + $0x141] sm:$0xff]  ;;  %v3369_v47 = vpack.c.bf16 %v255_v37, %v254_v36  ;;  %v3056_v51 = vld [vmem:[%s4065_s1 + $0x118] sm:$0xff]  ;;  %v3055_v55 = vld [vmem:[%s4065_s1 + $0x110] sm:$0xff] }
  0x1a   : > { %v239_v41 = vld [vmem:[%s3286_s5 + $0x21] sm:$0xff]  ;;  %v281_v48 = vpack.c.bf16 %v263_v39, %v262_v38  ;;  %v248_v60 = vld [vmem:[%s3286_s5 + $0x91] sm:$0xff]  ;;  %v249_v63 = vld [vmem:[%s3286_s5 + $0x99] sm:$0xff] }
  0x1b   : > { %v3025_v42 = vld [vmem:[%s4065_s1 + $0x20] sm:$0xff]  ;;  %v3371_v49 = vpack.c.bf16 %v239_v41, %v238_v40  ;;  %v3038_v56 = vld [vmem:[%s4065_s1 + $0x88] sm:$0xff]  ;;  %v256_v0 = vld [vmem:[%s3286_s5 + $0xf1] sm:$0xff]  ;;  %v3426_v8 = vpack.c.bf16 %v249_v63, %v248_v60 }
  0x1c   : > { %3200 = vmatpush.bf16.msra.mxu1 %v3032_v4  ;;  %3201 = vmatpush.bf16.msra.mxu2 %v3032_v4  ;;  %v3057_v43 = vld [vmem:[%s4065_s1 + $0x120] sm:$0xff]  ;;  %v3046_v57 = vld [vmem:[%s4065_s1 + $0xc8] sm:$0xff]  ;;  %v264_v2 = vld [vmem:[%s3286_s5 + $0x151] sm:$0xff] }
  0x1d   : > { %3202 = vmatpush.bf16.msra.mxu3 %v3032_v4  ;;  %353 = vmatpush.bf16.msra.mxu0 %v3032_v4  ;;  %v3022_v58 = vld [vmem:[%s4065_s1 + $0x8] sm:$0xff]  ;;  %v3037_v61 = vld [vmem:[%s4065_s1 + $0x80] sm:$0xff]  ;;  %v240_v4 = vld [vmem:[%s3286_s5 + $0x31] sm:$0xff] }
  0x1e   : > { %v3054_v59 = vld [vmem:[%s4065_s1 + $0x108] sm:$0xff]  ;;  %v3045_v62 = vld [vmem:[%s4065_s1 + $0xc0] sm:$0xff]  ;;  %v3076_v12 = vld [vmem:[%s4065_s1 + $0x1b8] sm:$0xff] }
  0x1f   : > { %v257_v1 = vld [vmem:[%s3286_s5 + $0xf9] sm:$0xff]  ;;  %v575_v32 = vld [vmem:[%s3286_s5 + $0x2] sm:$0xff]  ;;  %v3075_v39 = vld [vmem:[%s4065_s1 + $0x1b0] sm:$0xff] }
  0x20   : > { %3203 = vmatpush.bf16.msra.mxu1 %v3031_v5  ;;  %3204 = vmatpush.bf16.msra.mxu2 %v3031_v5  ;;  %v265_v3 = vld [vmem:[%s3286_s5 + $0x159] sm:$0xff]  ;;  %v3428_v9 = vpack.c.bf16 %v257_v1, %v256_v0  ;;  %v3083_v40 = vld [vmem:[%s4065_s1 + $0x1f0] sm:$0xff]  ;;  %v3090_v60 = vld [vmem:[%s4065_s1 + $0x228] sm:$0xff] }
  0x21   : > { %3205 = vmatpush.bf16.msra.mxu3 %v3031_v5  ;;  %354 = vmatpush.bf16.msra.mxu0 %v3031_v5  ;;  %v241_v5 = vld [vmem:[%s3286_s5 + $0x39] sm:$0xff]  ;;  %v282_v10 = vpack.c.bf16 %v265_v3, %v264_v2  ;;  %v3067_v41 = vld [vmem:[%s4065_s1 + $0x170] sm:$0xff]  ;;  %v2546_v0 = vld [vmem:[%s3286_s5 + $0x68] sm:$0xff] }
  0x22   : > { %v270_v11 = vpack.c.bf16 %v241_v5, %v240_v4  ;;  %v3084_v13 = vld [vmem:[%s4065_s1 + $0x1f8] sm:$0xff]  ;;  %v2540_v35 = vld [vmem:[%s3286_s5 + $0x20] sm:$0xff]  ;;  %v584_v4 = vld [vmem:[%s3286_s5 + $0x6a] sm:$0xff] }
  0x23   : > { %v3068_v14 = vld [vmem:[%s4065_s1 + $0x178] sm:$0xff]  ;;  %v2545_v63 = vld [vmem:[%s3286_s5 + $0x60] sm:$0xff] }
  0x24   : > { %3206 = vmatpush.bf16.msra.mxu1 %v3030_v6  ;;  %3207 = vmatpush.bf16.msra.mxu2 %v3030_v6  ;;  %v3092_v15 = vld [vmem:[%s4065_s1 + $0x238] sm:$0xff]  ;;  %v3516_v2 = vpack.c.bf16 %v2546_v0, %v2545_v63  ;;  %v583_v3 = vld [vmem:[%s3286_s5 + $0x62] sm:$0xff] }
  0x25   : > { %3208 = vmatpush.bf16.msra.mxu3 %v3030_v6  ;;  %355 = vmatpush.bf16.msra.mxu0 %v3030_v6  ;;  %v3021_v6 = vld [vmem:[%s4065_s1] sm:$0xff]  ;;  %v2547_v5 = vld [vmem:[%s3286_s5 + $0x78] sm:$0xff] }
  0x28   : > { %3209 = vmatpush.bf16.msra.mxu1 %v3029_v7  ;;  %3210 = vmatpush.bf16.msra.mxu2 %v3029_v7 }
  0x29   : > { %3211 = vmatpush.bf16.msra.mxu3 %v3029_v7  ;;  %356 = vmatpush.bf16.msra.mxu0 %v3029_v7  ;;  %v3053_v7 = vld [vmem:[%s4065_s1 + $0x100] sm:$0xff] }
  0x2b   : > { %377 = vmatmul.bf16.vlgmr.msra.gmra.mxu1 %v3305_v18  ;;  %397 = vmatmul.bf16.vlgmr.msra.gmra.mxu2 %v3307_v19 }
  0x2c   : > { %688 = vmatpush.bf16.msrb.mxu2 %v3044_v16  ;;  %417 = vmatmul.bf16.vlgmr.msra.gmra.mxu3 %v280_v20  ;;  %v250_v16 = vld [vmem:[%s3286_s5 + $0xa9] sm:$0xff] }
  0x2d   : > { %923 = vmatpush.bf16.msrb.mxu3 %v3052_v17  ;;  %357 = vmatmul.bf16.vlgmr.msra.gmra.mxu0 %v268_v21  ;;  %v251_v17 = vld [vmem:[%s3286_s5 + $0xb1] sm:$0xff]  ;;  %v258_v20 = vld [vmem:[%s3286_s5 + $0x109] sm:$0xff] }
  0x2e   : > { %486 = vmatpush.bf16.msrb.mxu1 %v3028_v22  ;;  %1157 = vmatpush.bf16.msrb.mxu0 %v3060_v23  ;;  %v259_v21 = vld [vmem:[%s3286_s5 + $0x111] sm:$0xff]  ;;  %v266_v22 = vld [vmem:[%s3286_s5 + $0x169] sm:$0xff] }
  0x2f   : > { %v267_v23 = vld [vmem:[%s3286_s5 + $0x171] sm:$0xff] }
  0x30   : > { %689 = vmatpush.bf16.msrb.mxu2 %v3043_v24  ;;  %v242_v24 = vld [vmem:[%s3286_s5 + $0x49] sm:$0xff] }
  0x31   : > { %924 = vmatpush.bf16.msrb.mxu3 %v3051_v25  ;;  %v243_v25 = vld [vmem:[%s3286_s5 + $0x51] sm:$0xff] }
  0x32   : > { %487 = vmatpush.bf16.msrb.mxu1 %v3027_v26  ;;  %1158 = vmatpush.bf16.msrb.mxu0 %v3059_v27  ;;  %v3452_v26 = vpack.c.bf16 %v251_v17, %v250_v16  ;;  %v3454_v27 = vpack.c.bf16 %v259_v21, %v258_v20  ;;  %v3065_v16 = vld [vmem:[%s4065_s1 + $0x160] sm:$0xff] }
  0x33   : > { %v3089_v20 = vld [vmem:[%s4065_s1 + $0x220] sm:$0xff] }
  0x34   : > { %690 = vmatpush.bf16.msrb.mxu2 %v3042_v28  ;;  %v283_v28 = vpack.c.bf16 %v267_v23, %v266_v22  ;;  %v585_v21 = vld [vmem:[%s3286_s5 + $0x7a] sm:$0xff]  ;;  %v586_v22 = vld [vmem:[%s3286_s5 + $0x82] sm:$0xff]  ;;  %v2549_v23 = vld [vmem:[%s3286_s5 + $0x90] sm:$0xff] }
  0x35   : > { %925 = vmatpush.bf16.msrb.mxu3 %v3050_v29  ;;  %v271_v29 = vpack.c.bf16 %v243_v25, %v242_v24  ;;  %v2550_v24 = vld [vmem:[%s3286_s5 + $0x98] sm:$0xff] }
  0x36   : > { %488 = vmatpush.bf16.msrb.mxu1 %v3026_v30  ;;  %1159 = vmatpush.bf16.msrb.mxu0 %v3058_v31  ;;  %v172_v30 = vld [vmem:[%s3286_s5] sm:$0xff]  ;;  %v173_v31 = vld [vmem:[%s3286_s5 + $0x8] sm:$0xff] }
  0x37   : > { %v204_v36 = vpack.c.bf16 %v173_v31, %v172_v30  ;;  %v3567_v31 = vpack.c.bf16 %v2550_v24, %v2549_v23  ;;  %v2556_v23 = vld [vmem:[%s3286_s5 + $0xe0] sm:$0xff] }
  0x38   : > { %691 = vmatpush.bf16.msrb.mxu2 %v3041_v33  ;;  %v576_v33 = vld [vmem:[%s3286_s5 + $0xa] sm:$0xff] }
  0x39   : > { %926 = vmatpush.bf16.msrb.mxu3 %v3049_v34  ;;  %v2539_v34 = vld [vmem:[%s3286_s5 + $0x18] sm:$0xff]  ;;  %v607_v37 = vpack.c.bf16 %v576_v33, %v575_v32 }
  0x3a   : > { %489 = vmatpush.bf16.msrb.mxu1 %v3025_v42  ;;  %1160 = vmatpush.bf16.msrb.mxu0 %v3057_v43  ;;  %v842_v38 = vpack.c.bf16 %v2540_v35, %v2539_v34  ;;  %v3091_v42 = vld [vmem:[%s4065_s1 + $0x230] sm:$0xff]  ;;  %v577_v43 = vld [vmem:[%s3286_s5 + $0x1a] sm:$0xff] }
  0x3b   : > { %382 = vmatmul.bf16.gmra.mxu1 %v3367_v46  ;;  %402 = vmatmul.bf16.gmra.mxu2 %v3369_v47 }
  0x3c   : > { %692 = vmatpush.bf16.msrb.mxu2 %v3040_v44  ;;  %422 = vmatmul.bf16.gmra.mxu3 %v281_v48  ;;  %v578_v44 = vld [vmem:[%s3286_s5 + $0x22] sm:$0xff]  ;;  %v2542_v48 = vld [vmem:[%s3286_s5 + $0x38] sm:$0xff] }
  0x3d   : > { %927 = vmatpush.bf16.msrb.mxu3 %v3048_v45  ;;  %362 = vmatmul.bf16.gmra.mxu0 %v3371_v49  ;;  %v2541_v45 = vld [vmem:[%s3286_s5 + $0x30] sm:$0xff] }
  0x3e   : > { %490 = vmatpush.bf16.msrb.mxu1 %v3024_v50  ;;  %1161 = vmatpush.bf16.msrb.mxu0 %v3056_v51  ;;  %v3483_v50 = vpack.c.bf16 %v2542_v48, %v2541_v45  ;;  %v579_v51 = vld [vmem:[%s3286_s5 + $0x32] sm:$0xff] }
  0x3f   : > { %v3072_v48 = vld [vmem:[%s4065_s1 + $0x198] sm:$0xff] }
  0x40   : > { %693 = vmatpush.bf16.msrb.mxu2 %v3039_v52  ;;  %v580_v52 = vld [vmem:[%s3286_s5 + $0x3a] sm:$0xff] }
  0x41   : > { %928 = vmatpush.bf16.msrb.mxu3 %v3047_v53  ;;  %v2543_v53 = vld [vmem:[%s3286_s5 + $0x48] sm:$0xff] }
  0x42   : > { %491 = vmatpush.bf16.msrb.mxu1 %v3023_v54  ;;  %1162 = vmatpush.bf16.msrb.mxu0 %v3055_v55  ;;  %v2544_v54 = vld [vmem:[%s3286_s5 + $0x50] sm:$0xff]  ;;  %v3491_v55 = vpack.c.bf16 %v580_v52, %v579_v51  ;;  %v3080_v51 = vld [vmem:[%s4065_s1 + $0x1d8] sm:$0xff] }
  0x44   : > { %694 = vmatpush.bf16.msrb.mxu2 %v3038_v56  ;;  %v3493_v56 = vpack.c.bf16 %v2544_v54, %v2543_v53 }
  0x45   : > { %929 = vmatpush.bf16.msrb.mxu3 %v3046_v57  ;;  %v3074_v57 = vld [vmem:[%s4065_s1 + $0x1a8] sm:$0xff] }
  0x46   : > { %492 = vmatpush.bf16.msrb.mxu1 %v3022_v58  ;;  %1163 = vmatpush.bf16.msrb.mxu0 %v3054_v59  ;;  %v3082_v58 = vld [vmem:[%s4065_s1 + $0x1e8] sm:$0xff] }
  0x47   : > { %v3066_v59 = vld [vmem:[%s4065_s1 + $0x168] sm:$0xff] }
  0x48   : > { %695 = vmatpush.bf16.msrb.mxu2 %v3037_v61  ;;  %v581_v61 = vld [vmem:[%s3286_s5 + $0x4a] sm:$0xff] }
  0x49   : > { %930 = vmatpush.bf16.msrb.mxu3 %v3045_v62  ;;  %v582_v62 = vld [vmem:[%s3286_s5 + $0x52] sm:$0xff] }
  0x4a   : > { %493 = vmatpush.bf16.msrb.mxu1 %v3021_v6  ;;  %1164 = vmatpush.bf16.msrb.mxu0 %v3053_v7  ;;  %v3514_v1 = vpack.c.bf16 %v582_v62, %v581_v61  ;;  %v2548_v6 = vld [vmem:[%s3286_s5 + $0x80] sm:$0xff]  ;;  %v3526_v7 = vpack.c.bf16 %v584_v4, %v583_v3  ;;  %v2554_v62 = vld [vmem:[%s3286_s5 + $0xc8] sm:$0xff] }
  0x4b   : > { %387 = vmatmul.bf16.gmra.mxu1 %v3426_v8  ;;  %407 = vmatmul.bf16.gmra.mxu2 %v3428_v9  ;;  %v2553_v61 = vld [vmem:[%s3286_s5 + $0xc0] sm:$0xff] }
  0x4c   : > { %427 = vmatmul.bf16.gmra.mxu3 %v282_v10  ;;  %1626 = vmatpush.bf16.msra.mxu2 %v3076_v12 }
  0x4d   : > { %367 = vmatmul.bf16.gmra.mxu0 %v270_v11  ;;  %1860 = vmatpush.bf16.msra.mxu3 %v3084_v13  ;;  %v3081_v13 = vld [vmem:[%s4065_s1 + $0x1e0] sm:$0xff] }
  0x4e   : > { %1391 = vmatpush.bf16.msra.mxu1 %v3068_v14  ;;  %2094 = vmatpush.bf16.msra.mxu0 %v3092_v15 }
  0x50   : > { %1627 = vmatpush.bf16.msra.mxu2 %v3075_v39  ;;  %v2551_v39 = vld [vmem:[%s3286_s5 + $0xa8] sm:$0xff] }
  0x51   : > { %1861 = vmatpush.bf16.msra.mxu3 %v3083_v40  ;;  %v2552_v40 = vld [vmem:[%s3286_s5 + $0xb0] sm:$0xff] }
  0x52   : > { %1392 = vmatpush.bf16.msra.mxu1 %v3067_v41  ;;  %2095 = vmatpush.bf16.msra.mxu0 %v3091_v42 }
  0x54   : > { %1628 = vmatpush.bf16.msra.mxu2 %v3074_v57 }
  0x55   : > { %1862 = vmatpush.bf16.msra.mxu3 %v3082_v58  ;;  %v3088_v58 = vld [vmem:[%s4065_s1 + $0x218] sm:$0xff] }
  0x56   : > { %1393 = vmatpush.bf16.msra.mxu1 %v3066_v59  ;;  %2096 = vmatpush.bf16.msra.mxu0 %v3090_v60  ;;  %v589_v59 = vld [vmem:[%s3286_s5 + $0xaa] sm:$0xff]  ;;  %v590_v60 = vld [vmem:[%s3286_s5 + $0xb2] sm:$0xff] }
  0x57   : > { %v3627_v3 = vpack.c.bf16 %v590_v60, %v589_v59 }
  0x59   : > { %1863 = vmatpush.bf16.msra.mxu3 %v3081_v13 }
  0x5a   : > { %1394 = vmatpush.bf16.msra.mxu1 %v3065_v16  ;;  %2097 = vmatpush.bf16.msra.mxu0 %v3089_v20  ;;  %v591_v20 = vld [vmem:[%s3286_s5 + $0xc2] sm:$0xff] }
  0x5b   : > { %392 = vmatmul.bf16.gmra.mxu1 %v3452_v26  ;;  %412 = vmatmul.bf16.gmra.mxu2 %v3454_v27 }
  0x5c   : > { %432 = vmatmul.bf16.gmra.mxu3 %v283_v28 }
  0x5d   : > { %372 = vmatmul.bf16.gmra.mxu0 %v271_v29  ;;  %1864 = vmatpush.bf16.msra.mxu3 %v3080_v51  ;;  %v3079_v51 = vld [vmem:[%s4065_s1 + $0x1d0] sm:$0xff] }
  0x5e   : > { %2098 = vmatpush.bf16.msra.mxu0 %v3088_v58 }
  0x61   : > { %1865 = vmatpush.bf16.msra.mxu3 %v3079_v51 }
  0x6b   : > { %494 = vmatmul.bf16.vlgmr.msrb.gmra.mxu1 %v204_v36  ;;  %696 = vmatmul.bf16.vlgmr.msrb.gmra.mxu2 %v607_v37  ;;  %v587_v37 = vld [vmem:[%s3286_s5 + $0x92] sm:$0xff] }
  0x6c   : > { %931 = vmatmul.bf16.vlgmr.msrb.gmra.mxu3 %v842_v38 }
  0x6d   : > { %1165 = vmatmul.bf16.vlgmr.msrb.gmra.mxu0 %v3371_v49  ;;  %v3481_v49 = vpack.c.bf16 %v578_v44, %v577_v43 }
  0x7b   : > { %499 = vmatmul.bf16.gmra.mxu1 %v842_v38  ;;  %701 = vmatmul.bf16.gmra.mxu2 %v3481_v49  ;;  %v588_v38 = vld [vmem:[%s3286_s5 + $0x9a] sm:$0xff] }
  0x7c   : > { %936 = vmatmul.bf16.gmra.mxu3 %v3483_v50  ;;  %v3590_v43 = vpack.c.bf16 %v588_v38, %v587_v37 }
  0x7d   : > { %1170 = vmatmul.bf16.gmra.mxu0 %v270_v11  ;;  %v846_v11 = vpack.c.bf16 %v2548_v6, %v2547_v5  ;;  %v3631_v5 = vpack.c.bf16 %v2554_v62, %v2553_v61  ;;  %v3063_v62 = vld [vmem:[%s4065_s1 + $0x150] sm:$0xff] }
  0x8b   : > { %504 = vmatmul.bf16.gmra.mxu1 %v3483_v50  ;;  %706 = vmatmul.bf16.gmra.mxu2 %v3491_v55 }
  0x8c   : > { %941 = vmatmul.bf16.gmra.mxu3 %v3493_v56 }
  0x8d   : > { %1175 = vmatmul.bf16.gmra.mxu0 %v271_v29  ;;  %v3563_v29 = vpack.c.bf16 %v586_v22, %v585_v21  ;;  %v592_v21 = vld [vmem:[%s3286_s5 + $0xca] sm:$0xff]  ;;  %v2555_v22 = vld [vmem:[%s3286_s5 + $0xd8] sm:$0xff] }
  0x8e   : > { %v3654_v38 = vpack.c.bf16 %v592_v21, %v591_v20  ;;  %v3087_v20 = vld [vmem:[%s4065_s1 + $0x210] sm:$0xff] }
  0x8f   : > { %2099 = vmatpush.bf16.msra.mxu0 %v3087_v20 }
  0x9b   : > { %509 = vmatmul.bf16.gmra.mxu1 %v3493_v56  ;;  %711 = vmatmul.bf16.gmra.mxu2 %v3514_v1 }
  0x9c   : > { %946 = vmatmul.bf16.gmra.mxu3 %v3516_v2 }
  0x9d   : > { %1180 = vmatmul.bf16.gmra.mxu0 %v3305_v18  ;;  %v3073_v18 = vld [vmem:[%s4065_s1 + $0x1a0] sm:$0xff] }
  0x9e   : > { %1629 = vmatpush.bf16.msra.mxu2 %v3073_v18 }
  0xa2   : > { %1630 = vmatpush.bf16.msra.mxu2 %v3072_v48  ;;  %v3071_v48 = vld [vmem:[%s4065_s1 + $0x190] sm:$0xff] }
  0xa6   : > { %1631 = vmatpush.bf16.msra.mxu2 %v3071_v48 }
  0xa8   : > { %v3528_v10 = vpop.f32.mrf.mxu1 }
  0xaa   : > { %v3530_v12 = vpop.f32.mrf.mxu0 }
  0xab   : > { %514 = vmatmul.bf16.gmra.mxu1 %v3516_v2  ;;  %716 = vmatmul.bf16.gmra.mxu2 %v3526_v7 }
  0xac   : > { %951 = vmatmul.bf16.gmra.mxu3 %v846_v11 }
  0xad   : > { %1185 = vmatmul.bf16.gmra.mxu0 %v3367_v46 }
  0xae   : > { %v3541_v14 = vpop.f32.mrf.mxu2 }
  0xaf   : > { %v3543_v15 = vpop.f32.mrf.mxu3 }
  0xb0   : > { %v3548_v46 = vpop.f32.mrf.mxu1 }
  0xb2   : > { %v3550_v17 = vpop.f32.mrf.mxu0 }
  0xb6   : > { %v3559_v25 = vpop.f32.mrf.mxu2 }
  0xb7   : > { %v3561_v28 = vpop.f32.mrf.mxu3 }
  0xb8   : > { %v3565_v30 = vpop.f32.mrf.mxu1 }
  0xba   : > { %v3569_v32 = vpop.f32.mrf.mxu0 }
  0xbb   : > { %519 = vmatmul.bf16.gmra.mxu1 %v846_v11  ;;  %721 = vmatmul.bf16.gmra.mxu2 %v3563_v29 }
  0xbc   : > { %956 = vmatmul.bf16.gmra.mxu3 %v3567_v31 }
  0xbd   : > { %1190 = vmatmul.bf16.gmra.mxu0 %v3426_v8  ;;  %v848_v8 = vpack.c.bf16 %v2552_v40, %v2551_v39 }
  0xbe   : > { %v3574_v33 = vpop.f32.mrf.mxu2 }
  0xbf   : > { %v3576_v34 = vpop.f32.mrf.mxu3 }
  0xc0   : > { %v3578_v35 = vpop.f32.mrf.mxu1 }
  0xc2   : > { %v3580_v36 = vpop.f32.mrf.mxu0 }
  0xc6   : > { %v3586_v41 = vpop.f32.mrf.mxu2 }
  0xc7   : > { %v3588_v42 = vpop.f32.mrf.mxu3 }
  0xc8   : > { %v3592_v44 = vpop.f32.mrf.mxu1 }
  0xca   : > { %v3594_v45 = vpop.f32.mrf.mxu0 }
  0xcb   : > { %524 = vmatmul.bf16.gmra.mxu1 %v3567_v31  ;;  %726 = vmatmul.bf16.gmra.mxu2 %v3590_v43 }
  0xcc   : > { %961 = vmatmul.bf16.gmra.mxu3 %v848_v8 }
  0xcd   : > { %1195 = vmatmul.bf16.gmra.mxu0 %v3452_v26  ;;  %v3064_v26 = vld [vmem:[%s4065_s1 + $0x158] sm:$0xff] }
  0xce   : > { %v3605_v52 = vpop.f32.mrf.mxu2  ;;  %1395 = vmatpush.bf16.msra.mxu1 %v3064_v26 }
  0xcf   : > { %v3607_v53 = vpop.f32.mrf.mxu3 }
  0xd0   : > { %v3609_v54 = vpop.f32.mrf.mxu1 }
  0xd2   : > { %v3611_v57 = vpop.f32.mrf.mxu0  ;;  %1396 = vmatpush.bf16.msra.mxu1 %v3063_v62 }
  0xd6   : > { %v3623_v63 = vpop.f32.mrf.mxu2 }
  0xd7   : > { %v3625_v0 = vpop.f32.mrf.mxu3 }
  0xd8   : > { %v3629_v4 = vpop.f32.mrf.mxu1 }
  0xda   : > { %v3633_v6 = vpop.f32.mrf.mxu0 }
  0xdb   : > { %529 = vmatmul.bf16.gmra.mxu1 %v848_v8  ;;  %731 = vmatmul.bf16.gmra.mxu2 %v3627_v3 }
  0xdc   : > { %966 = vmatmul.bf16.gmra.mxu3 %v3631_v5 }
  0xdd   : > { %1200 = vmatmul.bf16.gmra.mxu0 %v3307_v19  ;;  %v3656_v19 = vpack.c.bf16 %v2556_v23, %v2555_v22  ;;  %v593_v22 = vld [vmem:[%s3286_s5 + $0xda] sm:$0xff]  ;;  %v594_v23 = vld [vmem:[%s3286_s5 + $0xe2] sm:$0xff] }
  0xde   : > { %v3638_v11 = vpop.f32.mrf.mxu2 }
  0xdf   : > { %v3640_v18 = vpop.f32.mrf.mxu3 }
  0xe0   : > { %4070 = vst [vmem:[#allocation2_spill] sm:$0xff] %v3640_v18  ;;  %v3642_v13 = vpop.f32.mrf.mxu1 }
  0xe2   : > { %v3644_v16 = vpop.f32.mrf.mxu0 }
  0xe6   : > { %v3650_v24 = vpop.f32.mrf.mxu2 }
  0xe7   : > { %v3652_v37 = vpop.f32.mrf.mxu3 }
  0xe8   : > { %4071 = vst [vmem:[#allocation3_spill] sm:$0xff] %v3652_v37  ;;  %v495_v39 = vpop.f32.mrf.mxu1 }
  0xe9   : > { %v496_v40 = vadd.f32 %v495_v39, %v3530_v12  ;;  %v2557_v39 = vld [vmem:[%s3286_s5 + $0xf0] sm:$0xff] }
  0xea   : > { %v1166_v8 = vpop.f32.mrf.mxu0 }
  0xeb   : > { %534 = vmatmul.bf16.gmra.mxu1 %v3631_v5  ;;  %736 = vmatmul.bf16.gmra.mxu2 %v3654_v38 }
  0xec   : > { %971 = vmatmul.bf16.gmra.mxu3 %v3656_v19 }
  0xed   : > { %1205 = vmatmul.bf16.gmra.mxu0 %v3369_v47 }
  0xee   : > { %v697_v12 = vpop.f32.mrf.mxu2 }
  0xef   : > { %v777_v26 = vadd.f32 %v697_v12, %v496_v40  ;;  %v932_v58 = vpop.f32.mrf.mxu3  ;;  %v2558_v40 = vld [vmem:[%s3286_s5 + $0xf8] sm:$0xff]  ;;  %v3682_v12 = vpack.c.bf16 %v594_v23, %v593_v22 }
  0xf0   : > { %v497_v59 = vpop.f32.mrf.mxu1 }
  0xf1   : > { %v1012_v60 = vadd.f32 %v932_v58, %v777_v26  ;;  %v498_v47 = vadd.f32 %v497_v59, %v3550_v17  ;;  %v3684_v58 = vpack.c.bf16 %v2558_v40, %v2557_v39 }
  0xf2   : > { %v1168_v61 = vpop.f32.mrf.mxu0 }
  0xf3   : > { %v3676_v21 = vadd.f32 %v1166_v8, %v1012_v60 }
  0xf5   : > { %4072 = vst [vmem:[#allocation4_spill] sm:$0xff] %v3676_v21 }
  0xf6   : > { %v699_v48 = vpop.f32.mrf.mxu2 }
  0xf7   : > { %v778_v51 = vadd.f32 %v699_v48, %v498_v47  ;;  %v934_v17 = vpop.f32.mrf.mxu3  ;;  %v595_v48 = vld [vmem:[%s3286_s5 + $0xf2] sm:$0xff] }
  0xf8   : > { %v500_v26 = vpop.f32.mrf.mxu1 }
  0xf9   : > { %v1013_v59 = vadd.f32 %v934_v17, %v778_v51  ;;  %v501_v37 = vadd.f32 %v500_v26, %v3569_v32  ;;  %v596_v51 = vld [vmem:[%s3286_s5 + $0xfa] sm:$0xff]  ;;  %v2559_v17 = vld [vmem:[%s3286_s5 + $0x108] sm:$0xff]  ;;  %v2560_v26 = vld [vmem:[%s3286_s5 + $0x110] sm:$0xff] }
  0xfa   : > { %v1171_v62 = vpop.f32.mrf.mxu0  ;;  %v3700_v21 = vpack.c.bf16 %v596_v51, %v595_v48  ;;  %v3702_v18 = vpack.c.bf16 %v2560_v26, %v2559_v17  ;;  %v3062_v48 = vld [vmem:[%s4065_s1 + $0x148] sm:$0xff] }
  0xfb   : > { %539 = vmatmul.bf16.gmra.mxu1 %v3656_v19  ;;  %741 = vmatmul.bf16.gmra.mxu2 %v3682_v12  ;;  %v3689_v8 = vadd.f32 %v1168_v61, %v1013_v59  ;;  %v3086_v51 = vld [vmem:[%s4065_s1 + $0x208] sm:$0xff] }
  0xfc   : > { %976 = vmatmul.bf16.gmra.mxu3 %v3684_v58  ;;  %1397 = vmatpush.bf16.msra.mxu1 %v3062_v48  ;;  %v597_v26 = vld [vmem:[%s3286_s5 + $0x10a] sm:$0xff] }
  0xfd   : > { %4073 = vst [vmem:[#allocation5_spill] sm:$0xff] %v3689_v8  ;;  %1210 = vmatmul.bf16.gmra.mxu0 %v3428_v9 }
  0xfe   : > { %v702_v60 = vpop.f32.mrf.mxu2  ;;  %2100 = vmatpush.bf16.msra.mxu0 %v3086_v51 }
  0xff   : > { %v779_v47 = vadd.f32 %v702_v60, %v501_v37  ;;  %v937_v20 = vpop.f32.mrf.mxu3 }
 0x100   : > { %v502_v22 = vpop.f32.mrf.mxu1 }
 0x101   : > { %v1014_v23 = vadd.f32 %v937_v20, %v779_v47  ;;  %v503_v32 = vadd.f32 %v502_v22, %v3580_v36 }
 0x102   : > { %v1173_v39 = vpop.f32.mrf.mxu0 }
 0x103   : > { %v3694_v40 = vadd.f32 %v1171_v62, %v1014_v23  ;;  %v3070_v62 = vld [vmem:[%s4065_s1 + $0x188] sm:$0xff] }
 0x104   : > { %1632 = vmatpush.bf16.msra.mxu2 %v3070_v62 }
 0x105   : > { %4074 = vst [vmem:[#allocation6_spill] sm:$0xff] %v3694_v40 }
 0x106   : > { %v704_v61 = vpop.f32.mrf.mxu2 }
 0x107   : > { %v780_v59 = vadd.f32 %v704_v61, %v503_v32  ;;  %v939_v8 = vpop.f32.mrf.mxu3  ;;  %v598_v61 = vld [vmem:[%s3286_s5 + $0x112] sm:$0xff] }
 0x108   : > { %v505_v9 = vpop.f32.mrf.mxu1 }
 0x109   : > { %v1015_v37 = vadd.f32 %v939_v8, %v780_v59  ;;  %v506_v60 = vadd.f32 %v505_v9, %v3594_v45  ;;  %v3078_v45 = vld [vmem:[%s4065_s1 + $0x1c8] sm:$0xff]  ;;  %v2561_v59 = vld [vmem:[%s3286_s5 + $0x120] sm:$0xff] }
 0x10a   : > { %v1176_v47 = vpop.f32.mrf.mxu0  ;;  %1866 = vmatpush.bf16.msra.mxu3 %v3078_v45  ;;  %v2562_v9 = vld [vmem:[%s3286_s5 + $0x128] sm:$0xff] }
 0x10b   : > { %544 = vmatmul.bf16.gmra.mxu1 %v3684_v58  ;;  %746 = vmatmul.bf16.gmra.mxu2 %v3700_v21  ;;  %v3707_v36 = vadd.f32 %v1173_v39, %v1015_v37  ;;  %v2641_v37 = vld [vmem:[%s3286_s5 + $0x121] sm:$0xff] }
 0x10c   : > { %981 = vmatmul.bf16.gmra.mxu3 %v3702_v18 }
 0x10d   : > { %4075 = vst [vmem:[#allocation7_spill] sm:$0xff] %v3707_v36  ;;  %1215 = vmatmul.bf16.gmra.mxu0 %v3454_v27 }
 0x10e   : > { %v707_v8 = vpop.f32.mrf.mxu2 }
 0x10f   : > { %v781_v20 = vadd.f32 %v707_v8, %v506_v60  ;;  %v942_v22 = vpop.f32.mrf.mxu3  ;;  %v2642_v60 = vld [vmem:[%s3286_s5 + $0x129] sm:$0xff]  ;;  %v3732_v8 = vpack.c.bf16 %v598_v61, %v597_v26 }
 0x110   : > { %v507_v27 = vpop.f32.mrf.mxu1 }
 0x111   : > { %v1016_v23 = vadd.f32 %v942_v22, %v781_v20  ;;  %v508_v32 = vadd.f32 %v507_v27, %v3611_v57  ;;  %v3734_v22 = vpack.c.bf16 %v2562_v9, %v2561_v59  ;;  %v3736_v27 = vpack.c.bf16 %v2642_v60, %v2641_v37 }
 0x112   : > { %v1178_v39 = vpop.f32.mrf.mxu0 }
 0x113   : > { %v3724_v17 = vadd.f32 %v1176_v47, %v1016_v23  ;;  %4077 = vst [vmem:[#allocation9_spill] sm:$0xff] %v3736_v27 }
 0x115   : > { %4076 = vst [vmem:[#allocation8_spill] sm:$0xff] %v3724_v17 }
 0x116   : > { %v709_v57 = vpop.f32.mrf.mxu2 }
 0x117   : > { %v782_v62 = vadd.f32 %v709_v57, %v508_v32  ;;  %v944_v45 = vpop.f32.mrf.mxu3  ;;  %v599_v57 = vld [vmem:[%s3286_s5 + $0x122] sm:$0xff] }
 0x118   : > { %v510_v20 = vpop.f32.mrf.mxu1 }
 0x119   : > { %v1017_v48 = vadd.f32 %v944_v45, %v782_v62  ;;  %v511_v47 = vadd.f32 %v510_v20, %v3633_v6  ;;  %v600_v62 = vld [vmem:[%s3286_s5 + $0x12a] sm:$0xff]  ;;  %v2563_v45 = vld [vmem:[%s3286_s5 + $0x138] sm:$0xff] }
 0x11a   : > { %v1181_v23 = vpop.f32.mrf.mxu0  ;;  %v2643_v20 = vld [vmem:[%s3286_s5 + $0x139] sm:$0xff] }
 0x11b   : > { %549 = vmatmul.bf16.gmra.mxu1 %v3702_v18  ;;  %751 = vmatmul.bf16.gmra.mxu2 %v3732_v8  ;;  %v3741_v32 = vadd.f32 %v1178_v39, %v1017_v48  ;;  %v2564_v39 = vld [vmem:[%s3286_s5 + $0x140] sm:$0xff] }
 0x11c   : > { %986 = vmatmul.bf16.gmra.mxu3 %v3734_v22  ;;  %v2644_v48 = vld [vmem:[%s3286_s5 + $0x141] sm:$0xff] }
 0x11d   : > { %4078 = vst [vmem:[#allocation10_spill] sm:$0xff] %v3741_v32  ;;  %1220 = vmatmul.bf16.gmra.mxu0 %v3736_v27  ;;  %v3754_v27 = vpack.c.bf16 %v600_v62, %v599_v57  ;;  %v3756_v40 = vpack.c.bf16 %v2644_v48, %v2643_v20  ;;  %v3061_v62 = vld [vmem:[%s4065_s1 + $0x140] sm:$0xff]  ;;  %v2565_v48 = vld [vmem:[%s3286_s5 + $0x150] sm:$0xff] }
 0x11e   : > { %v712_v51 = vpop.f32.mrf.mxu2  ;;  %1398 = vmatpush.bf16.msra.mxu1 %v3061_v62  ;;  %v602_v20 = vld [vmem:[%s3286_s5 + $0x142] sm:$0xff] }
 0x11f   : > { %v783_v26 = vadd.f32 %v712_v51, %v511_v47  ;;  %v947_v61 = vpop.f32.mrf.mxu3  ;;  %v854_v51 = vpack.c.bf16 %v2564_v39, %v2563_v45  ;;  %v601_v39 = vld [vmem:[%s3286_s5 + $0x13a] sm:$0xff] }
 0x120   : > { %v512_v6 = vpop.f32.mrf.mxu1 }
 0x121   : > { %v1018_v59 = vadd.f32 %v947_v61, %v783_v26  ;;  %v513_v9 = vadd.f32 %v512_v6, %v3644_v16  ;;  %v3077_v61 = vld [vmem:[%s4065_s1 + $0x1c0] sm:$0xff] }
 0x122   : > { %v1183_v37 = vpop.f32.mrf.mxu0  ;;  %1867 = vmatpush.bf16.msra.mxu3 %v3077_v61  ;;  %v2646_v61 = vld [vmem:[%s3286_s5 + $0x159] sm:$0xff] }
 0x123   : > { %v3746_v60 = vadd.f32 %v1181_v23, %v1018_v59 }
 0x125   : > { %4079 = vst [vmem:[#allocation11_spill] sm:$0xff] %v3746_v60 }
 0x126   : > { %v714_v32 = vpop.f32.mrf.mxu2 }
 0x127   : > { %v784_v17 = vadd.f32 %v714_v32, %v513_v9  ;;  %v949_v36 = vpop.f32.mrf.mxu3  ;;  %v3069_v32 = vld [vmem:[%s4065_s1 + $0x180] sm:$0xff] }
 0x128   : > { %v515_v47 = vpop.f32.mrf.mxu1  ;;  %1633 = vmatpush.bf16.msra.mxu2 %v3069_v32  ;;  %v2645_v32 = vld [vmem:[%s3286_s5 + $0x151] sm:$0xff] }
 0x129   : > { %v1019_v26 = vadd.f32 %v949_v36, %v784_v17  ;;  %v516_v36 = vadd.f32 %v515_v47, %v3528_v10  ;;  %v3085_v10 = vld [vmem:[%s4065_s1 + $0x200] sm:$0xff]  ;;  %v3789_v62 = vpack.c.bf16 %v2646_v61, %v2645_v32  ;;  %v603_v32 = vld [vmem:[%s3286_s5 + $0x152] sm:$0xff] }
 0x12a   : > { %v1186_v16 = vpop.f32.mrf.mxu0  ;;  %2101 = vmatpush.bf16.msra.mxu0 %v3085_v10  ;;  %v604_v61 = vld [vmem:[%s3286_s5 + $0x15a] sm:$0xff] }
 0x12b   : > { %554 = vmatmul.bf16.gmra.mxu1 %v3734_v22  ;;  %756 = vmatmul.bf16.gmra.mxu2 %v3754_v27  ;;  %v3760_v23 = vadd.f32 %v1183_v37, %v1019_v26  ;;  %v2566_v26 = vld [vmem:[%s3286_s5 + $0x158] sm:$0xff]  ;;  %4082 = vst [vmem:[#allocation14_spill] sm:$0xff] %v3789_v62 }
 0x12c   : > { %991 = vmatmul.bf16.gmra.mxu3 %v854_v51  ;;  %v3787_v60 = vpack.c.bf16 %v2566_v26, %v2565_v48 }
 0x12d   : > { %4080 = vst [vmem:[#allocation12_spill] sm:$0xff] %v3760_v23  ;;  %1225 = vmatmul.bf16.gmra.mxu0 %v3756_v40 }
 0x12e   : > { %v717_v17 = vpop.f32.mrf.mxu2 }
 0x12f   : > { %v785_v6 = vadd.f32 %v717_v17, %v516_v36  ;;  %v952_v59 = vpop.f32.mrf.mxu3 }
 0x130   : > { %v517_v9 = vpop.f32.mrf.mxu1 }
 0x131   : > { %v1020_v37 = vadd.f32 %v952_v59, %v785_v6  ;;  %v518_v47 = vadd.f32 %v517_v9, %v3548_v46  ;;  %v3785_v59 = vpack.c.bf16 %v602_v20, %v601_v39 }
 0x132   : > { %v1188_v57 = vpop.f32.mrf.mxu0 }
 0x133   : > { %v3776_v45 = vadd.f32 %v1186_v16, %v1020_v37 }
 0x135   : > { %4081 = vst [vmem:[#allocation13_spill] sm:$0xff] %v3776_v45 }
 0x136   : > { %v719_v36 = vpop.f32.mrf.mxu2 }
 0x137   : > { %v786_v17 = vadd.f32 %v719_v36, %v518_v47  ;;  %v954_v6 = vpop.f32.mrf.mxu3 }
 0x138   : > { %v520_v23 = vpop.f32.mrf.mxu1 }
 0x139   : > { %v1021_v16 = vadd.f32 %v954_v6, %v786_v17  ;;  %v521_v9 = vadd.f32 %v520_v23, %v3565_v30  ;;  %v2568_v17 = vld [vmem:[%s3286_s5 + $0x170] sm:$0xff]  ;;  %v3806_v30 = vpack.c.bf16 %v604_v61, %v603_v32 }
 0x13a   : > { %v1191_v37 = vpop.f32.mrf.mxu0  ;;  %v2647_v6 = vld [vmem:[%s3286_s5 + $0x169] sm:$0xff] }
 0x13b   : > { %559 = vmatmul.bf16.gmra.mxu1 %v854_v51  ;;  %761 = vmatmul.bf16.gmra.mxu2 %v3785_v59  ;;  %v3792_v46 = vadd.f32 %v1188_v57, %v1021_v16  ;;  %v2567_v57 = vld [vmem:[%s3286_s5 + $0x168] sm:$0xff]  ;;  %v2648_v16 = vld [vmem:[%s3286_s5 + $0x171] sm:$0xff] }
 0x13c   : > { %996 = vmatmul.bf16.gmra.mxu3 %v3787_v60 }
 0x13d   : > { %4083 = vst [vmem:[#allocation15_spill] sm:$0xff] %v3792_v46  ;;  %1230 = vmatmul.bf16.gmra.mxu0 %v3789_v62 }
 0x13e   : > { %v722_v10 = vpop.f32.mrf.mxu2 }
 0x13f   : > { %v787_v39 = vadd.f32 %v722_v10, %v521_v9  ;;  %v957_v20 = vpop.f32.mrf.mxu3  ;;  %v856_v9 = vpack.c.bf16 %v2568_v17, %v2567_v57  ;;  %v1090_v10 = vpack.c.bf16 %v2648_v16, %v2647_v6  ;;  %v605_v57 = vld [vmem:[%s3286_s5 + $0x16a] sm:$0xff]  ;;  %v2569_v17 = vld [vmem:[%s3286_s5 + $0x180] sm:$0xff] }
 0x140   : > { %v522_v48 = vpop.f32.mrf.mxu1  ;;  %v2570_v6 = vld [vmem:[%s3286_s5 + $0x188] sm:$0xff] }
 0x141   : > { %v1022_v47 = vadd.f32 %v957_v20, %v787_v39  ;;  %v523_v36 = vadd.f32 %v522_v48, %v3578_v35  ;;  %v2649_v16 = vld [vmem:[%s3286_s5 + $0x181] sm:$0xff] }
 0x142   : > { %v1193_v26 = vpop.f32.mrf.mxu0 }
 0x143   : > { %v3797_v51 = vadd.f32 %v1191_v37, %v1022_v47 }
 0x145   : > { %4084 = vst [vmem:[#allocation16_spill] sm:$0xff] %v3797_v51 }
 0x146   : > { %v724_v46 = vpop.f32.mrf.mxu2 }
 0x147   : > { %v788_v45 = vadd.f32 %v724_v46, %v523_v36  ;;  %v959_v62 = vpop.f32.mrf.mxu3  ;;  %v606_v36 = vld [vmem:[%s3286_s5 + $0x172] sm:$0xff] }
 0x148   : > { %v525_v23 = vpop.f32.mrf.mxu1 }
 0x149   : > { %v1023_v39 = vadd.f32 %v959_v62, %v788_v45  ;;  %v526_v46 = vadd.f32 %v525_v23, %v3592_v44  ;;  %v3822_v44 = vpack.c.bf16 %v606_v36, %v605_v57 }
 0x14a   : > { %v1196_v37 = vpop.f32.mrf.mxu0 }
 0x14b   : > { %564 = vmatmul.bf16.gmra.mxu1 %v3787_v60  ;;  %766 = vmatmul.bf16.gmra.mxu2 %v3806_v30  ;;  %v3810_v35 = vadd.f32 %v1193_v26, %v1023_v39  ;;  %v2650_v39 = vld [vmem:[%s3286_s5 + $0x189] sm:$0xff] }
 0x14c   : > { %1001 = vmatmul.bf16.gmra.mxu3 %v856_v9 }
 0x14d   : > { %4085 = vst [vmem:[#allocation17_spill] sm:$0xff] %v3810_v35  ;;  %1235 = vmatmul.bf16.gmra.mxu0 %v1090_v10 }
 0x14e   : > { %v727_v20 = vpop.f32.mrf.mxu2 }
 0x14f   : > { %v789_v48 = vadd.f32 %v727_v20, %v526_v46  ;;  %v962_v47 = vpop.f32.mrf.mxu3  ;;  %v857_v46 = vpack.c.bf16 %v2570_v6, %v2569_v17  ;;  %v1091_v20 = vpack.c.bf16 %v2650_v39, %v2649_v16  ;;  %v2859_v6 = vld [vmem:[%s3286_s5 + $0x31] sm:$0xff] }
 0x150   : > { %v527_v45 = vpop.f32.mrf.mxu1 }
 0x151   : > { %v1024_v62 = vadd.f32 %v962_v47, %v789_v48  ;;  %v528_v26 = vadd.f32 %v527_v45, %v3609_v54 }
 0x152   : > { %v1198_v32 = vpop.f32.mrf.mxu0 }
 0x153   : > { %v3813_v61 = vadd.f32 %v1196_v37, %v1024_v62 }
 0x156   : > { %v729_v35 = vpop.f32.mrf.mxu2 }
 0x157   : > { %v790_v10 = vadd.f32 %v729_v35, %v528_v26  ;;  %v964_v51 = vpop.f32.mrf.mxu3 }
 0x158   : > { %v530_v23 = vpop.f32.mrf.mxu1 }
 0x159   : > { %v1025_v48 = vadd.f32 %v964_v51, %v790_v10  ;;  %v531_v54 = vadd.f32 %v530_v23, %v3629_v4 }
 0x15a   : > { %v1201_v37 = vpop.f32.mrf.mxu0 }
 0x15b   : > { %569 = vmatmul.bf16.gmra.mxu1 %v856_v9  ;;  %771 = vmatmul.bf16.gmra.mxu2 %v3822_v44  ;;  %v3825_v47 = vadd.f32 %v1198_v32, %v1025_v48  ;;  %v2860_v9 = vld [vmem:[%s3286_s5 + $0x39] sm:$0xff] }
 0x15c   : > { %1006 = vmatmul.bf16.gmra.mxu3 %v857_v46  ;;  %v1779_v46 = vpack.c.bf16 %v2860_v9, %v2859_v6 }
 0x15d   : > { %1240 = vmatmul.bf16.gmra.mxu0 %v1091_v20 }
 0x15e   : > { %v732_v35 = vpop.f32.mrf.mxu2 }
 0x15f   : > { %v791_v45 = vadd.f32 %v732_v35, %v531_v54  ;;  %v967_v62 = vpop.f32.mrf.mxu3 }
 0x160   : > { %v532_v57 = vpop.f32.mrf.mxu1 }
 0x161   : > { %v1026_v36 = vadd.f32 %v967_v62, %v791_v45  ;;  %v533_v51 = vadd.f32 %v532_v57, %v3642_v13 }
 0x162   : > { %v1203_v17 = vpop.f32.mrf.mxu0 }
 0x163   : > { %v3828_v26 = vadd.f32 %v1201_v37, %v1026_v36 }
 0x166   : > { %v734_v16 = vpop.f32.mrf.mxu2 }
 0x167   : > { %v792_v39 = vadd.f32 %v734_v16, %v533_v51  ;;  %v969_v32 = vpop.f32.mrf.mxu3  ;;  %v2862_v51 = vld [vmem:[%s3286_s5 + $0x51] sm:$0xff] }
 0x168   : > { %v535_v10 = vpop.f32.mrf.mxu1 }
 0x169   : > { %v1027_v20 = vadd.f32 %v969_v32, %v792_v39  ;;  %v536_v13 = vadd.f32 %v535_v10, %v3541_v14 }
 0x16a   : > { %v1206_v4 = vpop.f32.mrf.mxu0 }
 0x16b   : > { %1399 = vmatmul.bf16.vlgmr.msra.gmra.mxu1 %v3481_v49  ;;  %1634 = vmatmul.bf16.vlgmr.msra.gmra.mxu2 %v3483_v50  ;;  %v3835_v23 = vadd.f32 %v1203_v17, %v1027_v20  ;;  %v2861_v49 = vld [vmem:[%s3286_s5 + $0x49] sm:$0xff] }
 0x16c   : > { %1868 = vmatmul.bf16.vlgmr.msra.gmra.mxu3 %v1779_v46  ;;  %v1780_v16 = vpack.c.bf16 %v2862_v51, %v2861_v49 }
 0x16d   : > { %2102 = vmatmul.bf16.vlgmr.msra.gmra.mxu0 %v3491_v55 }
 0x16e   : > { %v737_v48 = vpop.f32.mrf.mxu2 }
 0x16f   : > { %v793_v37 = vadd.f32 %v737_v48, %v536_v13  ;;  %v972_v54 = vpop.f32.mrf.mxu3 }
 0x170   : > { %v537_v35 = vpop.f32.mrf.mxu1 }
 0x171   : > { %v1028_v45 = vadd.f32 %v972_v54, %v793_v37  ;;  %v538_v36 = vadd.f32 %v537_v35, %v3559_v25  ;;  %v2864_v35 = vld [vmem:[%s3286_s5 + $0x69] sm:$0xff] }
 0x172   : > { %v1208_v62 = vpop.f32.mrf.mxu0 }
 0x173   : > { %v3839_v57 = vadd.f32 %v1206_v4, %v1028_v45 }
 0x176   : > { %v739_v50 = vpop.f32.mrf.mxu2 }
 0x177   : > { %v794_v17 = vadd.f32 %v739_v50, %v538_v36  ;;  %v974_v6 = vpop.f32.mrf.mxu3 }
 0x178   : > { %v540_v9 = vpop.f32.mrf.mxu1 }
 0x179   : > { %v1029_v39 = vadd.f32 %v974_v6, %v794_v17  ;;  %v541_v25 = vadd.f32 %v540_v9, %v3574_v33 }
 0x17a   : > { %v1211_v14 = vpop.f32.mrf.mxu0 }
 0x17b   : > { %1404 = vmatmul.bf16.gmra.mxu1 %v3491_v55  ;;  %1639 = vmatmul.bf16.gmra.mxu2 %v3493_v56  ;;  %v3846_v32 = vadd.f32 %v1208_v62, %v1029_v39  ;;  %v2863_v55 = vld [vmem:[%s3286_s5 + $0x61] sm:$0xff] }
 0x17c   : > { %1873 = vmatmul.bf16.gmra.mxu3 %v1780_v16  ;;  %v1781_v49 = vpack.c.bf16 %v2864_v35, %v2863_v55 }
 0x17d   : > { %2107 = vmatmul.bf16.gmra.mxu0 %v3514_v1 }
 0x17e   : > { %v742_v10 = vpop.f32.mrf.mxu2 }
 0x17f   : > { %v795_v46 = vadd.f32 %v742_v10, %v541_v25  ;;  %v977_v20 = vpop.f32.mrf.mxu3  ;;  %v2705_v25 = vld [vmem:[%s3286_s5 + $0x62] sm:$0xff]  ;;  %v2706_v10 = vld [vmem:[%s3286_s5 + $0x6a] sm:$0xff] }
 0x180   : > { %v542_v4 = vpop.f32.mrf.mxu1 }
 0x181   : > { %v1030_v13 = vadd.f32 %v977_v20, %v795_v46  ;;  %v543_v54 = vadd.f32 %v542_v4, %v3586_v41  ;;  %v2786_v46 = vld [vmem:[%s3286_s5 + $0x80] sm:$0xff] }
 0x182   : > { %v1213_v48 = vpop.f32.mrf.mxu0  ;;  %v2865_v4 = vld [vmem:[%s3286_s5 + $0x79] sm:$0xff] }
 0x183   : > { %v3850_v37 = vadd.f32 %v1211_v14, %v1030_v13  ;;  %v2866_v13 = vld [vmem:[%s3286_s5 + $0x81] sm:$0xff] }
 0x186   : > { %v744_v56 = vpop.f32.mrf.mxu2 }
 0x187   : > { %v796_v45 = vadd.f32 %v744_v56, %v543_v54  ;;  %v979_v62 = vpop.f32.mrf.mxu3  ;;  %v1782_v56 = vpack.c.bf16 %v2866_v13, %v2865_v4 }
 0x188   : > { %v545_v36 = vpop.f32.mrf.mxu1 }
 0x189   : > { %v1031_v51 = vadd.f32 %v979_v62, %v796_v45  ;;  %v546_v41 = vadd.f32 %v545_v36, %v3605_v52  ;;  %v1313_v52 = vpack.c.bf16 %v2706_v10, %v2705_v25  ;;  %v2868_v25 = vld [vmem:[%s3286_s5 + $0x99] sm:$0xff] }
 0x18a   : > { %v1216_v33 = vpop.f32.mrf.mxu0 }
 0x18b   : > { %1409 = vmatmul.bf16.gmra.mxu1 %v3514_v1  ;;  %1644 = vmatmul.bf16.gmra.mxu2 %v3516_v2  ;;  %v3857_v50 = vadd.f32 %v1213_v48, %v1031_v51  ;;  %v2785_v2 = vld [vmem:[%s3286_s5 + $0x78] sm:$0xff] }
 0x18c   : > { %1878 = vmatmul.bf16.gmra.mxu3 %v1781_v49  ;;  %v1548_v55 = vpack.c.bf16 %v2786_v46, %v2785_v2 }
 0x18d   : > { %2112 = vmatmul.bf16.gmra.mxu0 %v3526_v7 }
 0x18e   : > { %v747_v17 = vpop.f32.mrf.mxu2 }
 0x18f   : > { %v797_v6 = vadd.f32 %v747_v17, %v546_v41  ;;  %v982_v9 = vpop.f32.mrf.mxu3 }
 0x190   : > { %v547_v16 = vpop.f32.mrf.mxu1 }
 0x191   : > { %v1032_v39 = vadd.f32 %v982_v9, %v797_v6  ;;  %v548_v20 = vadd.f32 %v547_v16, %v3623_v63 }
 0x192   : > { %v1218_v14 = vpop.f32.mrf.mxu0 }
 0x193   : > { %v3862_v1 = vadd.f32 %v1216_v33, %v1032_v39  ;;  %v2867_v39 = vld [vmem:[%s3286_s5 + $0x91] sm:$0xff] }
 0x196   : > { %v749_v48 = vpop.f32.mrf.mxu2 }
 0x197   : > { %v798_v7 = vadd.f32 %v749_v48, %v548_v20  ;;  %v984_v54 = vpop.f32.mrf.mxu3  ;;  %v1783_v20 = vpack.c.bf16 %v2868_v25, %v2867_v39 }
 0x198   : > { %v550_v35 = vpop.f32.mrf.mxu1 }
 0x199   : > { %v1033_v45 = vadd.f32 %v984_v54, %v798_v7  ;;  %v551_v63 = vadd.f32 %v550_v35, %v3638_v11 }
 0x19a   : > { %v1221_v62 = vpop.f32.mrf.mxu0 }
 0x19b   : > { %1414 = vmatmul.bf16.gmra.mxu1 %v1313_v52  ;;  %1649 = vmatmul.bf16.gmra.mxu2 %v1548_v55  ;;  %v3870_v36 = vadd.f32 %v1218_v14, %v1033_v45  ;;  %v2710_v45 = vld [vmem:[%s3286_s5 + $0x9a] sm:$0xff] }
 0x19c   : > { %1883 = vmatmul.bf16.gmra.mxu3 %v1782_v56  ;;  %v2709_v56 = vld [vmem:[%s3286_s5 + $0x92] sm:$0xff] }
 0x19d   : > { %2117 = vmatmul.bf16.gmra.mxu0 %v3563_v29 }
 0x19e   : > { %v752_v49 = vpop.f32.mrf.mxu2 }
 0x19f   : > { %v799_v51 = vadd.f32 %v752_v49, %v551_v63  ;;  %v987_v33 = vpop.f32.mrf.mxu3  ;;  %v2869_v49 = vld [vmem:[%s3286_s5 + $0xa9] sm:$0xff] }
 0x1a0   : > { %v552_v41 = vpop.f32.mrf.mxu1 }
 0x1a1   : > { %v1034_v17 = vadd.f32 %v987_v33, %v799_v51  ;;  %v553_v16 = vadd.f32 %v552_v41, %v3650_v24  ;;  %v2870_v51 = vld [vmem:[%s3286_s5 + $0xb1] sm:$0xff] }
 0x1a2   : > { %v1223_v6 = vpop.f32.mrf.mxu0 }
 0x1a3   : > { %v3874_v9 = vadd.f32 %v1221_v62, %v1034_v17  ;;  %v2790_v62 = vld [vmem:[%s3286_s5 + $0xb0] sm:$0xff] }
 0x1a6   : > { %v754_v10 = vpop.f32.mrf.mxu2 }
 0x1a7   : > { %v800_v14 = vadd.f32 %v754_v10, %v553_v16  ;;  %v989_v2 = vpop.f32.mrf.mxu3  ;;  %v1784_v16 = vpack.c.bf16 %v2870_v51, %v2869_v49 }
 0x1a8   : > { %v555_v46 = vpop.f32.mrf.mxu1 }
 0x1a9   : > { %v1035_v4 = vadd.f32 %v989_v2, %v800_v14  ;;  %v556_v24 = vadd.f32 %v555_v46, %v3543_v15  ;;  %v1315_v15 = vpack.c.bf16 %v2710_v45, %v2709_v56 }
 0x1aa   : > { %v1226_v11 = vpop.f32.mrf.mxu0 }
 0x1ab   : > { %1419 = vmatmul.bf16.gmra.mxu1 %v3563_v29  ;;  %1654 = vmatmul.bf16.gmra.mxu2 %v3567_v31  ;;  %v3881_v13 = vadd.f32 %v1223_v6, %v1035_v4  ;;  %v2789_v31 = vld [vmem:[%s3286_s5 + $0xa8] sm:$0xff] }
 0x1ac   : > { %1888 = vmatmul.bf16.gmra.mxu3 %v1783_v20  ;;  %v1550_v17 = vpack.c.bf16 %v2790_v62, %v2789_v31 }
 0x1ad   : > { %2122 = vmatmul.bf16.gmra.mxu0 %v3590_v43 }
 0x1ae   : > { %v757_v48 = vpop.f32.mrf.mxu2 }
 0x1af   : > { %v801_v7 = vadd.f32 %v757_v48, %v556_v24  ;;  %v992_v54 = vpop.f32.mrf.mxu3 }
 0x1b0   : > { %v557_v52 = vpop.f32.mrf.mxu1 }
 0x1b1   : > { %v1036_v55 = vadd.f32 %v992_v54, %v801_v7  ;;  %v558_v63 = vadd.f32 %v557_v52, %v3561_v28  ;;  %v2871_v7 = vld [vmem:[%s3286_s5 + $0xc1] sm:$0xff]  ;;  %v2872_v54 = vld [vmem:[%s3286_s5 + $0xc9] sm:$0xff] }
 0x1b2   : > { %v1228_v35 = vpop.f32.mrf.mxu0  ;;  %v1785_v45 = vpack.c.bf16 %v2872_v54, %v2871_v7 }
 0x1b3   : > { %v3886_v29 = vadd.f32 %v1226_v11, %v1036_v55 }
 0x1b6   : > { %v759_v33 = vpop.f32.mrf.mxu2 }
 0x1b7   : > { %v802_v43 = vadd.f32 %v759_v33, %v558_v63  ;;  %v994_v41 = vpop.f32.mrf.mxu3 }
 0x1b8   : > { %v560_v6 = vpop.f32.mrf.mxu1 }
 0x1b9   : > { %v1037_v39 = vadd.f32 %v994_v41, %v802_v43  ;;  %v561_v28 = vadd.f32 %v560_v6, %v3576_v34  ;;  %v2874_v6 = vld [vmem:[%s3286_s5 + $0xe1] sm:$0xff] }
 0x1ba   : > { %v1231_v25 = vpop.f32.mrf.mxu0 }
 0x1bb   : > { %1424 = vmatmul.bf16.gmra.mxu1 %v1315_v15  ;;  %1659 = vmatmul.bf16.gmra.mxu2 %v1550_v17  ;;  %v3894_v10 = vadd.f32 %v1228_v35, %v1037_v39 }
 0x1bc   : > { %1893 = vmatmul.bf16.gmra.mxu3 %v1784_v16 }
 0x1bd   : > { %2127 = vmatmul.bf16.gmra.mxu0 %v3627_v3 }
 0x1be   : > { %v762_v14 = vpop.f32.mrf.mxu2 }
 0x1bf   : > { %v803_v2 = vadd.f32 %v762_v14, %v561_v28  ;;  %v997_v46 = vpop.f32.mrf.mxu3 }
 0x1c0   : > { %v562_v20 = vpop.f32.mrf.mxu1 }
 0x1c1   : > { %v1038_v4 = vadd.f32 %v997_v46, %v803_v2  ;;  %v563_v48 = vadd.f32 %v562_v20, %v3588_v42 }
 0x1c2   : > { %v1233_v11 = vpop.f32.mrf.mxu0 }
 0x1c3   : > { %v3898_v24 = vadd.f32 %v1231_v25, %v1038_v4 }
 0x1c6   : > { %v764_v52 = vpop.f32.mrf.mxu2 }
 0x1c7   : > { %v804_v55 = vadd.f32 %v764_v52, %v563_v48  ;;  %v999_v35 = vpop.f32.mrf.mxu3 }
 0x1c8   : > { %v565_v56 = vpop.f32.mrf.mxu1 }
 0x1c9   : > { %v1039_v31 = vadd.f32 %v999_v35, %v804_v55  ;;  %v566_v42 = vadd.f32 %v565_v56, %v3607_v53  ;;  %v4087_v55 = vld [vmem:[#allocation3_spill] sm:$0xff]  ;;  %v2876_v56 = vld [vmem:[%s3286_s5 + $0xf9] sm:$0xff] }
 0x1ca   : > { %v1236_v34 = vpop.f32.mrf.mxu0 }
 0x1cb   : > { %1429 = vmatmul.bf16.gmra.mxu1 %v3627_v3  ;;  %1664 = vmatmul.bf16.gmra.mxu2 %v3631_v5  ;;  %v3905_v62 = vadd.f32 %v1233_v11, %v1039_v31  ;;  %v2873_v3 = vld [vmem:[%s3286_s5 + $0xd9] sm:$0xff] }
 0x1cc   : > { %1898 = vmatmul.bf16.gmra.mxu3 %v1785_v45  ;;  %v1786_v28 = vpack.c.bf16 %v2874_v6, %v2873_v3 }
 0x1cd   : > { %2132 = vmatmul.bf16.gmra.mxu0 %v3654_v38 }
 0x1ce   : > { %v767_v63 = vpop.f32.mrf.mxu2 }
 0x1cf   : > { %v805_v49 = vadd.f32 %v767_v63, %v566_v42  ;;  %v1002_v51 = vpop.f32.mrf.mxu3 }
 0x1d0   : > { %v567_v33 = vpop.f32.mrf.mxu1 }
 0x1d1   : > { %v1040_v43 = vadd.f32 %v1002_v51, %v805_v49  ;;  %v568_v17 = vadd.f32 %v567_v33, %v3625_v0  ;;  %v4086_v0 = vld [vmem:[#allocation2_spill] sm:$0xff]  ;;  %v4088_v33 = vld [vmem:[#allocation4_spill] sm:$0xff] }
 0x1d2   : > { %v1238_v41 = vpop.f32.mrf.mxu0 }
 0x1d3   : > { %v3909_v15 = vadd.f32 %v1236_v34, %v1040_v43 }
 0x1d6   : > { %v769_v5 = vpop.f32.mrf.mxu2 }
 0x1d7   : > { %v806_v16 = vadd.f32 %v769_v5, %v568_v17  ;;  %v1004_v39 = vpop.f32.mrf.mxu3 }
 0x1d8   : > { %v570_v25 = vpop.f32.mrf.mxu1 }
 0x1d9   : > { %v1041_v14 = vadd.f32 %v1004_v39, %v806_v16  ;;  %v571_v46 = vadd.f32 %v570_v25, %v4086_v0  ;;  %v4089_v39 = vld [vmem:[#allocation5_spill] sm:$0xff] }
 0x1da   : > { %v1241_v53 = vpop.f32.mrf.mxu0 }
 0x1db   : > { %1434 = vmatmul.bf16.gmra.mxu1 %v3654_v38  ;;  %1669 = vmatmul.bf16.gmra.mxu2 %v3656_v19  ;;  %v3916_v2 = vadd.f32 %v1238_v41, %v1041_v14  ;;  %v2875_v38 = vld [vmem:[%s3286_s5 + $0xf1] sm:$0xff] }
 0x1dc   : > { %1903 = vmatmul.bf16.gmra.mxu3 %v1786_v28  ;;  %v1787_v42 = vpack.c.bf16 %v2876_v56, %v2875_v38  ;;  %v2878_v28 = vld [vmem:[%s3286_s5 + $0x111] sm:$0xff] }
 0x1dd   : > { %2137 = vmatmul.bf16.gmra.mxu0 %v3682_v12 }
 0x1de   : > { %v772_v20 = vpop.f32.mrf.mxu2 }
 0x1df   : > { %v807_v4 = vadd.f32 %v772_v20, %v571_v46  ;;  %v1007_v11 = vpop.f32.mrf.mxu3 }
 0x1e0   : > { %v572_v48 = vpop.f32.mrf.mxu1 }
 0x1e1   : > { %v1042_v7 = vadd.f32 %v1007_v11, %v807_v4  ;;  %v573_v35 = vadd.f32 %v572_v48, %v4087_v55 }
 0x1e2   : > { %v1243_v54 = vpop.f32.mrf.mxu0 }
 0x1e3   : > { %v3920_v52 = vadd.f32 %v1241_v53, %v1042_v7  ;;  %v3938_v53 = vld [vmem:[%s4066_s2] ss:$0 sm:$0xff] }
 0x1e6   : > { %v774_v19 = vpop.f32.mrf.mxu2 }
 0x1e7   : > { %v808_v45 = vadd.f32 %v774_v19, %v573_v35  ;;  %v1009_v31 = vpop.f32.mrf.mxu3  ;;  %v4090_v35 = vld [vmem:[#allocation6_spill] sm:$0xff] }
 0x1e8   : > { %v1400_v34 = vpop.f32.mrf.mxu1 }
 0x1e9   : > { %v1043_v63 = vadd.f32 %v1009_v31, %v808_v45  ;;  %v1480_v43 = vadd.f32 %v1400_v34, %v4088_v33 }
 0x1ea   : > { %v2103_v49 = vpop.f32.mrf.mxu0 }
 0x1eb   : > { %1439 = vmatmul.bf16.gmra.mxu1 %v3682_v12  ;;  %1674 = vmatmul.bf16.gmra.mxu2 %v3684_v58  ;;  %v3927_v51 = vadd.f32 %v1243_v54, %v1043_v63  ;;  %v2877_v12 = vld [vmem:[%s3286_s5 + $0x109] sm:$0xff] }
 0x1ec   : > { %1908 = vmatmul.bf16.gmra.mxu3 %v1787_v42  ;;  %v1788_v4 = vpack.c.bf16 %v2878_v28, %v2877_v12  ;;  %v4092_v12 = vld [vmem:[#allocation9_spill] sm:$0xff] }
 0x1ed   : > { %2142 = vmatmul.bf16.gmra.mxu0 %v3700_v21 }
 0x1ee   : > { %v1635_v41 = vpop.f32.mrf.mxu2 }
 0x1ef   : > { %v1715_v17 = vadd.f32 %v1635_v41, %v1480_v43  ;;  %v1869_v3 = vpop.f32.mrf.mxu3 }
 0x1f0   : > { %v1402_v6 = vpop.f32.mrf.mxu1 }
 0x1f1   : > { %v1949_v16 = vadd.f32 %v1869_v3, %v1715_v17  ;;  %v1481_v25 = vadd.f32 %v1402_v6, %v4089_v39 }
 0x1f2   : > { %v2105_v5 = vpop.f32.mrf.mxu0 }
 0x1f3   : > { %v2183_v14 = vadd.f32 %v2103_v49, %v1949_v16  ;;  %v4091_v49 = vld [vmem:[#allocation7_spill] sm:$0xff] }
 0x1f5   : > { %v2219_v7 = vadd.f32 %v3938_v53, %v2183_v14 }
 0x1f6   : > { %v1637_v58 = vpop.f32.mrf.mxu2 }
 0x1f7   : > { %v1716_v0 = vadd.f32 %v1637_v58, %v1481_v25  ;;  %v1871_v46 = vpop.f32.mrf.mxu3  ;;  %v2251_v19 = vmax.f32 %v2219_v7, 0.0  ;;  %v4093_v58 = vld [vmem:[#allocation8_spill] sm:$0xff] }
 0x1f8   : > { %v1405_v20 = vpop.f32.mrf.mxu1 }
 0x1f9   : > { %v1950_v11 = vadd.f32 %v1871_v46, %v1716_v0  ;;  %v1482_v38 = vadd.f32 %v1405_v20, %v4090_v35  ;;  %v2801_v35 = vld [vmem:[%s3286_s5 + $0x138] sm:$0xff] }
 0x1fa   : > { %v2108_v48 = vpop.f32.mrf.mxu0 }
 0x1fb   : > { %v2184_v54 = vadd.f32 %v2105_v5, %v1950_v11  ;;  %1444 = vmatmul.bf16.gmra.mxu1 %v3700_v21  ;;  %1679 = vmatmul.bf16.gmra.mxu2 %v3702_v18 }
 0x1fc   : > { %1913 = vmatmul.bf16.gmra.mxu3 %v1788_v4 }
 0x1fd   : > { %2147 = vmatmul.bf16.gmra.mxu0 %v3732_v8  ;;  %v2220_v55 = vadd.f32 %v3938_v53, %v2184_v54  ;;  %v2721_v54 = vld [vmem:[%s3286_s5 + $0x122] sm:$0xff] }
 0x1fe   : > { %v1640_v56 = vpop.f32.mrf.mxu2 }
 0x1ff   : > { %v2252_v45 = vmax.f32 %v2220_v55, 0.0  ;;  %v1717_v31 = vadd.f32 %v1640_v56, %v1482_v38  ;;  %v1874_v34 = vpop.f32.mrf.mxu3  ;;  %v2722_v55 = vld [vmem:[%s3286_s5 + $0x12a] sm:$0xff]  ;;  %v2802_v38 = vld [vmem:[%s3286_s5 + $0x140] sm:$0xff] }
 0x200   : > { %v1407_v18 = vpop.f32.mrf.mxu1 }
 0x201   : > { %v3096_v21 = vpack.c.bf16 %v2252_v45, %v2251_v19  ;;  %v1951_v63 = vadd.f32 %v1874_v34, %v1717_v31  ;;  %v1483_v33 = vadd.f32 %v1407_v18, %v4091_v49  ;;  %v1321_v18 = vpack.c.bf16 %v2722_v55, %v2721_v54  ;;  %v4097_v55 = vld [vmem:[#allocation14_spill] sm:$0xff] }
 0x202   : > { %v2110_v42 = vpop.f32.mrf.mxu0 }
 0x203   : > { %3097 = vst [vmem:[%s3949_s23] sm:$0xff] %v3096_v21   ;;  %v2185_v41 = vadd.f32 %v2108_v48, %v1951_v63  ;;  %v1556_v21 = vpack.c.bf16 %v2802_v38, %v2801_v35  ;;  %v4098_v38 = vld [vmem:[#allocation13_spill] sm:$0xff] }
 0x205   : > { %v2221_v39 = vadd.f32 %v3938_v53, %v2185_v41 }
 0x206   : > { %v1642_v43 = vpop.f32.mrf.mxu2 }
 0x207   : > { %v1718_v17 = vadd.f32 %v1642_v43, %v1483_v33  ;;  %v1876_v3 = vpop.f32.mrf.mxu3  ;;  %v2253_v46 = vmax.f32 %v2221_v39, 0.0 }
 0x208   : > { %v1410_v6 = vpop.f32.mrf.mxu1 }
 0x209   : > { %v1952_v5 = vadd.f32 %v1876_v3, %v1718_v17  ;;  %v1484_v14 = vadd.f32 %v1410_v6, %v4093_v58  ;;  %v4095_v17 = vld [vmem:[#allocation11_spill] sm:$0xff] }
 0x20a   : > { %v2113_v16 = vpop.f32.mrf.mxu0 }
 0x20b   : > { %v2186_v25 = vadd.f32 %v2110_v42, %v1952_v5  ;;  %1449 = vmatmul.bf16.gmra.mxu1 %v3732_v8  ;;  %1684 = vmatmul.bf16.gmra.mxu2 %v3734_v22 }
 0x20c   : > { %1918 = vmatmul.bf16.gmra.mxu3 %v4092_v12 }
 0x20d   : > { %2152 = vmatmul.bf16.gmra.mxu0 %v3754_v27  ;;  %v2222_v28 = vadd.f32 %v3938_v53, %v2186_v25  ;;  %v4094_v27 = vld [vmem:[#allocation10_spill] sm:$0xff] }
 0x20e   : > { %v1645_v0 = vpop.f32.mrf.mxu2 }
 0x20f   : > { %v2254_v20 = vmax.f32 %v2222_v28, 0.0  ;;  %v1719_v4 = vadd.f32 %v1645_v0, %v1484_v14  ;;  %v1879_v11 = vpop.f32.mrf.mxu3  ;;  %v4096_v0 = vld [vmem:[#allocation12_spill] sm:$0xff] }
 0x210   : > { %v1412_v8 = vpop.f32.mrf.mxu1 }
 0x211   : > { %v3101_v48 = vpack.c.bf16 %v2254_v20, %v2253_v46  ;;  %v1953_v22 = vadd.f32 %v1879_v11, %v1719_v4  ;;  %v1485_v56 = vadd.f32 %v1412_v8, %v4094_v27 }
 0x212   : > { %v2115_v7 = vpop.f32.mrf.mxu0 }
 0x213   : > { %3173 = vst [vmem:[%s3949_s23 + $0x8] sm:$0xff] %v3101_v48   ;;  %v2187_v45 = vadd.f32 %v2113_v16, %v1953_v22 }
 0x215   : > { %v2223_v33 = vadd.f32 %v3938_v53, %v2187_v45 }
 0x216   : > { %v1647_v19 = vpop.f32.mrf.mxu2 }
 0x217   : > { %v1720_v31 = vadd.f32 %v1647_v19, %v1485_v56  ;;  %v1881_v34 = vpop.f32.mrf.mxu3  ;;  %v2255_v5 = vmax.f32 %v2223_v33, 0.0  ;;  %v4099_v33 = vld [vmem:[#allocation15_spill] sm:$0xff] }
 0x218   : > { %v1415_v42 = vpop.f32.mrf.mxu1 }
 0x219   : > { %v1954_v63 = vadd.f32 %v1881_v34, %v1720_v31  ;;  %v1486_v3 = vadd.f32 %v1415_v42, %v4095_v17  ;;  %v2725_v42 = vld [vmem:[%s3286_s5 + $0x152] sm:$0xff] }
 0x21a   : > { %v2118_v49 = vpop.f32.mrf.mxu0  ;;  %v2886_v17 = vld [vmem:[%s3286_s5 + $0x171] sm:$0xff] }
 0x21b   : > { %v2188_v43 = vadd.f32 %v2115_v7, %v1954_v63  ;;  %1454 = vmatmul.bf16.gmra.mxu1 %v1321_v18  ;;  %1689 = vmatmul.bf16.gmra.mxu2 %v1556_v21  ;;  %v2726_v63 = vld [vmem:[%s3286_s5 + $0x15a] sm:$0xff] }
 0x21c   : > { %1923 = vmatmul.bf16.gmra.mxu3 %v3756_v40 }
 0x21d   : > { %2157 = vmatmul.bf16.gmra.mxu0 %v3785_v59  ;;  %v2224_v41 = vadd.f32 %v3938_v53, %v2188_v43 }
 0x21e   : > { %v1650_v6 = vpop.f32.mrf.mxu2 }
 0x21f   : > { %v2256_v16 = vmax.f32 %v2224_v41, 0.0  ;;  %v1721_v39 = vadd.f32 %v1650_v6, %v1486_v3  ;;  %v1884_v25 = vpop.f32.mrf.mxu3  ;;  %v2885_v41 = vld [vmem:[%s3286_s5 + $0x169] sm:$0xff] }
 0x220   : > { %v1417_v12 = vpop.f32.mrf.mxu1 }
 0x221   : > { %v3106_v28 = vpack.c.bf16 %v2256_v16, %v2255_v5  ;;  %v1955_v14 = vadd.f32 %v1884_v25, %v1721_v39  ;;  %v1487_v46 = vadd.f32 %v1417_v12, %v4096_v0  ;;  %v1323_v39 = vpack.c.bf16 %v2726_v63, %v2725_v42 }
 0x222   : > { %v2120_v58 = vpop.f32.mrf.mxu0 }
 0x223   : > { %3174 = vst [vmem:[%s3949_s23 + $0x10] sm:$0xff] %v3106_v28   ;;  %v2189_v40 = vadd.f32 %v2118_v49, %v1955_v14  ;;  %v2806_v49 = vld [vmem:[%s3286_s5 + $0x170] sm:$0xff]  ;;  %v1792_v28 = vpack.c.bf16 %v2886_v17, %v2885_v41 }
 0x225   : > { %v2225_v22 = vadd.f32 %v3938_v53, %v2189_v40  ;;  %v4100_v40 = vld [vmem:[#allocation16_spill] sm:$0xff] }
 0x226   : > { %v1652_v20 = vpop.f32.mrf.mxu2 }
 0x227   : > { %v1722_v4 = vadd.f32 %v1652_v20, %v1487_v46  ;;  %v1886_v11 = vpop.f32.mrf.mxu3  ;;  %v2257_v19 = vmax.f32 %v2225_v22, 0.0 }
 0x228   : > { %v1420_v8 = vpop.f32.mrf.mxu1 }
 0x229   : > { %v1956_v48 = vadd.f32 %v1886_v11, %v1722_v4  ;;  %v1488_v27 = vadd.f32 %v1420_v8, %v4098_v38 }
 0x22a   : > { %v2123_v7 = vpop.f32.mrf.mxu0 }
 0x22b   : > { %v2190_v54 = vadd.f32 %v2120_v58, %v1956_v48  ;;  %1459 = vmatmul.bf16.gmra.mxu1 %v3785_v59  ;;  %1694 = vmatmul.bf16.gmra.mxu2 %v3787_v60 }
 0x22c   : > { %1928 = vmatmul.bf16.gmra.mxu3 %v4097_v55 }
 0x22d   : > { %2162 = vmatmul.bf16.gmra.mxu0 %v3806_v30  ;;  %v2226_v35 = vadd.f32 %v3938_v53, %v2190_v54  ;;  %v2805_v30 = vld [vmem:[%s3286_s5 + $0x168] sm:$0xff] }
 0x22e   : > { %v1655_v56 = vpop.f32.mrf.mxu2  ;;  %v1558_v25 = vpack.c.bf16 %v2806_v49, %v2805_v30 }
 0x22f   : > { %v2258_v45 = vmax.f32 %v2226_v35, 0.0  ;;  %v1723_v59 = vadd.f32 %v1655_v56, %v1488_v27  ;;  %v1889_v31 = vpop.f32.mrf.mxu3  ;;  %v2728_v27 = vld [vmem:[%s3286_s5 + $0x172] sm:$0xff]  ;;  %v2807_v56 = vld [vmem:[%s3286_s5 + $0x180] sm:$0xff] }
 0x230   : > { %v1422_v34 = vpop.f32.mrf.mxu1 }
 0x231   : > { %v3111_v60 = vpack.c.bf16 %v2258_v45, %v2257_v19  ;;  %v1957_v21 = vadd.f32 %v1889_v31, %v1723_v59  ;;  %v1489_v43 = vadd.f32 %v1422_v34, %v4099_v33  ;;  %v2808_v19 = vld [vmem:[%s3286_s5 + $0x188] sm:$0xff]  ;;  %v4101_v59 = vld [vmem:[#allocation17_spill] sm:$0xff] }
 0x232   : > { %v2125_v18 = vpop.f32.mrf.mxu0  ;;  %v2887_v45 = vld [vmem:[%s3286_s5 + $0x181] sm:$0xff]  ;;  %v2888_v34 = vld [vmem:[%s3286_s5 + $0x189] sm:$0xff]  ;;  %v1559_v33 = vpack.c.bf16 %v2808_v19, %v2807_v56 }
 0x233   : > { %3175 = vst [vmem:[%s3949_s23 + $0x18] sm:$0xff] %v3111_v60   ;;  %v2191_v6 = vadd.f32 %v2123_v7, %v1957_v21  ;;  %v2967_v60 = vld [vmem:[%s3286_s5 + $0x182] sm:$0xff]  ;;  %v1793_v41 = vpack.c.bf16 %v2888_v34, %v2887_v45 }
 0x235   : > { %v2227_v0 = vadd.f32 %v3938_v53, %v2191_v6 }
 0x236   : > { %v1657_v3 = vpop.f32.mrf.mxu2 }
 0x237   : > { %v1724_v5 = vadd.f32 %v1657_v3, %v1489_v43  ;;  %v1891_v16 = vpop.f32.mrf.mxu3  ;;  %v2259_v8 = vmax.f32 %v2227_v0, 0.0 }
 0x238   : > { %v1425_v12 = vpop.f32.mrf.mxu1 }
 0x239   : > { %v1958_v58 = vadd.f32 %v1891_v16, %v1724_v5  ;;  %v1490_v4 = vadd.f32 %v1425_v12, %v4100_v40 }
 0x23a   : > { %v2128_v14 = vpop.f32.mrf.mxu0 }
 0x23b   : > { %v2192_v46 = vadd.f32 %v2125_v18, %v1958_v58  ;;  %1464 = vmatmul.bf16.gmra.mxu1 %v1323_v39  ;;  %1699 = vmatmul.bf16.gmra.mxu2 %v1558_v25  ;;  %v2968_v18 = vld [vmem:[%s3286_s5 + $0x18a] sm:$0xff] }
 0x23c   : > { %1933 = vmatmul.bf16.gmra.mxu3 %v1792_v28  ;;  %v2027_v17 = vpack.c.bf16 %v2968_v18, %v2967_v60 }
 0x23d   : > { %2167 = vmatmul.bf16.gmra.mxu0 %v3822_v44  ;;  %v2228_v20 = vadd.f32 %v3938_v53, %v2192_v46  ;;  %v2727_v44 = vld [vmem:[%s3286_s5 + $0x16a] sm:$0xff] }
 0x23e   : > { %v1660_v11 = vpop.f32.mrf.mxu2  ;;  %v1324_v49 = vpack.c.bf16 %v2728_v27, %v2727_v44 }
 0x23f   : > { %v2260_v48 = vmax.f32 %v2228_v20, 0.0  ;;  %v1725_v7 = vadd.f32 %v1660_v11, %v1490_v4  ;;  %v1894_v22 = vpop.f32.mrf.mxu3  ;;  %v2809_v11 = vld [vmem:[%s3286_s5 + $0x198] sm:$0xff] }
 0x240   : > { %v1427_v54 = vpop.f32.mrf.mxu1 }
 0x241   : > { %v3116_v55 = vpack.c.bf16 %v2260_v48, %v2259_v8  ;;  %v1959_v38 = vadd.f32 %v1894_v22, %v1725_v7  ;;  %v1491_v31 = vadd.f32 %v1427_v54, %v4101_v59  ;;  %v2810_v8 = vld [vmem:[%s3286_s5 + $0x1a0] sm:$0xff] }
 0x242   : > { %v2130_v35 = vpop.f32.mrf.mxu0  ;;  %v2889_v48 = vld [vmem:[%s3286_s5 + $0x199] sm:$0xff]  ;;  %v2890_v22 = vld [vmem:[%s3286_s5 + $0x1a1] sm:$0xff]  ;;  %v1560_v27 = vpack.c.bf16 %v2810_v8, %v2809_v11 }
 0x243   : > { %3176 = vst [vmem:[%s3949_s23 + $0x20] sm:$0xff] %v3116_v55   ;;  %v2193_v42 = vadd.f32 %v2128_v14, %v1959_v38  ;;  %v2969_v54 = vld [vmem:[%s3286_s5 + $0x19a] sm:$0xff]  ;;  %v1794_v19 = vpack.c.bf16 %v2890_v22, %v2889_v48 }
 0x245   : > { %v2229_v5 = vadd.f32 %v3938_v53, %v2193_v42 }
 0x246   : > { %v1662_v21 = vpop.f32.mrf.mxu2 }
 0x247   : > { %v1726_v63 = vadd.f32 %v1662_v21, %v1491_v31  ;;  %v1896_v30 = vpop.f32.mrf.mxu3  ;;  %v2261_v28 = vmax.f32 %v2229_v5, 0.0 }
 0x248   : > { %v1430_v43 = vpop.f32.mrf.mxu1 }
 0x249   : > { %v1960_v3 = vadd.f32 %v1896_v30, %v1726_v63  ;;  %v1492_v25 = vadd.f32 %v1430_v43, %v3813_v61  ;;  %v2970_v61 = vld [vmem:[%s3286_s5 + $0x1a2] sm:$0xff] }
 0x24a   : > { %v2133_v6 = vpop.f32.mrf.mxu0  ;;  %v2028_v45 = vpack.c.bf16 %v2970_v61, %v2969_v54 }
 0x24b   : > { %v2194_v16 = vadd.f32 %v2130_v35, %v1960_v3  ;;  %1469 = vmatmul.bf16.gmra.mxu1 %v1324_v49  ;;  %1704 = vmatmul.bf16.gmra.mxu2 %v1559_v33 }
 0x24c   : > { %1938 = vmatmul.bf16.gmra.mxu3 %v1793_v41 }
 0x24d   : > { %2172 = vmatmul.bf16.gmra.mxu0 %v2027_v17  ;;  %v2230_v39 = vadd.f32 %v3938_v53, %v2194_v16 }
 0x24e   : > { %v1665_v12 = vpop.f32.mrf.mxu2 }
 0x24f   : > { %v2262_v58 = vmax.f32 %v2230_v39, 0.0  ;;  %v1727_v14 = vadd.f32 %v1665_v12, %v1492_v25  ;;  %v1899_v0 = vpop.f32.mrf.mxu3 }
 0x250   : > { %v1432_v46 = vpop.f32.mrf.mxu1 }
 0x251   : > { %v3121_v20 = vpack.c.bf16 %v2262_v58, %v2261_v28  ;;  %v1961_v4 = vadd.f32 %v1899_v0, %v1727_v14  ;;  %v1493_v7 = vadd.f32 %v1432_v46, %v3825_v47 }
 0x252   : > { %v2135_v40 = vpop.f32.mrf.mxu0 }
 0x253   : > { %3177 = vst [vmem:[%s3949_s23 + $0x28] sm:$0xff] %v3121_v20   ;;  %v2195_v35 = vadd.f32 %v2133_v6, %v1961_v4 }
 0x255   : > { %v2231_v34 = vadd.f32 %v3938_v53, %v2195_v35 }
 0x256   : > { %v1667_v55 = vpop.f32.mrf.mxu2 }
 0x257   : > { %v1728_v38 = vadd.f32 %v1667_v55, %v1493_v7  ;;  %v1901_v44 = vpop.f32.mrf.mxu3  ;;  %v2263_v42 = vmax.f32 %v2231_v34, 0.0 }
 0x258   : > { %v1435_v56 = vpop.f32.mrf.mxu1 }
 0x259   : > { %v1962_v59 = vadd.f32 %v1901_v44, %v1728_v38  ;;  %v1494_v18 = vadd.f32 %v1435_v56, %v3828_v26 }
 0x25a   : > { %v2138_v31 = vpop.f32.mrf.mxu0 }
 0x25b   : > { %v2196_v60 = vadd.f32 %v2135_v40, %v1962_v59  ;;  %1474 = vmatmul.bf16.gmra.mxu1 %v2027_v17  ;;  %1709 = vmatmul.bf16.gmra.mxu2 %v1560_v27 }
 0x25c   : > { %1943 = vmatmul.bf16.gmra.mxu3 %v1794_v19 }
 0x25d   : > { %2177 = vmatmul.bf16.gmra.mxu0 %v2028_v45  ;;  %v2232_v47 = vadd.f32 %v3938_v53, %v2196_v60 }
 0x25e   : > { %v1670_v21 = vpop.f32.mrf.mxu2 }
 0x25f   : > { %v2264_v63 = vmax.f32 %v2232_v47, 0.0  ;;  %v1729_v30 = vadd.f32 %v1670_v21, %v1494_v18  ;;  %v1904_v49 = vpop.f32.mrf.mxu3 }
 0x260   : > { %v1437_v33 = vpop.f32.mrf.mxu1 }
 0x261   : > { %v3126_v43 = vpack.c.bf16 %v2264_v63, %v2263_v42  ;;  %v1963_v3 = vadd.f32 %v1904_v49, %v1729_v30  ;;  %v1495_v6 = vadd.f32 %v1437_v33, %v3835_v23 }
 0x262   : > { %v2140_v41 = vpop.f32.mrf.mxu0 }
 0x263   : > { %3178 = vst [vmem:[%s3949_s23 + $0x30] sm:$0xff] %v3126_v43   ;;  %v2197_v5 = vadd.f32 %v2138_v31, %v1963_v3 }
 0x265   : > { %v2233_v28 = vadd.f32 %v3938_v53, %v2197_v5 }
 0x266   : > { %v1672_v17 = vpop.f32.mrf.mxu2 }
 0x267   : > { %v1730_v16 = vadd.f32 %v1672_v17, %v1495_v6  ;;  %v1906_v39 = vpop.f32.mrf.mxu3  ;;  %v2265_v20 = vmax.f32 %v2233_v28, 0.0 }
 0x268   : > { %v1440_v25 = vpop.f32.mrf.mxu1 }
 0x269   : > { %v1964_v12 = vadd.f32 %v1906_v39, %v1730_v16  ;;  %v1496_v0 = vadd.f32 %v1440_v25, %v3839_v57 }
 0x26a   : > { %v2143_v26 = vpop.f32.mrf.mxu0 }
 0x26b   : > { %v2198_v58 = vadd.f32 %v2140_v41, %v1964_v12 }
 0x26d   : > { %v2234_v14 = vadd.f32 %v3938_v53, %v2198_v58 }
 0x26e   : > { %v1675_v46 = vpop.f32.mrf.mxu2 }
 0x26f   : > { %v2266_v40 = vmax.f32 %v2234_v14, 0.0  ;;  %v1731_v4 = vadd.f32 %v1675_v46, %v1496_v0  ;;  %v1909_v23 = vpop.f32.mrf.mxu3 }
 0x270   : > { %v1442_v11 = vpop.f32.mrf.mxu1 }
 0x271   : > { %v3131_v8 = vpack.c.bf16 %v2266_v40, %v2265_v20  ;;  %v1965_v7 = vadd.f32 %v1909_v23, %v1731_v4  ;;  %v1497_v22 = vadd.f32 %v1442_v11, %v3846_v32 }
 0x272   : > { %v2145_v48 = vpop.f32.mrf.mxu0 }
 0x273   : > { %3179 = vst [vmem:[%s3949_s23 + $0x38] sm:$0xff] %v3131_v8   ;;  %v2199_v61 = vadd.f32 %v2143_v26, %v1965_v7 }
 0x275   : > { %v2235_v27 = vadd.f32 %v3938_v53, %v2199_v61 }
 0x276   : > { %v1677_v54 = vpop.f32.mrf.mxu2 }
 0x277   : > { %v1732_v55 = vadd.f32 %v1677_v54, %v1497_v22  ;;  %v1911_v35 = vpop.f32.mrf.mxu3  ;;  %v2267_v31 = vmax.f32 %v2235_v27, 0.0 }
 0x278   : > { %v1445_v38 = vpop.f32.mrf.mxu1 }
 0x279   : > { %v1966_v44 = vadd.f32 %v1911_v35, %v1732_v55  ;;  %v1498_v45 = vadd.f32 %v1445_v38, %v3850_v37 }
 0x27a   : > { %v2148_v57 = vpop.f32.mrf.mxu0 }
 0x27b   : > { %v2200_v56 = vadd.f32 %v2145_v48, %v1966_v44 }
 0x27d   : > { %v2236_v19 = vadd.f32 %v3938_v53, %v2200_v56 }
 0x27e   : > { %v1680_v59 = vpop.f32.mrf.mxu2 }
 0x27f   : > { %v2268_v34 = vmax.f32 %v2236_v19, 0.0  ;;  %v1733_v60 = vadd.f32 %v1680_v59, %v1498_v45  ;;  %v1914_v32 = vpop.f32.mrf.mxu3 }
 0x280   : > { %v1447_v47 = vpop.f32.mrf.mxu1 }
 0x281   : > { %v3136_v18 = vpack.c.bf16 %v2268_v34, %v2267_v31  ;;  %v1967_v42 = vadd.f32 %v1914_v32, %v1733_v60  ;;  %v1499_v63 = vadd.f32 %v1447_v47, %v3857_v50 }
 0x282   : > { %v2150_v21 = vpop.f32.mrf.mxu0 }
 0x283   : > { %3180 = vst [vmem:[%s3949_s23 + $0x40] sm:$0xff] %v3136_v18   ;;  %v2201_v49 = vadd.f32 %v2148_v57, %v1967_v42 }
 0x285   : > { %v2237_v6 = vadd.f32 %v3938_v53, %v2201_v49 }
 0x286   : > { %v1682_v30 = vpop.f32.mrf.mxu2 }
 0x287   : > { %v1734_v33 = vadd.f32 %v1682_v30, %v1499_v63  ;;  %v1916_v43 = vpop.f32.mrf.mxu3  ;;  %v2269_v25 = vmax.f32 %v2237_v6, 0.0 }
 0x288   : > { %v1450_v41 = vpop.f32.mrf.mxu1 }
 0x289   : > { %v1968_v3 = vadd.f32 %v1916_v43, %v1734_v33  ;;  %v1500_v16 = vadd.f32 %v1450_v41, %v3862_v1 }
 0x28a   : > { %v2153_v37 = vpop.f32.mrf.mxu0 }
 0x28b   : > { %v2202_v17 = vadd.f32 %v2150_v21, %v1968_v3 }
 0x28d   : > { %v2238_v5 = vadd.f32 %v3938_v53, %v2202_v17 }
 0x28e   : > { %v1685_v39 = vpop.f32.mrf.mxu2 }
 0x28f   : > { %v2270_v12 = vmax.f32 %v2238_v5, 0.0  ;;  %v1735_v26 = vadd.f32 %v1685_v39, %v1500_v16  ;;  %v1919_v50 = vpop.f32.mrf.mxu3 }
 0x290   : > { %v1452_v28 = vpop.f32.mrf.mxu1 }
 0x291   : > { %v3141_v58 = vpack.c.bf16 %v2270_v12, %v2269_v25  ;;  %v1969_v0 = vadd.f32 %v1919_v50, %v1735_v26  ;;  %v1501_v46 = vadd.f32 %v1452_v28, %v3870_v36 }
 0x292   : > { %v2155_v14 = vpop.f32.mrf.mxu0 }
 0x293   : > { %3181 = vst [vmem:[%s3949_s23 + $0x48] sm:$0xff] %v3141_v58   ;;  %v2203_v40 = vadd.f32 %v2153_v37, %v1969_v0 }
 0x295   : > { %v2239_v48 = vadd.f32 %v3938_v53, %v2203_v40 }
 0x296   : > { %v1687_v20 = vpop.f32.mrf.mxu2 }
 0x297   : > { %v1736_v4 = vadd.f32 %v1687_v20, %v1501_v46  ;;  %v1921_v23 = vpop.f32.mrf.mxu3  ;;  %v2271_v55 = vmax.f32 %v2239_v48, 0.0 }
 0x298   : > { %v1455_v11 = vpop.f32.mrf.mxu1 }
 0x299   : > { %v1970_v8 = vadd.f32 %v1921_v23, %v1736_v4  ;;  %v1502_v54 = vadd.f32 %v1455_v11, %v3874_v9 }
 0x29a   : > { %v2158_v1 = vpop.f32.mrf.mxu0 }
 0x29b   : > { %v2204_v7 = vadd.f32 %v2155_v14, %v1970_v8 }
 0x29d   : > { %v2240_v22 = vadd.f32 %v3938_v53, %v2204_v7 }
 0x29e   : > { %v1690_v61 = vpop.f32.mrf.mxu2 }
 0x29f   : > { %v2272_v35 = vmax.f32 %v2240_v22, 0.0  ;;  %v1737_v38 = vadd.f32 %v1690_v61, %v1502_v54  ;;  %v1924_v36 = vpop.f32.mrf.mxu3 }
 0x2a0   : > { %v1457_v44 = vpop.f32.mrf.mxu1 }
 0x2a1   : > { %v3146_v57 = vpack.c.bf16 %v2272_v35, %v2271_v55  ;;  %v1971_v56 = vadd.f32 %v1924_v36, %v1737_v38  ;;  %v1503_v19 = vadd.f32 %v1457_v44, %v3881_v13 }
 0x2a2   : > { %v2160_v27 = vpop.f32.mrf.mxu0 }
 0x2a3   : > { %3182 = vst [vmem:[%s3949_s23 + $0x50] sm:$0xff] %v3146_v57   ;;  %v2205_v59 = vadd.f32 %v2158_v1, %v1971_v56 }
 0x2a5   : > { %v2241_v47 = vadd.f32 %v3938_v53, %v2205_v59 }
 0x2a6   : > { %v1692_v45 = vpop.f32.mrf.mxu2 }
 0x2a7   : > { %v1738_v31 = vadd.f32 %v1692_v45, %v1503_v19  ;;  %v1926_v34 = vpop.f32.mrf.mxu3  ;;  %v2273_v30 = vmax.f32 %v2241_v47, 0.0 }
 0x2a8   : > { %v1460_v60 = vpop.f32.mrf.mxu1 }
 0x2a9   : > { %v1972_v32 = vadd.f32 %v1926_v34, %v1738_v31  ;;  %v1504_v42 = vadd.f32 %v1460_v60, %v3886_v29 }
 0x2aa   : > { %v2163_v9 = vpop.f32.mrf.mxu0 }
 0x2ab   : > { %v2206_v18 = vadd.f32 %v2160_v27, %v1972_v32 }
 0x2ad   : > { %v2242_v21 = vadd.f32 %v3938_v53, %v2206_v18 }
 0x2ae   : > { %v1695_v63 = vpop.f32.mrf.mxu2 }
 0x2af   : > { %v2274_v49 = vmax.f32 %v2242_v21, 0.0  ;;  %v1739_v33 = vadd.f32 %v1695_v63, %v1504_v42  ;;  %v1929_v13 = vpop.f32.mrf.mxu3 }
 0x2b0   : > { %v1462_v43 = vpop.f32.mrf.mxu1 }
 0x2b1   : > { %v3151_v41 = vpack.c.bf16 %v2274_v49, %v2273_v30  ;;  %v1973_v37 = vadd.f32 %v1929_v13, %v1739_v33  ;;  %v1505_v6 = vadd.f32 %v1462_v43, %v3894_v10 }
 0x2b2   : > { %v2165_v3 = vpop.f32.mrf.mxu0 }
 0x2b3   : > { %3183 = vst [vmem:[%s3949_s23 + $0x58] sm:$0xff] %v3151_v41   ;;  %v2207_v5 = vadd.f32 %v2163_v9, %v1973_v37 }
 0x2b5   : > { %v2243_v26 = vadd.f32 %v3938_v53, %v2207_v5 }
 0x2b6   : > { %v1697_v17 = vpop.f32.mrf.mxu2 }
 0x2b7   : > { %v1740_v16 = vadd.f32 %v1697_v17, %v1505_v6  ;;  %v1931_v39 = vpop.f32.mrf.mxu3  ;;  %v2275_v0 = vmax.f32 %v2243_v26, 0.0 }
 0x2b8   : > { %v1465_v25 = vpop.f32.mrf.mxu1 }
 0x2b9   : > { %v1974_v12 = vadd.f32 %v1931_v39, %v1740_v16  ;;  %v1506_v58 = vadd.f32 %v1465_v25, %v3898_v24 }
 0x2ba   : > { %v2168_v29 = vpop.f32.mrf.mxu0 }
 0x2bb   : > { %v2208_v50 = vadd.f32 %v2165_v3, %v1974_v12 }
 0x2bd   : > { %v2244_v28 = vadd.f32 %v3938_v53, %v2208_v50 }
 0x2be   : > { %v1700_v14 = vpop.f32.mrf.mxu2 }
 0x2bf   : > { %v2276_v46 = vmax.f32 %v2244_v28, 0.0  ;;  %v1741_v20 = vadd.f32 %v1700_v14, %v1506_v58  ;;  %v1934_v10 = vpop.f32.mrf.mxu3 }
 0x2c0   : > { %v1467_v40 = vpop.f32.mrf.mxu1 }
 0x2c1   : > { %v3156_v4 = vpack.c.bf16 %v2276_v46, %v2275_v0  ;;  %v1975_v11 = vadd.f32 %v1934_v10, %v1741_v20  ;;  %v1507_v8 = vadd.f32 %v1467_v40, %v3905_v62 }
 0x2c2   : > { %v2170_v23 = vpop.f32.mrf.mxu0 }
 0x2c3   : > { %3184 = vst [vmem:[%s3949_s23 + $0x60] sm:$0xff] %v3156_v4   ;;  %v2209_v48 = vadd.f32 %v2168_v29, %v1975_v11 }
 0x2c5   : > { %v2245_v24 = vadd.f32 %v3938_v53, %v2209_v48 }
 0x2c6   : > { %v1702_v1 = vpop.f32.mrf.mxu2 }
 0x2c7   : > { %v1742_v7 = vadd.f32 %v1702_v1, %v1507_v8  ;;  %v1936_v22 = vpop.f32.mrf.mxu3  ;;  %v2277_v57 = vmax.f32 %v2245_v24, 0.0 }
 0x2c8   : > { %v1470_v54 = vpop.f32.mrf.mxu1 }
 0x2c9   : > { %v1976_v61 = vadd.f32 %v1936_v22, %v1742_v7  ;;  %v1508_v36 = vadd.f32 %v1470_v54, %v3909_v15 }
 0x2ca   : > { %v2173_v35 = vpop.f32.mrf.mxu0 }
 0x2cb   : > { %v2210_v55 = vadd.f32 %v2170_v23, %v1976_v61 }
 0x2cd   : > { %v2246_v38 = vadd.f32 %v3938_v53, %v2210_v55 }
 0x2ce   : > { %v1705_v44 = vpop.f32.mrf.mxu2 }
 0x2cf   : > { %v2278_v27 = vmax.f32 %v2246_v38, 0.0  ;;  %v1743_v56 = vadd.f32 %v1705_v44, %v1508_v36  ;;  %v1939_v62 = vpop.f32.mrf.mxu3 }
 0x2d0   : > { %v1472_v19 = vpop.f32.mrf.mxu1 }
 0x2d1   : > { %v3161_v45 = vpack.c.bf16 %v2278_v27, %v2277_v57  ;;  %v1977_v59 = vadd.f32 %v1939_v62, %v1743_v56  ;;  %v1509_v31 = vadd.f32 %v1472_v19, %v3916_v2 }
 0x2d2   : > { %v2175_v34 = vpop.f32.mrf.mxu0 }
 0x2d3   : > { %3185 = vst [vmem:[%s3949_s23 + $0x68] sm:$0xff] %v3161_v45   ;;  %v2211_v32 = vadd.f32 %v2173_v35, %v1977_v59 }
 0x2d5   : > { %v2247_v15 = vadd.f32 %v3938_v53, %v2211_v32 }
 0x2d6   : > { %v1707_v60 = vpop.f32.mrf.mxu2 }
 0x2d7   : > { %v1744_v9 = vadd.f32 %v1707_v60, %v1509_v31  ;;  %v1941_v47 = vpop.f32.mrf.mxu3  ;;  %v2279_v33 = vmax.f32 %v2247_v15, 0.0 }
 0x2d8   : > { %v1475_v18 = vpop.f32.mrf.mxu1 }
 0x2d9   : > { %v1978_v21 = vadd.f32 %v1941_v47, %v1744_v9  ;;  %v1510_v30 = vadd.f32 %v1475_v18, %v3920_v52 }
 0x2da   : > { %v2178_v41 = vpop.f32.mrf.mxu0 }
 0x2db   : > { %v2212_v42 = vadd.f32 %v2175_v34, %v1978_v21 }
 0x2dd   : > { %v2248_v63 = vadd.f32 %v3938_v53, %v2212_v42 }
 0x2de   : > { %v1710_v49 = vpop.f32.mrf.mxu2 }
 0x2df   : > { %v2280_v13 = vmax.f32 %v2248_v63, 0.0  ;;  %v1745_v43 = vadd.f32 %v1710_v49, %v1510_v30  ;;  %v1944_v2 = vpop.f32.mrf.mxu3 }
 0x2e0   : > { %v1477_v37 = vpop.f32.mrf.mxu1 }
 0x2e1   : > { %v3166_v3 = vpack.c.bf16 %v2280_v13, %v2279_v33  ;;  %v1979_v6 = vadd.f32 %v1944_v2, %v1745_v43  ;;  %v1511_v17 = vadd.f32 %v1477_v37, %v3927_v51 }
 0x2e2   : > { %v2180_v29 = vpop.f32.mrf.mxu0 }
 0x2e3   : > { %3186 = vst [vmem:[%s3949_s23 + $0x70] sm:$0xff] %v3166_v3   ;;  %v2213_v16 = vadd.f32 %v2178_v41, %v1979_v6 }
 0x2e5   : > { %v2249_v52 = vadd.f32 %v3938_v53, %v2213_v16 }
 0x2e6   : > { %v1712_v5 = vpop.f32.mrf.mxu2 }
 0x2e7   : > { %v1746_v39 = vadd.f32 %v1712_v5, %v1511_v17  ;;  %v1946_v25 = vpop.f32.mrf.mxu3  ;;  %v2281_v28 = vmax.f32 %v2249_v52, 0.0 }
 0x2e9   : > { %v1980_v12 = vadd.f32 %v1946_v25, %v1746_v39 }
 0x2eb   : > { %v2214_v26 = vadd.f32 %v2180_v29, %v1980_v12 }
 0x2ed   : > { %v2250_v50 = vadd.f32 %v3938_v53, %v2214_v26 }
 0x2ef   : > { %v2282_v58 = vmax.f32 %v2250_v50, 0.0 }
 0x2f1   : > { %v3171_v14 = vpack.c.bf16 %v2282_v58, %v2281_v28 }
 0x2f3   : > { %3187 = vst [vmem:[%s3949_s23 + $0x78] sm:$0xff] %v3171_v14  }
 0x2f4 PF: > { %s13_s12 = sadd.s32 1, %s3228_s12  }
 0x2f5   : > { %p10_p5 = scmp.ge.s32.totalorder %s13_s12, 4  }
 0x2f7   :  { %12 = sbr.rel (!%p10_p5) target bundleno = 1 (0x1), region = 72 }

</bundles_post_ra>
